<compile_context>
chip_gen: v5e
topology: v5e:2x2
jax: 0.10.0
libtpu: 0.0.40
codegen_flags: <defaults>
</compile_context>

<pallas_src>
import numpy as np
import jax
import jax.numpy as jnp
from jax.experimental import pallas as pl
from jax.experimental.pallas import tpu as pltpu

# ----------------------------------------------------------------------------
# Deterministic "parameters" (same construction as IntCordic.__init__,
# mimicking torch's float32 atan/sqrt for the table constants).
# ----------------------------------------------------------------------------
N_ITER = 16
O_ANGLE = N_ITER          # 16
O_K = 16
PI = 3.141592653589793


def make_fixed(f, bits):
    return int(f * (1 << bits))


FIXED_PI_2 = make_fixed(PI / 2, O_ANGLE)
FIXED_PI = make_fixed(PI, O_ANGLE)
FIXED_3PI_2 = make_fixed(3 * PI / 2, O_ANGLE)
FIXED_2PI = make_fixed(2 * PI, O_ANGLE)
FIXED_4_PI = make_fixed(4 / PI, O_ANGLE)

CORDIC_THETAS = [0] * (N_ITER + 1)
_k = 1.0
for _i in range(1, N_ITER + 1):
    _theta = float(np.arctan(np.float32(1.0 / 2 ** _i)))          # f32, like torch
    CORDIC_THETAS[_i] = make_fixed(_theta, O_ANGLE)
    _k *= 1.0 / float(np.sqrt(np.float32(1.0 + 2.0 ** (-2 * _i))))
K_FIX = make_fixed(_k, O_K)
FIXED_ONE = 1 << O_ANGLE

# The arithmetic octant decode below relies on these exact relationships
# between the truncated fixed-point constants (they hold for O_ANGLE=16).
# Any change to N_ITER / O_ANGLE must re-run the int64 bit-exactness test.
assert FIXED_PI == 2 * FIXED_PI_2 + 1
assert FIXED_3PI_2 == 3 * FIXED_PI_2 + 2
assert FIXED_2PI == 4 * FIXED_PI_2 + 2


# ----------------------------------------------------------------------------
# Exact wide-multiply helper (int32 only, arithmetic shifts -> floor semantics).
# ----------------------------------------------------------------------------
def _mul_shift(x, const, shift, split):
    """floor(x * const / 2**shift) without overflowing int32.

    Requires |x >> split| * const < 2**31 and (2**split) * const < 2**31.
    Exact for any signed x (floor semantics, same as torch's `>>` on int64).
    """
    x_hi = x >> split
    x_lo = x - (x_hi << split)          # in [0, 2**split)
    return ((x_hi * const) + ((x_lo * const) >> split)) >> (shift - split)


# ----------------------------------------------------------------------------
# Pallas kernel: octant reduction + 16 CORDIC iterations + quadrant fix-up,
# computed 8 rows (= 8 vregs per i32 array) at a time so the whole chain is
# register-resident.
# ----------------------------------------------------------------------------
CHUNK_ROWS = 8            # 8 rows x 1024 lanes x i32 = 8 vregs per live array


def int_cordic_kernel(g_ref, cos_ref, sin_ref):
    n_chunks = g_ref.shape[0] // CHUNK_ROWS     # static

    @pl.loop(0, n_chunks)
    def _chunk(c):
        r0 = pl.multiple_of(c * CHUNK_ROWS, CHUNK_ROWS)
        gamma = g_ref[pl.ds(r0, CHUNK_ROWS), :]             # int32 fixed-point

        # N = gamma * FIXED_4_PI >> (2 * O_ANGLE)   (>31-bit product, emulated)
        N = _mul_shift(gamma, FIXED_4_PI, 2 * O_ANGLE, split=12)
        circles = N >> 3
        N = N - (circles << 3)                               # octant index 0..7
        gamma = gamma - circles * FIXED_2PI

        # Octant reduction via arithmetic decode (replaces 7-way where ladder).
        #   idx = (N+1)>>1 in 0..4 ; m = idx*pi/2 (+ exact truncation corr.)
        #   odd N  -> gamma = m - gamma ; even N -> gamma = gamma - m
        idx = (N + 1) >> 1
        corr = jnp.clip(idx - 1, 0, 2)
        m = idx * FIXED_PI_2 + corr     # == {0, PI_2, PI, 3PI_2, 2PI} exactly
        odd = (N & 1) == 1
        gamma = jnp.where(odd, m - gamma, gamma - m)
        # idx/corr/m/odd die here; only N is carried across the loop below.

        cur_angle = gamma
        cur_cos = jnp.full_like(gamma, FIXED_ONE)
        cur_sin = jnp.zeros_like(gamma)

        for i in range(1, N_ITER + 1):                       # unrolled VPU loop
            pos = cur_angle > 0                              # strict >, as in torch
            t = CORDIC_THETAS[i]
            cur_angle = cur_angle - jnp.where(pos, jnp.int32(t), jnp.int32(-t))
            ds = cur_sin >> i
            dc = cur_cos >> i
            new_cos = jnp.where(pos, cur_cos - ds, cur_cos + ds)
            new_sin = jnp.where(pos, cur_sin + dc, cur_sin - dc)
            cur_cos, cur_sin = new_cos, new_sin

        # x * K >> O_K   (33-bit product, emulated)
        cur_cos = _mul_shift(cur_cos, K_FIX, O_K, split=8)
        cur_sin = _mul_shift(cur_sin, K_FIX, O_K, split=8)

        # Final swap / negate via bit decode of N (replaces 14-way where ladder):
        #   swap    = bit1 of (N+1) ; neg_cos = bit2 of (N+2) ; neg_sin = bit2 of N
        swap = ((N + 1) & 2) != 0
        neg_c = ((N + 2) & 4) != 0
        neg_s = (N & 4) != 0
        cos_v = jnp.where(swap, cur_sin, cur_cos)
        sin_v = jnp.where(swap, cur_cos, cur_sin)
        cos_ref[pl.ds(r0, CHUNK_ROWS), :] = jnp.where(neg_c, -cos_v, cos_v)
        sin_ref[pl.ds(r0, CHUNK_ROWS), :] = jnp.where(neg_s, -sin_v, sin_v)


# ----------------------------------------------------------------------------
# Wrapper: lane-dense re-layout + adaptive tiling.
# ----------------------------------------------------------------------------
def _round_up(x, m):
    return -(-x // m) * m


LANES = 1024                 # lane-dense last dim (multiple of 128)
DEFAULT_BLOCK_ROWS = 256     # 256 x 1024 x int32 = 1 MiB input tile


def _choose_block_rows(rows, max_block_rows):
    """Pick block height (multiple of 8): bound row-padding waste to <=12.5%
    and, when rows > 8, keep the grid at >= 2 blocks (v7x dual-TC)."""
    cap = max(8, (min(max_block_rows, rows) // 8) * 8)
    if rows > 8:
        cap = min(cap, max(8, _round_up(rows // 2, 8)))      # grid >= 2
    best = 8                                                 # zero waste always
    for br in range(8, cap + 1, 8):
        waste = _round_up(rows, br) - rows
        if 8 * waste <= rows:                                # <= 12.5% waste
            best = br
    return best


def int_cordic(gamma: jax.Array,
               block_rows: int = DEFAULT_BLOCK_ROWS,
               lanes: int = LANES):
    """Fixed-point CORDIC cos/sin.

    gamma: int32 array (any shape) of NON-NEGATIVE fixed-point angles with
    O_ANGLE (=16) fractional bits.  Input contract: angle < ~1600 rad
    (gamma < ~1.05e8) so the split-12 wide multiply stays exact in int32.
    Returns (cos_val, sin_val): int32, same shape, O_ANGLE fractional bits.
    """
    assert block_rows % 8 == 0 and lanes % 128 == 0
    orig_shape = gamma.shape
    flat = gamma.reshape(-1).astype(jnp.int32)
    n = flat.shape[0]

    # Lane-dense 2D layout; adaptive block height bounds padding waste.
    rows = max(8, _round_up(-(-n // lanes), 8))
    block_rows = _choose_block_rows(rows, block_rows)
    rows = _round_up(rows, block_rows)
    padded = rows * lanes
    flat = jnp.pad(flat, (0, padded - n))
    g2 = flat.reshape(rows, lanes)

    spec = pl.BlockSpec((block_rows, lanes), lambda i: (i, 0))
    cost = pl.CostEstimate(flops=170 * padded, transcendentals=0,
                           bytes_accessed=12 * padded)

    cos2, sin2 = pl.pallas_call(
        int_cordic_kernel,
        grid=(rows // block_rows,),
        in_specs=[spec],
        out_specs=(spec, spec),
        out_shape=(jax.ShapeDtypeStruct((rows, lanes), jnp.int32),
                   jax.ShapeDtypeStruct((rows, lanes), jnp.int32)),
        compiler_params=pltpu.CompilerParams(
            dimension_semantics=("parallel",),
            vmem_limit_bytes=32 * 1024 * 1024),
        cost_estimate=cost,
    )(g2)

    cos = cos2.reshape(-1)[:n].reshape(orig_shape)
    sin = sin2.reshape(-1)[:n].reshape(orig_shape)
    return cos, sin


# ----------------------------------------------------------------------------
# Pure numpy int64 reference (mirrors the PyTorch forward exactly).
# ----------------------------------------------------------------------------
def int_cordic_ref(gamma_np):
    g = gamma_np.astype(np.int64)
    N = (g * FIXED_4_PI) >> (2 * O_ANGLE)
    circles = N >> 3
    N = N - (circles << 3)
    g = g - circles * FIXED_2PI
    g = np.where(N == 1, FIXED_PI_2 - g, g)
    g = np.where(N == 2, g - FIXED_PI_2, g)
    g = np.where(N == 3, FIXED_PI - g, g)
    g = np.where(N == 4, g - FIXED_PI, g)
    g = np.where(N == 5, FIXED_3PI_2 - g, g)
    g = np.where(N == 6, g - FIXED_3PI_2, g)
    g = np.where(N == 7, FIXED_2PI - g, g)
    cur_angle = g
    cur_cos = np.full_like(g, FIXED_ONE)
    cur_sin = np.zeros_like(g)
    for i in range(1, N_ITER + 1):
        pos = cur_angle > 0
        na = np.where(pos, cur_angle - CORDIC_THETAS[i], cur_angle + CORDIC_THETAS[i])
        nc = np.where(pos, cur_cos - (cur_sin >> i), cur_cos + (cur_sin >> i))
        ns = np.where(pos, cur_sin + (cur_cos >> i), cur_sin - (cur_cos >> i))
        cur_angle, cur_cos, cur_sin = na, nc, ns
    cur_cos = (cur_cos * K_FIX) >> O_K
    cur_sin = (cur_sin * K_FIX) >> O_K
    cos_val = np.where(N == 1, cur_sin, cur_cos)
    sin_val = np.where(N == 1, cur_cos, cur_sin)
    cos_val = np.where(N == 2, -cur_sin, cos_val)
    sin_val = np.where(N == 2, cur_cos, sin_val)
    cos_val = np.where(N == 3, -cur_cos, cos_val)
    sin_val = np.where(N == 3, cur_sin, sin_val)
    cos_val = np.where(N == 4, -cur_cos, cos_val)
    sin_val = np.where(N == 4, -cur_sin, sin_val)
    cos_val = np.where(N == 5, -cur_sin, cos_val)
    sin_val = np.where(N == 5, -cur_cos, sin_val)
    cos_val = np.where(N == 6, cur_sin, cos_val)
    sin_val = np.where(N == 6, -cur_cos, sin_val)
    cos_val = np.where(N == 7, cur_cos, cos_val)
    sin_val = np.where(N == 7, -cur_sin, sin_val)
    return cos_val, sin_val


if __name__ == "__main__":
    key = jax.random.PRNGKey(0)
    k1, k2 = jax.random.split(key)

    # --- Test 1: small, module-consistent shape (batch=2, seq=8, dim=32) ----
    angles1 = jax.random.uniform(k1, (2, 8, 32), dtype=jnp.float32,
                                 minval=0.0, maxval=16.0 * 2.0 * PI)
    gamma1 = (angles1 * (1 << O_ANGLE)).astype(jnp.int32)
    cos1, sin1 = jax.block_until_ready(int_cordic(gamma1))

    ref_c1, ref_s1 = int_cordic_ref(np.asarray(gamma1))
    assert np.array_equal(np.asarray(cos1, dtype=np.int64), ref_c1)
    assert np.array_equal(np.asarray(sin1, dtype=np.int64), ref_s1)

    cos_f = np.asarray(cos1, dtype=np.float64) / (1 << O_ANGLE)
    sin_f = np.asarray(sin1, dtype=np.float64) / (1 << O_ANGLE)
    ang_f = np.asarray(angles1, dtype=np.float64)
    assert np.max(np.abs(cos_f - np.cos(ang_f))) < 1e-2
    assert np.max(np.abs(sin_f - np.sin(ang_f))) < 1e-2

    # --- Test 2: awkward shape + multi-step grid (exercises padding/tiling,
    #     adaptive block_rows, and the in-block chunk loop) ------------------
    angles2 = jax.random.uniform(k2, (48, 1000), dtype=jnp.float32,
                                 minval=0.0, maxval=200.0)
    gamma2 = (angles2 * (1 << O_ANGLE)).astype(jnp.int32)
    cos2, sin2 = jax.block_until_ready(int_cordic(gamma2, block_rows=16))

    ref_c2, ref_s2 = int_cordic_ref(np.asarray(gamma2))
    assert np.array_equal(np.asarray(cos2, dtype=np.int64), ref_c2)
    assert np.array_equal(np.asarray(sin2, dtype=np.int64), ref_s2)

    # --- Test 3: default block_rows path (adaptive chooser, >=2 grid blocks) -
    cos3, sin3 = jax.block_until_ready(int_cordic(gamma2))
    assert np.array_equal(np.asarray(cos3, dtype=np.int64), ref_c2)
    assert np.array_equal(np.asarray(sin3, dtype=np.int64), ref_s2)

    print("KERNEL_OK")
</pallas_src>

<mosaic_0001>
module attributes {stable_mosaic.version = 11 : i64} {
  func.func @int_cordic_kernel(%arg0: i32, %arg1: memref<8x1024xi32, #tpu.memory_space<vmem>>, %arg2: memref<8x1024xi32, #tpu.memory_space<vmem>>, %arg3: memref<8x1024xi32, #tpu.memory_space<vmem>>) attributes {dimension_semantics = [#tpu.dimension_semantics<parallel>], iteration_bounds = array<i64: 1>, scalar_prefetch = 0 : i64, scratch_operands = 0 : i64, tpu.core_type = #tpu.core_type<tc>, window_params = [{transform_indices = @transform_0, window_bounds = array<i64: 8, 1024>}, {transform_indices = @transform_1, window_bounds = array<i64: 8, 1024>}, {transform_indices = @transform_2, window_bounds = array<i64: 8, 1024>}]} {
    %c0_i32 = arith.constant 0 : i32
    %c1_i32 = arith.constant 1 : i32
    %0 = arith.muli %c0_i32, %c1_i32 : i32
    %c0_i32_0 = arith.constant 0 : i32
    %1 = arith.addi %c0_i32_0, %0 : i32
    %c8_i32 = arith.constant 8 : i32
    %2 = arith.muli %1, %c8_i32 : i32
    %3 = tpu.assume_multiple %2, 8 : i32
    %4 = arith.index_cast %3 : i32 to index
    %c0 = arith.constant 0 : index
    %5 = vector.load %arg1[%4, %c0] : memref<8x1024xi32, #tpu.memory_space<vmem>>, vector<8x1024xi32>
    %c12_i32 = arith.constant 12 : i32
    %6 = vector.broadcast %c12_i32 : i32 to vector<8x1024xi32>
    %7 = arith.shrsi %5, %6 : vector<8x1024xi32>
    %c12_i32_1 = arith.constant 12 : i32
    %8 = vector.broadcast %c12_i32_1 : i32 to vector<8x1024xi32>
    %9 = arith.shli %7, %8 : vector<8x1024xi32>
    %10 = arith.subi %5, %9 : vector<8x1024xi32>
    %c83443_i32 = arith.constant 83443 : i32
    %11 = vector.broadcast %c83443_i32 : i32 to vector<8x1024xi32>
    %12 = arith.muli %7, %11 : vector<8x1024xi32>
    %c83443_i32_2 = arith.constant 83443 : i32
    %13 = vector.broadcast %c83443_i32_2 : i32 to vector<8x1024xi32>
    %14 = arith.muli %10, %13 : vector<8x1024xi32>
    %c12_i32_3 = arith.constant 12 : i32
    %15 = vector.broadcast %c12_i32_3 : i32 to vector<8x1024xi32>
    %16 = arith.shrsi %14, %15 : vector<8x1024xi32>
    %17 = arith.addi %12, %16 : vector<8x1024xi32>
    %c20_i32 = arith.constant 20 : i32
    %18 = vector.broadcast %c20_i32 : i32 to vector<8x1024xi32>
    %19 = arith.shrsi %17, %18 : vector<8x1024xi32>
    %c3_i32 = arith.constant 3 : i32
    %20 = vector.broadcast %c3_i32 : i32 to vector<8x1024xi32>
    %21 = arith.shrsi %19, %20 : vector<8x1024xi32>
    %c3_i32_4 = arith.constant 3 : i32
    %22 = vector.broadcast %c3_i32_4 : i32 to vector<8x1024xi32>
    %23 = arith.shli %21, %22 : vector<8x1024xi32>
    %24 = arith.subi %19, %23 : vector<8x1024xi32>
    %c411774_i32 = arith.constant 411774 : i32
    %25 = vector.broadcast %c411774_i32 : i32 to vector<8x1024xi32>
    %26 = arith.muli %21, %25 : vector<8x1024xi32>
    %27 = arith.subi %5, %26 : vector<8x1024xi32>
    %c1_i32_5 = arith.constant 1 : i32
    %28 = vector.broadcast %c1_i32_5 : i32 to vector<8x1024xi32>
    %29 = arith.addi %24, %28 : vector<8x1024xi32>
    %c1_i32_6 = arith.constant 1 : i32
    %30 = vector.broadcast %c1_i32_6 : i32 to vector<8x1024xi32>
    %31 = arith.shrsi %29, %30 : vector<8x1024xi32>
    %c1_i32_7 = arith.constant 1 : i32
    %32 = vector.broadcast %c1_i32_7 : i32 to vector<8x1024xi32>
    %33 = arith.subi %31, %32 : vector<8x1024xi32>
    %c0_i32_8 = arith.constant 0 : i32
    %c2_i32 = arith.constant 2 : i32
    %34 = vector.broadcast %c0_i32_8 : i32 to vector<8x1024xi32>
    %35 = arith.maxsi %34, %33 : vector<8x1024xi32>
    %36 = vector.broadcast %c2_i32 : i32 to vector<8x1024xi32>
    %37 = arith.minsi %36, %35 : vector<8x1024xi32>
    %c102943_i32 = arith.constant 102943 : i32
    %38 = vector.broadcast %c102943_i32 : i32 to vector<8x1024xi32>
    %39 = arith.muli %31, %38 : vector<8x1024xi32>
    %40 = arith.addi %39, %37 : vector<8x1024xi32>
    %c1_i32_9 = arith.constant 1 : i32
    %41 = vector.broadcast %c1_i32_9 : i32 to vector<8x1024xi32>
    %42 = arith.andi %24, %41 : vector<8x1024xi32>
    %c1_i32_10 = arith.constant 1 : i32
    %43 = vector.broadcast %c1_i32_10 : i32 to vector<8x1024xi32>
    %44 = arith.cmpi eq, %42, %43 : vector<8x1024xi32>
    %45 = arith.subi %40, %27 : vector<8x1024xi32>
    %46 = arith.subi %27, %40 : vector<8x1024xi32>
    %47 = arith.select %44, %45, %46 : vector<8x1024xi1>, vector<8x1024xi32>
    %c65536_i32 = arith.constant 65536 : i32
    %48 = vector.broadcast %c65536_i32 : i32 to vector<8x1024xi32>
    %c0_i32_11 = arith.constant 0 : i32
    %49 = vector.broadcast %c0_i32_11 : i32 to vector<8x1024xi32>
    %c0_i32_12 = arith.constant 0 : i32
    %50 = vector.broadcast %c0_i32_12 : i32 to vector<8x1024xi32>
    %51 = arith.cmpi sgt, %47, %50 : vector<8x1024xi32>
    %c30385_i32 = arith.constant 30385 : i32
    %c-30385_i32 = arith.constant -30385 : i32
    %52 = vector.broadcast %c30385_i32 : i32 to vector<8x1024xi32>
    %53 = vector.broadcast %c-30385_i32 : i32 to vector<8x1024xi32>
    %54 = arith.select %51, %52, %53 : vector<8x1024xi1>, vector<8x1024xi32>
    %55 = arith.subi %47, %54 : vector<8x1024xi32>
    %c1_i32_13 = arith.constant 1 : i32
    %56 = vector.broadcast %c1_i32_13 : i32 to vector<8x1024xi32>
    %57 = arith.shrsi %49, %56 : vector<8x1024xi32>
    %c1_i32_14 = arith.constant 1 : i32
    %58 = vector.broadcast %c1_i32_14 : i32 to vector<8x1024xi32>
    %59 = arith.shrsi %48, %58 : vector<8x1024xi32>
    %60 = arith.subi %48, %57 : vector<8x1024xi32>
    %61 = arith.addi %48, %57 : vector<8x1024xi32>
    %62 = arith.select %51, %60, %61 : vector<8x1024xi1>, vector<8x1024xi32>
    %63 = arith.addi %49, %59 : vector<8x1024xi32>
    %64 = arith.subi %49, %59 : vector<8x1024xi32>
    %65 = arith.select %51, %63, %64 : vector<8x1024xi1>, vector<8x1024xi32>
    %c0_i32_15 = arith.constant 0 : i32
    %66 = vector.broadcast %c0_i32_15 : i32 to vector<8x1024xi32>
    %67 = arith.cmpi sgt, %55, %66 : vector<8x1024xi32>
    %c16054_i32 = arith.constant 16054 : i32
    %c-16054_i32 = arith.constant -16054 : i32
    %68 = vector.broadcast %c16054_i32 : i32 to vector<8x1024xi32>
    %69 = vector.broadcast %c-16054_i32 : i32 to vector<8x1024xi32>
    %70 = arith.select %67, %68, %69 : vector<8x1024xi1>, vector<8x1024xi32>
    %71 = arith.subi %55, %70 : vector<8x1024xi32>
    %c2_i32_16 = arith.constant 2 : i32
    %72 = vector.broadcast %c2_i32_16 : i32 to vector<8x1024xi32>
    %73 = arith.shrsi %65, %72 : vector<8x1024xi32>
    %c2_i32_17 = arith.constant 2 : i32
    %74 = vector.broadcast %c2_i32_17 : i32 to vector<8x1024xi32>
    %75 = arith.shrsi %62, %74 : vector<8x1024xi32>
    %76 = arith.subi %62, %73 : vector<8x1024xi32>
    %77 = arith.addi %62, %73 : vector<8x1024xi32>
    %78 = arith.select %67, %76, %77 : vector<8x1024xi1>, vector<8x1024xi32>
    %79 = arith.addi %65, %75 : vector<8x1024xi32>
    %80 = arith.subi %65, %75 : vector<8x1024xi32>
    %81 = arith.select %67, %79, %80 : vector<8x1024xi1>, vector<8x1024xi32>
    %c0_i32_18 = arith.constant 0 : i32
    %82 = vector.broadcast %c0_i32_18 : i32 to vector<8x1024xi32>
    %83 = arith.cmpi sgt, %71, %82 : vector<8x1024xi32>
    %c8149_i32 = arith.constant 8149 : i32
    %c-8149_i32 = arith.constant -8149 : i32
    %84 = vector.broadcast %c8149_i32 : i32 to vector<8x1024xi32>
    %85 = vector.broadcast %c-8149_i32 : i32 to vector<8x1024xi32>
    %86 = arith.select %83, %84, %85 : vector<8x1024xi1>, vector<8x1024xi32>
    %87 = arith.subi %71, %86 : vector<8x1024xi32>
    %c3_i32_19 = arith.constant 3 : i32
    %88 = vector.broadcast %c3_i32_19 : i32 to vector<8x1024xi32>
    %89 = arith.shrsi %81, %88 : vector<8x1024xi32>
    %c3_i32_20 = arith.constant 3 : i32
    %90 = vector.broadcast %c3_i32_20 : i32 to vector<8x1024xi32>
    %91 = arith.shrsi %78, %90 : vector<8x1024xi32>
    %92 = arith.subi %78, %89 : vector<8x1024xi32>
    %93 = arith.addi %78, %89 : vector<8x1024xi32>
    %94 = arith.select %83, %92, %93 : vector<8x1024xi1>, vector<8x1024xi32>
    %95 = arith.addi %81, %91 : vector<8x1024xi32>
    %96 = arith.subi %81, %91 : vector<8x1024xi32>
    %97 = arith.select %83, %95, %96 : vector<8x1024xi1>, vector<8x1024xi32>
    %c0_i32_21 = arith.constant 0 : i32
    %98 = vector.broadcast %c0_i32_21 : i32 to vector<8x1024xi32>
    %99 = arith.cmpi sgt, %87, %98 : vector<8x1024xi32>
    %c4090_i32 = arith.constant 4090 : i32
    %c-4090_i32 = arith.constant -4090 : i32
    %100 = vector.broadcast %c4090_i32 : i32 to vector<8x1024xi32>
    %101 = vector.broadcast %c-4090_i32 : i32 to vector<8x1024xi32>
    %102 = arith.select %99, %100, %101 : vector<8x1024xi1>, vector<8x1024xi32>
    %103 = arith.subi %87, %102 : vector<8x1024xi32>
    %c4_i32 = arith.constant 4 : i32
    %104 = vector.broadcast %c4_i32 : i32 to vector<8x1024xi32>
    %105 = arith.shrsi %97, %104 : vector<8x1024xi32>
    %c4_i32_22 = arith.constant 4 : i32
    %106 = vector.broadcast %c4_i32_22 : i32 to vector<8x1024xi32>
    %107 = arith.shrsi %94, %106 : vector<8x1024xi32>
    %108 = arith.subi %94, %105 : vector<8x1024xi32>
    %109 = arith.addi %94, %105 : vector<8x1024xi32>
    %110 = arith.select %99, %108, %109 : vector<8x1024xi1>, vector<8x1024xi32>
    %111 = arith.addi %97, %107 : vector<8x1024xi32>
    %112 = arith.subi %97, %107 : vector<8x1024xi32>
    %113 = arith.select %99, %111, %112 : vector<8x1024xi1>, vector<8x1024xi32>
    %c0_i32_23 = arith.constant 0 : i32
    %114 = vector.broadcast %c0_i32_23 : i32 to vector<8x1024xi32>
    %115 = arith.cmpi sgt, %103, %114 : vector<8x1024xi32>
    %c2047_i32 = arith.constant 2047 : i32
    %c-2047_i32 = arith.constant -2047 : i32
    %116 = vector.broadcast %c2047_i32 : i32 to vector<8x1024xi32>
    %117 = vector.broadcast %c-2047_i32 : i32 to vector<8x1024xi32>
    %118 = arith.select %115, %116, %117 : vector<8x1024xi1>, vector<8x1024xi32>
    %119 = arith.subi %103, %118 : vector<8x1024xi32>
    %c5_i32 = arith.constant 5 : i32
    %120 = vector.broadcast %c5_i32 : i32 to vector<8x1024xi32>
    %121 = arith.shrsi %113, %120 : vector<8x1024xi32>
    %c5_i32_24 = arith.constant 5 : i32
    %122 = vector.broadcast %c5_i32_24 : i32 to vector<8x1024xi32>
    %123 = arith.shrsi %110, %122 : vector<8x1024xi32>
    %124 = arith.subi %110, %121 : vector<8x1024xi32>
    %125 = arith.addi %110, %121 : vector<8x1024xi32>
    %126 = arith.select %115, %124, %125 : vector<8x1024xi1>, vector<8x1024xi32>
    %127 = arith.addi %113, %123 : vector<8x1024xi32>
    %128 = arith.subi %113, %123 : vector<8x1024xi32>
    %129 = arith.select %115, %127, %128 : vector<8x1024xi1>, vector<8x1024xi32>
    %c0_i32_25 = arith.constant 0 : i32
    %130 = vector.broadcast %c0_i32_25 : i32 to vector<8x1024xi32>
    %131 = arith.cmpi sgt, %119, %130 : vector<8x1024xi32>
    %c1023_i32 = arith.constant 1023 : i32
    %c-1023_i32 = arith.constant -1023 : i32
    %132 = vector.broadcast %c1023_i32 : i32 to vector<8x1024xi32>
    %133 = vector.broadcast %c-1023_i32 : i32 to vector<8x1024xi32>
    %134 = arith.select %131, %132, %133 : vector<8x1024xi1>, vector<8x1024xi32>
    %135 = arith.subi %119, %134 : vector<8x1024xi32>
    %c6_i32 = arith.constant 6 : i32
    %136 = vector.broadcast %c6_i32 : i32 to vector<8x1024xi32>
    %137 = arith.shrsi %129, %136 : vector<8x1024xi32>
    %c6_i32_26 = arith.constant 6 : i32
    %138 = vector.broadcast %c6_i32_26 : i32 to vector<8x1024xi32>
    %139 = arith.shrsi %126, %138 : vector<8x1024xi32>
    %140 = arith.subi %126, %137 : vector<8x1024xi32>
    %141 = arith.addi %126, %137 : vector<8x1024xi32>
    %142 = arith.select %131, %140, %141 : vector<8x1024xi1>, vector<8x1024xi32>
    %143 = arith.addi %129, %139 : vector<8x1024xi32>
    %144 = arith.subi %129, %139 : vector<8x1024xi32>
    %145 = arith.select %131, %143, %144 : vector<8x1024xi1>, vector<8x1024xi32>
    %c0_i32_27 = arith.constant 0 : i32
    %146 = vector.broadcast %c0_i32_27 : i32 to vector<8x1024xi32>
    %147 = arith.cmpi sgt, %135, %146 : vector<8x1024xi32>
    %c511_i32 = arith.constant 511 : i32
    %c-511_i32 = arith.constant -511 : i32
    %148 = vector.broadcast %c511_i32 : i32 to vector<8x1024xi32>
    %149 = vector.broadcast %c-511_i32 : i32 to vector<8x1024xi32>
    %150 = arith.select %147, %148, %149 : vector<8x1024xi1>, vector<8x1024xi32>
    %151 = arith.subi %135, %150 : vector<8x1024xi32>
    %c7_i32 = arith.constant 7 : i32
    %152 = vector.broadcast %c7_i32 : i32 to vector<8x1024xi32>
    %153 = arith.shrsi %145, %152 : vector<8x1024xi32>
    %c7_i32_28 = arith.constant 7 : i32
    %154 = vector.broadcast %c7_i32_28 : i32 to vector<8x1024xi32>
    %155 = arith.shrsi %142, %154 : vector<8x1024xi32>
    %156 = arith.subi %142, %153 : vector<8x1024xi32>
    %157 = arith.addi %142, %153 : vector<8x1024xi32>
    %158 = arith.select %147, %156, %157 : vector<8x1024xi1>, vector<8x1024xi32>
    %159 = arith.addi %145, %155 : vector<8x1024xi32>
    %160 = arith.subi %145, %155 : vector<8x1024xi32>
    %161 = arith.select %147, %159, %160 : vector<8x1024xi1>, vector<8x1024xi32>
    %c0_i32_29 = arith.constant 0 : i32
    %162 = vector.broadcast %c0_i32_29 : i32 to vector<8x1024xi32>
    %163 = arith.cmpi sgt, %151, %162 : vector<8x1024xi32>
    %c255_i32 = arith.constant 255 : i32
    %c-255_i32 = arith.constant -255 : i32
    %164 = vector.broadcast %c255_i32 : i32 to vector<8x1024xi32>
    %165 = vector.broadcast %c-255_i32 : i32 to vector<8x1024xi32>
    %166 = arith.select %163, %164, %165 : vector<8x1024xi1>, vector<8x1024xi32>
    %167 = arith.subi %151, %166 : vector<8x1024xi32>
    %c8_i32_30 = arith.constant 8 : i32
    %168 = vector.broadcast %c8_i32_30 : i32 to vector<8x1024xi32>
    %169 = arith.shrsi %161, %168 : vector<8x1024xi32>
    %c8_i32_31 = arith.constant 8 : i32
    %170 = vector.broadcast %c8_i32_31 : i32 to vector<8x1024xi32>
    %171 = arith.shrsi %158, %170 : vector<8x1024xi32>
    %172 = arith.subi %158, %169 : vector<8x1024xi32>
    %173 = arith.addi %158, %169 : vector<8x1024xi32>
    %174 = arith.select %163, %172, %173 : vector<8x1024xi1>, vector<8x1024xi32>
    %175 = arith.addi %161, %171 : vector<8x1024xi32>
    %176 = arith.subi %161, %171 : vector<8x1024xi32>
    %177 = arith.select %163, %175, %176 : vector<8x1024xi1>, vector<8x1024xi32>
    %c0_i32_32 = arith.constant 0 : i32
    %178 = vector.broadcast %c0_i32_32 : i32 to vector<8x1024xi32>
    %179 = arith.cmpi sgt, %167, %178 : vector<8x1024xi32>
    %c127_i32 = arith.constant 127 : i32
    %c-127_i32 = arith.constant -127 : i32
    %180 = vector.broadcast %c127_i32 : i32 to vector<8x1024xi32>
    %181 = vector.broadcast %c-127_i32 : i32 to vector<8x1024xi32>
    %182 = arith.select %179, %180, %181 : vector<8x1024xi1>, vector<8x1024xi32>
    %183 = arith.subi %167, %182 : vector<8x1024xi32>
    %c9_i32 = arith.constant 9 : i32
    %184 = vector.broadcast %c9_i32 : i32 to vector<8x1024xi32>
    %185 = arith.shrsi %177, %184 : vector<8x1024xi32>
    %c9_i32_33 = arith.constant 9 : i32
    %186 = vector.broadcast %c9_i32_33 : i32 to vector<8x1024xi32>
    %187 = arith.shrsi %174, %186 : vector<8x1024xi32>
    %188 = arith.subi %174, %185 : vector<8x1024xi32>
    %189 = arith.addi %174, %185 : vector<8x1024xi32>
    %190 = arith.select %179, %188, %189 : vector<8x1024xi1>, vector<8x1024xi32>
    %191 = arith.addi %177, %187 : vector<8x1024xi32>
    %192 = arith.subi %177, %187 : vector<8x1024xi32>
    %193 = arith.select %179, %191, %192 : vector<8x1024xi1>, vector<8x1024xi32>
    %c0_i32_34 = arith.constant 0 : i32
    %194 = vector.broadcast %c0_i32_34 : i32 to vector<8x1024xi32>
    %195 = arith.cmpi sgt, %183, %194 : vector<8x1024xi32>
    %c63_i32 = arith.constant 63 : i32
    %c-63_i32 = arith.constant -63 : i32
    %196 = vector.broadcast %c63_i32 : i32 to vector<8x1024xi32>
    %197 = vector.broadcast %c-63_i32 : i32 to vector<8x1024xi32>
    %198 = arith.select %195, %196, %197 : vector<8x1024xi1>, vector<8x1024xi32>
    %199 = arith.subi %183, %198 : vector<8x1024xi32>
    %c10_i32 = arith.constant 10 : i32
    %200 = vector.broadcast %c10_i32 : i32 to vector<8x1024xi32>
    %201 = arith.shrsi %193, %200 : vector<8x1024xi32>
    %c10_i32_35 = arith.constant 10 : i32
    %202 = vector.broadcast %c10_i32_35 : i32 to vector<8x1024xi32>
    %203 = arith.shrsi %190, %202 : vector<8x1024xi32>
    %204 = arith.subi %190, %201 : vector<8x1024xi32>
    %205 = arith.addi %190, %201 : vector<8x1024xi32>
    %206 = arith.select %195, %204, %205 : vector<8x1024xi1>, vector<8x1024xi32>
    %207 = arith.addi %193, %203 : vector<8x1024xi32>
    %208 = arith.subi %193, %203 : vector<8x1024xi32>
    %209 = arith.select %195, %207, %208 : vector<8x1024xi1>, vector<8x1024xi32>
    %c0_i32_36 = arith.constant 0 : i32
    %210 = vector.broadcast %c0_i32_36 : i32 to vector<8x1024xi32>
    %211 = arith.cmpi sgt, %199, %210 : vector<8x1024xi32>
    %c31_i32 = arith.constant 31 : i32
    %c-31_i32 = arith.constant -31 : i32
    %212 = vector.broadcast %c31_i32 : i32 to vector<8x1024xi32>
    %213 = vector.broadcast %c-31_i32 : i32 to vector<8x1024xi32>
    %214 = arith.select %211, %212, %213 : vector<8x1024xi1>, vector<8x1024xi32>
    %215 = arith.subi %199, %214 : vector<8x1024xi32>
    %c11_i32 = arith.constant 11 : i32
    %216 = vector.broadcast %c11_i32 : i32 to vector<8x1024xi32>
    %217 = arith.shrsi %209, %216 : vector<8x1024xi32>
    %c11_i32_37 = arith.constant 11 : i32
    %218 = vector.broadcast %c11_i32_37 : i32 to vector<8x1024xi32>
    %219 = arith.shrsi %206, %218 : vector<8x1024xi32>
    %220 = arith.subi %206, %217 : vector<8x1024xi32>
    %221 = arith.addi %206, %217 : vector<8x1024xi32>
    %222 = arith.select %211, %220, %221 : vector<8x1024xi1>, vector<8x1024xi32>
    %223 = arith.addi %209, %219 : vector<8x1024xi32>
    %224 = arith.subi %209, %219 : vector<8x1024xi32>
    %225 = arith.select %211, %223, %224 : vector<8x1024xi1>, vector<8x1024xi32>
    %c0_i32_38 = arith.constant 0 : i32
    %226 = vector.broadcast %c0_i32_38 : i32 to vector<8x1024xi32>
    %227 = arith.cmpi sgt, %215, %226 : vector<8x1024xi32>
    %c16_i32 = arith.constant 16 : i32
    %c-16_i32 = arith.constant -16 : i32
    %228 = vector.broadcast %c16_i32 : i32 to vector<8x1024xi32>
    %229 = vector.broadcast %c-16_i32 : i32 to vector<8x1024xi32>
    %230 = arith.select %227, %228, %229 : vector<8x1024xi1>, vector<8x1024xi32>
    %231 = arith.subi %215, %230 : vector<8x1024xi32>
    %c12_i32_39 = arith.constant 12 : i32
    %232 = vector.broadcast %c12_i32_39 : i32 to vector<8x1024xi32>
    %233 = arith.shrsi %225, %232 : vector<8x1024xi32>
    %c12_i32_40 = arith.constant 12 : i32
    %234 = vector.broadcast %c12_i32_40 : i32 to vector<8x1024xi32>
    %235 = arith.shrsi %222, %234 : vector<8x1024xi32>
    %236 = arith.subi %222, %233 : vector<8x1024xi32>
    %237 = arith.addi %222, %233 : vector<8x1024xi32>
    %238 = arith.select %227, %236, %237 : vector<8x1024xi1>, vector<8x1024xi32>
    %239 = arith.addi %225, %235 : vector<8x1024xi32>
    %240 = arith.subi %225, %235 : vector<8x1024xi32>
    %241 = arith.select %227, %239, %240 : vector<8x1024xi1>, vector<8x1024xi32>
    %c0_i32_41 = arith.constant 0 : i32
    %242 = vector.broadcast %c0_i32_41 : i32 to vector<8x1024xi32>
    %243 = arith.cmpi sgt, %231, %242 : vector<8x1024xi32>
    %c8_i32_42 = arith.constant 8 : i32
    %c-8_i32 = arith.constant -8 : i32
    %244 = vector.broadcast %c8_i32_42 : i32 to vector<8x1024xi32>
    %245 = vector.broadcast %c-8_i32 : i32 to vector<8x1024xi32>
    %246 = arith.select %243, %244, %245 : vector<8x1024xi1>, vector<8x1024xi32>
    %247 = arith.subi %231, %246 : vector<8x1024xi32>
    %c13_i32 = arith.constant 13 : i32
    %248 = vector.broadcast %c13_i32 : i32 to vector<8x1024xi32>
    %249 = arith.shrsi %241, %248 : vector<8x1024xi32>
    %c13_i32_43 = arith.constant 13 : i32
    %250 = vector.broadcast %c13_i32_43 : i32 to vector<8x1024xi32>
    %251 = arith.shrsi %238, %250 : vector<8x1024xi32>
    %252 = arith.subi %238, %249 : vector<8x1024xi32>
    %253 = arith.addi %238, %249 : vector<8x1024xi32>
    %254 = arith.select %243, %252, %253 : vector<8x1024xi1>, vector<8x1024xi32>
    %255 = arith.addi %241, %251 : vector<8x1024xi32>
    %256 = arith.subi %241, %251 : vector<8x1024xi32>
    %257 = arith.select %243, %255, %256 : vector<8x1024xi1>, vector<8x1024xi32>
    %c0_i32_44 = arith.constant 0 : i32
    %258 = vector.broadcast %c0_i32_44 : i32 to vector<8x1024xi32>
    %259 = arith.cmpi sgt, %247, %258 : vector<8x1024xi32>
    %c4_i32_45 = arith.constant 4 : i32
    %c-4_i32 = arith.constant -4 : i32
    %260 = vector.broadcast %c4_i32_45 : i32 to vector<8x1024xi32>
    %261 = vector.broadcast %c-4_i32 : i32 to vector<8x1024xi32>
    %262 = arith.select %259, %260, %261 : vector<8x1024xi1>, vector<8x1024xi32>
    %263 = arith.subi %247, %262 : vector<8x1024xi32>
    %c14_i32 = arith.constant 14 : i32
    %264 = vector.broadcast %c14_i32 : i32 to vector<8x1024xi32>
    %265 = arith.shrsi %257, %264 : vector<8x1024xi32>
    %c14_i32_46 = arith.constant 14 : i32
    %266 = vector.broadcast %c14_i32_46 : i32 to vector<8x1024xi32>
    %267 = arith.shrsi %254, %266 : vector<8x1024xi32>
    %268 = arith.subi %254, %265 : vector<8x1024xi32>
    %269 = arith.addi %254, %265 : vector<8x1024xi32>
    %270 = arith.select %259, %268, %269 : vector<8x1024xi1>, vector<8x1024xi32>
    %271 = arith.addi %257, %267 : vector<8x1024xi32>
    %272 = arith.subi %257, %267 : vector<8x1024xi32>
    %273 = arith.select %259, %271, %272 : vector<8x1024xi1>, vector<8x1024xi32>
    %c0_i32_47 = arith.constant 0 : i32
    %274 = vector.broadcast %c0_i32_47 : i32 to vector<8x1024xi32>
    %275 = arith.cmpi sgt, %263, %274 : vector<8x1024xi32>
    %c2_i32_48 = arith.constant 2 : i32
    %c-2_i32 = arith.constant -2 : i32
    %276 = vector.broadcast %c2_i32_48 : i32 to vector<8x1024xi32>
    %277 = vector.broadcast %c-2_i32 : i32 to vector<8x1024xi32>
    %278 = arith.select %275, %276, %277 : vector<8x1024xi1>, vector<8x1024xi32>
    %279 = arith.subi %263, %278 : vector<8x1024xi32>
    %c15_i32 = arith.constant 15 : i32
    %280 = vector.broadcast %c15_i32 : i32 to vector<8x1024xi32>
    %281 = arith.shrsi %273, %280 : vector<8x1024xi32>
    %c15_i32_49 = arith.constant 15 : i32
    %282 = vector.broadcast %c15_i32_49 : i32 to vector<8x1024xi32>
    %283 = arith.shrsi %270, %282 : vector<8x1024xi32>
    %284 = arith.subi %270, %281 : vector<8x1024xi32>
    %285 = arith.addi %270, %281 : vector<8x1024xi32>
    %286 = arith.select %275, %284, %285 : vector<8x1024xi1>, vector<8x1024xi32>
    %287 = arith.addi %273, %283 : vector<8x1024xi32>
    %288 = arith.subi %273, %283 : vector<8x1024xi32>
    %289 = arith.select %275, %287, %288 : vector<8x1024xi1>, vector<8x1024xi32>
    %c0_i32_50 = arith.constant 0 : i32
    %290 = vector.broadcast %c0_i32_50 : i32 to vector<8x1024xi32>
    %291 = arith.cmpi sgt, %279, %290 : vector<8x1024xi32>
    %c16_i32_51 = arith.constant 16 : i32
    %292 = vector.broadcast %c16_i32_51 : i32 to vector<8x1024xi32>
    %293 = arith.shrsi %289, %292 : vector<8x1024xi32>
    %c16_i32_52 = arith.constant 16 : i32
    %294 = vector.broadcast %c16_i32_52 : i32 to vector<8x1024xi32>
    %295 = arith.shrsi %286, %294 : vector<8x1024xi32>
    %296 = arith.subi %286, %293 : vector<8x1024xi32>
    %297 = arith.addi %286, %293 : vector<8x1024xi32>
    %298 = arith.select %291, %296, %297 : vector<8x1024xi1>, vector<8x1024xi32>
    %299 = arith.addi %289, %295 : vector<8x1024xi32>
    %300 = arith.subi %289, %295 : vector<8x1024xi32>
    %301 = arith.select %291, %299, %300 : vector<8x1024xi1>, vector<8x1024xi32>
    %c8_i32_53 = arith.constant 8 : i32
    %302 = vector.broadcast %c8_i32_53 : i32 to vector<8x1024xi32>
    %303 = arith.shrsi %298, %302 : vector<8x1024xi32>
    %c8_i32_54 = arith.constant 8 : i32
    %304 = vector.broadcast %c8_i32_54 : i32 to vector<8x1024xi32>
    %305 = arith.shli %303, %304 : vector<8x1024xi32>
    %306 = arith.subi %298, %305 : vector<8x1024xi32>
    %c56281_i32 = arith.constant 56281 : i32
    %307 = vector.broadcast %c56281_i32 : i32 to vector<8x1024xi32>
    %308 = arith.muli %303, %307 : vector<8x1024xi32>
    %c56281_i32_55 = arith.constant 56281 : i32
    %309 = vector.broadcast %c56281_i32_55 : i32 to vector<8x1024xi32>
    %310 = arith.muli %306, %309 : vector<8x1024xi32>
    %c8_i32_56 = arith.constant 8 : i32
    %311 = vector.broadcast %c8_i32_56 : i32 to vector<8x1024xi32>
    %312 = arith.shrsi %310, %311 : vector<8x1024xi32>
    %313 = arith.addi %308, %312 : vector<8x1024xi32>
    %c8_i32_57 = arith.constant 8 : i32
    %314 = vector.broadcast %c8_i32_57 : i32 to vector<8x1024xi32>
    %315 = arith.shrsi %313, %314 : vector<8x1024xi32>
    %c8_i32_58 = arith.constant 8 : i32
    %316 = vector.broadcast %c8_i32_58 : i32 to vector<8x1024xi32>
    %317 = arith.shrsi %301, %316 : vector<8x1024xi32>
    %c8_i32_59 = arith.constant 8 : i32
    %318 = vector.broadcast %c8_i32_59 : i32 to vector<8x1024xi32>
    %319 = arith.shli %317, %318 : vector<8x1024xi32>
    %320 = arith.subi %301, %319 : vector<8x1024xi32>
    %c56281_i32_60 = arith.constant 56281 : i32
    %321 = vector.broadcast %c56281_i32_60 : i32 to vector<8x1024xi32>
    %322 = arith.muli %317, %321 : vector<8x1024xi32>
    %c56281_i32_61 = arith.constant 56281 : i32
    %323 = vector.broadcast %c56281_i32_61 : i32 to vector<8x1024xi32>
    %324 = arith.muli %320, %323 : vector<8x1024xi32>
    %c8_i32_62 = arith.constant 8 : i32
    %325 = vector.broadcast %c8_i32_62 : i32 to vector<8x1024xi32>
    %326 = arith.shrsi %324, %325 : vector<8x1024xi32>
    %327 = arith.addi %322, %326 : vector<8x1024xi32>
    %c8_i32_63 = arith.constant 8 : i32
    %328 = vector.broadcast %c8_i32_63 : i32 to vector<8x1024xi32>
    %329 = arith.shrsi %327, %328 : vector<8x1024xi32>
    %c1_i32_64 = arith.constant 1 : i32
    %330 = vector.broadcast %c1_i32_64 : i32 to vector<8x1024xi32>
    %331 = arith.addi %24, %330 : vector<8x1024xi32>
    %c2_i32_65 = arith.constant 2 : i32
    %332 = vector.broadcast %c2_i32_65 : i32 to vector<8x1024xi32>
    %333 = arith.andi %331, %332 : vector<8x1024xi32>
    %c0_i32_66 = arith.constant 0 : i32
    %334 = vector.broadcast %c0_i32_66 : i32 to vector<8x1024xi32>
    %335 = arith.cmpi ne, %333, %334 : vector<8x1024xi32>
    %c2_i32_67 = arith.constant 2 : i32
    %336 = vector.broadcast %c2_i32_67 : i32 to vector<8x1024xi32>
    %337 = arith.addi %24, %336 : vector<8x1024xi32>
    %c4_i32_68 = arith.constant 4 : i32
    %338 = vector.broadcast %c4_i32_68 : i32 to vector<8x1024xi32>
    %339 = arith.andi %337, %338 : vector<8x1024xi32>
    %c0_i32_69 = arith.constant 0 : i32
    %340 = vector.broadcast %c0_i32_69 : i32 to vector<8x1024xi32>
    %341 = arith.cmpi ne, %339, %340 : vector<8x1024xi32>
    %c4_i32_70 = arith.constant 4 : i32
    %342 = vector.broadcast %c4_i32_70 : i32 to vector<8x1024xi32>
    %343 = arith.andi %24, %342 : vector<8x1024xi32>
    %c0_i32_71 = arith.constant 0 : i32
    %344 = vector.broadcast %c0_i32_71 : i32 to vector<8x1024xi32>
    %345 = arith.cmpi ne, %343, %344 : vector<8x1024xi32>
    %346 = arith.select %335, %329, %315 : vector<8x1024xi1>, vector<8x1024xi32>
    %347 = arith.select %335, %315, %329 : vector<8x1024xi1>, vector<8x1024xi32>
    %c0_i32_72 = arith.constant 0 : i32
    %348 = vector.broadcast %c0_i32_72 : i32 to vector<8x1024xi32>
    %349 = arith.subi %348, %346 : vector<8x1024xi32>
    %350 = arith.select %341, %349, %346 : vector<8x1024xi1>, vector<8x1024xi32>
    %351 = arith.index_cast %3 : i32 to index
    %c0_73 = arith.constant 0 : index
    %352 = vector.load %arg2[%351, %c0_73] : memref<8x1024xi32, #tpu.memory_space<vmem>>, vector<8x1024xi32>
    tpu.vector_store %arg2[%351, %c0_73], %350 {strides = array<i32>} : memref<8x1024xi32, #tpu.memory_space<vmem>>, vector<8x1024xi32>,
    %c0_i32_74 = arith.constant 0 : i32
    %353 = vector.broadcast %c0_i32_74 : i32 to vector<8x1024xi32>
    %354 = arith.subi %353, %347 : vector<8x1024xi32>
    %355 = arith.select %345, %354, %347 : vector<8x1024xi1>, vector<8x1024xi32>
    %356 = arith.index_cast %3 : i32 to index
    %c0_75 = arith.constant 0 : index
    %357 = vector.load %arg3[%356, %c0_75] : memref<8x1024xi32, #tpu.memory_space<vmem>>, vector<8x1024xi32>
    tpu.vector_store %arg3[%356, %c0_75], %355 {strides = array<i32>} : memref<8x1024xi32, #tpu.memory_space<vmem>>, vector<8x1024xi32>,
    %c1_i32_76 = arith.constant 1 : i32
    return
  }
  func.func @transform_0(%arg0: i32) -> (i32, i32) {
    %c0_i32 = arith.constant 0 : i32
    %c0_i32_0 = arith.constant 0 : i32
    return %arg0, %c0_i32 : i32, i32
  }
  func.func @transform_1(%arg0: i32) -> (i32, i32) {
    %c0_i32 = arith.constant 0 : i32
    %c0_i32_0 = arith.constant 0 : i32
    return %arg0, %c0_i32 : i32, i32
  }
  func.func @transform_2(%arg0: i32) -> (i32, i32) {
    %c0_i32 = arith.constant 0 : i32
    %c0_i32_0 = arith.constant 0 : i32
    return %arg0, %c0_i32 : i32, i32
  }
}

</mosaic_0001>

<bundles_post_ra>
// kernel: tpu_custom_call.1
= control target key start
LH: loop header
LB: loop body
LE: loop exit
PB: predicated region body
PF: predicated region fallthrough
CT: control target
= control target key end

     0   :  { %8 = vsyncpa [#allocation3], 0  ;;  %s4949_s0 = inlined_call_operand.hbm [shape: s32[8,1024], index: 0, kind: input, shape index: {}]   ;;  %s4950_s1 = inlined_call_operand.hbm [shape: s32[8,1024], index: 1, kind: output, shape index: {0}]   ;;  %s4951_s2 = inlined_call_operand.hbm [shape: s32[8,1024], index: 2, kind: output, shape index: {1}]  }
   0x1   :  { %9 = vsyncpa [#allocation4], 0 }
   0x2   :  { %10 = vsyncpa [#allocation7], 0  ;;  %s16_s11 = sshll.u32 %s4949_s0, 4  ;;  %s1979_s12 = smov [#allocation2]   ;;  %s17_s11 = int_to_ptr.hbm [resolvable:$true] %s16_s11 }
   0x3   :  { %s18_s13 = sshll.u32 %s1979_s12, 4  ;;  %s19_s13 = int_to_ptr.vmem [resolvable:$true] %s18_s13 }
   0x4   :  { %21 = dma.hbm_to_vmem [thread:$0]  %s17_s11, 1024, %s19_s13, [#allocation3]  }
   0x5   :  { %1973 = dma.done.wait [#allocation3], 1024  }
   0x6   :  { %1974 = vsyncadd [#allocation3], 4294966272  ;;  %v2016_v0 = vld [vmem:[#allocation2] sm:$0xff]  ;;  %v2018_v1 = vld [vmem:[#allocation2 + $0x8] sm:$0xff]  ;;  %s1996_s0 = smov [#allocation5]   ;;  %s1840_s17 = sshll.u32 %s4950_s1, 4  ;;  %s1841_s17 = int_to_ptr.hbm [resolvable:$true] %s1840_s17 }
   0x7   :  { %v2020_v2 = vld [vmem:[#allocation2 + $0x10] sm:$0xff]  ;;  %v2022_v3 = vld [vmem:[#allocation2 + $0x18] sm:$0xff]  ;;  %v2024_v4 = vld [vmem:[#allocation2 + $0x20] sm:$0xff]  ;;  %v37_v6 = vshra.s32 %v2016_v0, 12  ;;  %v38_v7 = vshra.s32 %v2018_v1, 12  ;;  %s4898_s14 = sshll.u32 %s1996_s0, 4  ;;  %s1839_s14 = int_to_ptr.vmem [resolvable:$true] %s4898_s14 }
   0x8   :  { %v2026_v5 = vld [vmem:[#allocation2 + $0x28] sm:$0xff]  ;;  %v39_v8 = vshra.s32 %v2020_v2, 12  ;;  %v2031_v9 = vld [vmem:[#allocation2 + $0x30] sm:$0xff]  ;;  %v2033_v10 = vld [vmem:[#allocation2 + $0x38] sm:$0xff]  ;;  %v40_v11 = vshra.s32 %v2022_v3, 12  ;;  %v41_v12 = vshra.s32 %v2024_v4, 12 }
   0x9   :  { %v42_v13 = vshra.s32 %v2026_v5, 12  ;;  %v43_v14 = vshra.s32 %v2031_v9, 12  ;;  %v44_v15 = vshra.s32 %v2033_v10, 12  ;;  %v45_v16 = vshll.u32 %v37_v6, 12  ;;  %s1997_s1 = smov [#allocation6]   ;;  %s1851_s21 = sshll.u32 %s4951_s2, 4  ;;  %s1852_s21 = int_to_ptr.hbm [resolvable:$true] %s1851_s21 }
   0xa   :  { %v46_v17 = vshll.u32 %v38_v7, 12  ;;  %v47_v18 = vshll.u32 %v39_v8, 12  ;;  %v48_v19 = vshll.u32 %v40_v11, 12  ;;  %v49_v20 = vshll.u32 %v41_v12, 12  ;;  %s1849_s18 = sshll.u32 %s1997_s1, 4  ;;  %s1850_s18 = int_to_ptr.vmem [resolvable:$true] %s1849_s18 }
   0xb   :  { %v50_v21 = vshll.u32 %v42_v13, 12  ;;  %v51_v22 = vshll.u32 %v43_v14, 12  ;;  %v52_v23 = vshll.u32 %v44_v15, 12  ;;  %v53_v24 = vsub.s32 %v2016_v0, %v45_v16 }
   0xc   :  { %v54_v25 = vsub.s32 %v2018_v1, %v46_v17  ;;  %v55_v26 = vsub.s32 %v2020_v2, %v47_v18  ;;  %v56_v27 = vsub.s32 %v2022_v3, %v48_v19  ;;  %v57_v28 = vsub.s32 %v2024_v4, %v49_v20 }
   0xd   :  { %v58_v29 = vsub.s32 %v2026_v5, %v50_v21  ;;  %v59_v30 = vsub.s32 %v2031_v9, %v51_v22  ;;  %v60_v31 = vsub.s32 %v2033_v10, %v52_v23  ;;  %v61_v32 = vmul.u32 83443, %v37_v6 }
   0xe   :  { %v62_v33 = vmul.u32 83443, %v38_v7  ;;  %v63_v34 = vmul.u32 83443, %v39_v8  ;;  %v64_v35 = vmul.u32 83443, %v40_v11  ;;  %v65_v36 = vmul.u32 83443, %v41_v12 }
   0xf   :  { %v66_v37 = vmul.u32 83443, %v42_v13  ;;  %v67_v38 = vmul.u32 83443, %v43_v14  ;;  %v68_v39 = vmul.u32 83443, %v44_v15  ;;  %v69_v40 = vmul.u32 83443, %v53_v24 }
  0x10   :  { %v70_v41 = vmul.u32 83443, %v54_v25  ;;  %v71_v42 = vmul.u32 83443, %v55_v26  ;;  %v72_v43 = vmul.u32 83443, %v56_v27  ;;  %v73_v44 = vmul.u32 83443, %v57_v28 }
  0x11   :  { %v74_v45 = vmul.u32 83443, %v58_v29  ;;  %v75_v46 = vmul.u32 83443, %v59_v30  ;;  %v76_v47 = vmul.u32 83443, %v60_v31  ;;  %v77_v48 = vshra.s32 %v69_v40, 12 }
  0x12   :  { %v78_v49 = vshra.s32 %v70_v41, 12  ;;  %v79_v50 = vshra.s32 %v71_v42, 12  ;;  %v80_v51 = vshra.s32 %v72_v43, 12  ;;  %v81_v52 = vshra.s32 %v73_v44, 12 }
  0x13   :  { %v82_v53 = vshra.s32 %v74_v45, 12  ;;  %v83_v54 = vshra.s32 %v75_v46, 12  ;;  %v84_v55 = vshra.s32 %v76_v47, 12  ;;  %v85_v56 = vadd.s32 %v77_v48, %v61_v32 }
  0x14   :  { %v86_v57 = vadd.s32 %v78_v49, %v62_v33  ;;  %v87_v58 = vadd.s32 %v79_v50, %v63_v34  ;;  %v88_v59 = vadd.s32 %v80_v51, %v64_v35  ;;  %v89_v60 = vadd.s32 %v81_v52, %v65_v36 }
  0x15   :  { %v90_v61 = vadd.s32 %v82_v53, %v66_v37  ;;  %v91_v62 = vadd.s32 %v83_v54, %v67_v38  ;;  %v92_v63 = vadd.s32 %v84_v55, %v68_v39  ;;  %v93_v6 = vshra.s32 %v85_v56, 20 }
  0x16   :  { %v94_v7 = vshra.s32 %v86_v57, 20  ;;  %v95_v8 = vshra.s32 %v87_v58, 20  ;;  %v96_v11 = vshra.s32 %v88_v59, 20  ;;  %v97_v12 = vshra.s32 %v89_v60, 20 }
  0x17   :  { %v98_v13 = vshra.s32 %v90_v61, 20  ;;  %v99_v14 = vshra.s32 %v91_v62, 20  ;;  %v100_v15 = vshra.s32 %v92_v63, 20  ;;  %v101_v16 = vshra.s32 %v93_v6, 3 }
  0x18   :  { %v102_v17 = vshra.s32 %v94_v7, 3  ;;  %v103_v18 = vshra.s32 %v95_v8, 3  ;;  %v104_v19 = vshra.s32 %v96_v11, 3  ;;  %v105_v20 = vshra.s32 %v97_v12, 3 }
  0x19   :  { %v106_v21 = vshra.s32 %v98_v13, 3  ;;  %v2048_v22 = vshra.s32 %v99_v14, 3  ;;  %v2050_v23 = vshra.s32 %v100_v15, 3  ;;  %v109_v24 = vshll.u32 %v101_v16, 3 }
  0x1a   :  { %v110_v25 = vshll.u32 %v102_v17, 3  ;;  %v111_v26 = vshll.u32 %v103_v18, 3  ;;  %v112_v27 = vshll.u32 %v104_v19, 3  ;;  %v113_v28 = vshll.u32 %v105_v20, 3 }
  0x1b   :  { %v114_v29 = vshll.u32 %v106_v21, 3  ;;  %v115_v30 = vshll.u32 %v2048_v22, 3  ;;  %v116_v31 = vshll.u32 %v2050_v23, 3  ;;  %v2054_v32 = vsub.s32 %v93_v6, %v109_v24 }
  0x1c   :  { %v2056_v33 = vsub.s32 %v94_v7, %v110_v25  ;;  %v2058_v34 = vsub.s32 %v95_v8, %v111_v26  ;;  %v2060_v35 = vsub.s32 %v96_v11, %v112_v27  ;;  %v2062_v36 = vsub.s32 %v97_v12, %v113_v28 }
  0x1d   :  { %4983 = vst [vmem:[#allocation11_spill] sm:$0xff] %v2054_v32  ;;  %v2064_v37 = vsub.s32 %v98_v13, %v114_v29  ;;  %v125_v38 = vmul.u32 411774, %v101_v16  ;;  %v126_v39 = vmul.u32 411774, %v102_v17  ;;  %v127_v40 = vmul.u32 411774, %v103_v18 }
  0x1e   :  { %4984 = vst [vmem:[#allocation12_spill] sm:$0xff] %v2056_v33  ;;  %v128_v41 = vmul.u32 411774, %v104_v19  ;;  %v129_v42 = vmul.u32 411774, %v105_v20  ;;  %v130_v43 = vmul.u32 411774, %v106_v21  ;;  %v2066_v44 = vsub.s32 %v99_v14, %v115_v30 }
  0x1f   :  { %4985 = vst [vmem:[#allocation13_spill] sm:$0xff] %v2058_v34  ;;  %v2068_v45 = vsub.s32 %v100_v15, %v116_v31  ;;  %v131_v46 = vmul.u32 411774, %v2048_v22  ;;  %v132_v47 = vmul.u32 411774, %v2050_v23  ;;  %v2073_v48 = vsub.s32 %v2016_v0, %v125_v38 }
  0x20   :  { %4986 = vst [vmem:[#allocation14_spill] sm:$0xff] %v2060_v35  ;;  %v2076_v49 = vsub.s32 %v2018_v1, %v126_v39  ;;  %v2079_v50 = vsub.s32 %v2020_v2, %v127_v40  ;;  %v2082_v51 = vsub.s32 %v2022_v3, %v128_v41  ;;  %v2085_v52 = vsub.s32 %v2024_v4, %v129_v42 }
  0x21   :  { %4987 = vst [vmem:[#allocation15_spill] sm:$0xff] %v2062_v36  ;;  %v2088_v53 = vsub.s32 %v2026_v5, %v130_v43  ;;  %v2091_v54 = vadd.s32 1, %v2054_v32  ;;  %v2094_v0 = vadd.s32 1, %v2056_v33  ;;  %v2097_v1 = vadd.s32 1, %v2058_v34 }
  0x22   :  { %4988 = vst [vmem:[#allocation16_spill] sm:$0xff] %v2064_v37  ;;  %v2100_v2 = vadd.s32 1, %v2060_v35  ;;  %v2103_v3 = vadd.s32 1, %v2062_v36  ;;  %v2106_v4 = vadd.s32 1, %v2064_v37  ;;  %v2109_v5 = vadd.s32 1, %v2066_v44 }
  0x23   :  { %4989 = vst [vmem:[#allocation17_spill] sm:$0xff] %v2066_v44  ;;  %v2112_v55 = vadd.s32 1, %v2068_v45  ;;  %v149_v56 = vshra.s32 %v2091_v54, 1  ;;  %v150_v57 = vshra.s32 %v2094_v0, 1  ;;  %v151_v58 = vshra.s32 %v2097_v1, 1 }
  0x24   :  { %4990 = vst [vmem:[#allocation18_spill] sm:$0xff] %v2068_v45  ;;  %v152_v59 = vshra.s32 %v2100_v2, 1  ;;  %v153_v60 = vshra.s32 %v2103_v3, 1  ;;  %v154_v61 = vshra.s32 %v2106_v4, 1  ;;  %v155_v62 = vshra.s32 %v2109_v5, 1 }
  0x25   :  { %4991 = vst [vmem:[#allocation19_spill] sm:$0xff] %v2091_v54  ;;  %v156_v63 = vshra.s32 %v2112_v55, 1  ;;  %v1866_v6 = vadd.s32 4294967295, %v149_v56  ;;  %v1867_v7 = vadd.s32 4294967295, %v150_v57  ;;  %v1868_v8 = vadd.s32 4294967295, %v151_v58 }
  0x26   :  { %4992 = vst [vmem:[#allocation20_spill] sm:$0xff] %v2094_v0  ;;  %v1869_v11 = vadd.s32 4294967295, %v152_v59  ;;  %v1870_v12 = vadd.s32 4294967295, %v153_v60  ;;  %v1871_v13 = vadd.s32 4294967295, %v154_v61  ;;  %v1872_v14 = vadd.s32 4294967295, %v155_v62 }
  0x27   :  { %4993 = vst [vmem:[#allocation21_spill] sm:$0xff] %v2097_v1  ;;  %v1873_v15 = vadd.s32 4294967295, %v156_v63  ;;  %vm165_vm0 = vcmp.gt.s32.totalorder %v1866_v6, 0  ;;  %vm167_vm1 = vcmp.gt.s32.totalorder %v1867_v7, 0  ;;  %vm169_vm2 = vcmp.gt.s32.totalorder %v1868_v8, 0 }
  0x28   :  { %4994 = vst [vmem:[#allocation22_spill] sm:$0xff] %v2100_v2  ;;  %v166_v16 = vsel %vm165_vm0, %v1866_v6, 0  ;;  %v168_v17 = vsel %vm167_vm1, %v1867_v7, 0  ;;  %vm171_vm3 = vcmp.gt.s32.totalorder %v1869_v11, 0  ;;  %v170_v18 = vsel %vm169_vm2, %v1868_v8, 0 }
  0x29   :  { %4995 = vst [vmem:[#allocation23_spill] sm:$0xff] %v2103_v3  ;;  %v172_v19 = vsel %vm171_vm3, %v1869_v11, 0  ;;  %vm173_vm4 = vcmp.gt.s32.totalorder %v1870_v12, 0  ;;  %vm175_vm5 = vcmp.gt.s32.totalorder %v1871_v13, 0  ;;  %vm177_vm6 = vcmp.gt.s32.totalorder %v1872_v14, 0 }
  0x2a   :  { %4996 = vst [vmem:[#allocation24_spill] sm:$0xff] %v2106_v4  ;;  %v174_v20 = vsel %vm173_vm4, %v1870_v12, 0  ;;  %v176_v21 = vsel %vm175_vm5, %v1871_v13, 0  ;;  %vm179_vm7 = vcmp.gt.s32.totalorder %v1873_v15, 0  ;;  %v178_v22 = vsel %vm177_vm6, %v1872_v14, 0 }
  0x2b   :  { %4997 = vst [vmem:[#allocation25_spill] sm:$0xff] %v2109_v5  ;;  %v180_v23 = vsel %vm179_vm7, %v1873_v15, 0  ;;  %vm181_vm8 = vcmp.lt.s32.totalorder %v166_v16, 2  ;;  %vm183_vm9 = vcmp.lt.s32.totalorder %v168_v17, 2  ;;  %v2123_v24 = vsub.s32 %v2031_v9, %v131_v46 }
  0x2c   :  { %4998 = vst [vmem:[#allocation26_spill] sm:$0xff] %v2112_v55  ;;  %v2126_v25 = vsub.s32 %v2033_v10, %v132_v47  ;;  %vm185_vm10 = vcmp.lt.s32.totalorder %v170_v18, 2  ;;  %vm187_vm11 = vcmp.lt.s32.totalorder %v172_v19, 2  ;;  %v182_v26 = vsel %vm181_vm8, %v166_v16, 2 }
  0x2d   :  { %v184_v27 = vsel %vm183_vm9, %v168_v17, 2  ;;  %vm189_vm12 = vcmp.lt.s32.totalorder %v174_v20, 2  ;;  %vm191_vm13 = vcmp.lt.s32.totalorder %v176_v21, 2  ;;  %v186_v28 = vsel %vm185_vm10, %v170_v18, 2 }
  0x2e   :  { %v188_v29 = vsel %vm187_vm11, %v172_v19, 2  ;;  %vm193_vm14 = vcmp.lt.s32.totalorder %v178_v22, 2  ;;  %vm195_vm15 = vcmp.lt.s32.totalorder %v180_v23, 2  ;;  %v190_v30 = vsel %vm189_vm12, %v174_v20, 2 }
  0x2f   :  { %v192_v31 = vsel %vm191_vm13, %v176_v21, 2  ;;  %v197_v38 = vmul.u32 102943, %v149_v56  ;;  %v198_v39 = vmul.u32 102943, %v150_v57  ;;  %v199_v40 = vmul.u32 102943, %v151_v58 }
  0x30   :  { %v200_v9 = vmul.u32 102943, %v152_v59  ;;  %v201_v41 = vmul.u32 102943, %v153_v60  ;;  %v202_v42 = vmul.u32 102943, %v154_v61  ;;  %v194_v10 = vsel %vm193_vm14, %v178_v22, 2 }
  0x31   :  { %v196_v43 = vsel %vm195_vm15, %v180_v23, 2  ;;  %v203_v46 = vmul.u32 102943, %v155_v62  ;;  %v204_v47 = vmul.u32 102943, %v156_v63  ;;  %v205_v6 = vadd.s32 %v197_v38, %v182_v26 }
  0x32   :  { %v206_v7 = vadd.s32 %v198_v39, %v184_v27  ;;  %v207_v8 = vadd.s32 %v199_v40, %v186_v28  ;;  %v208_v11 = vadd.s32 %v200_v9, %v188_v29  ;;  %v209_v12 = vadd.s32 %v201_v41, %v190_v30 }
  0x33   :  { %v210_v13 = vadd.s32 %v202_v42, %v192_v31  ;;  %v213_v14 = vand.u32 1, %v2054_v32  ;;  %v214_v15 = vand.u32 1, %v2056_v33  ;;  %v215_v56 = vand.u32 1, %v2058_v34 }
  0x34   :  { %v216_v57 = vand.u32 1, %v2060_v35  ;;  %v217_v58 = vand.u32 1, %v2062_v36  ;;  %v218_v59 = vand.u32 1, %v2064_v37  ;;  %v211_v60 = vadd.s32 %v203_v46, %v194_v10 }
  0x35   :  { %v212_v61 = vadd.s32 %v204_v47, %v196_v43  ;;  %v219_v62 = vand.u32 1, %v2066_v44  ;;  %v220_v63 = vand.u32 1, %v2068_v45  ;;  %vm2136_vm0 = vcmp.eq.s32.totalorder %v213_v14, 1 }
  0x36   :  { %vm2140_vm1 = vcmp.eq.s32.totalorder %v214_v15, 1  ;;  %vm2144_vm2 = vcmp.eq.s32.totalorder %v215_v56, 1  ;;  %vm2148_vm3 = vcmp.eq.s32.totalorder %v216_v57, 1  ;;  %vm2152_vm4 = vcmp.eq.s32.totalorder %v217_v58, 1 }
  0x37   :  { %vm2156_vm5 = vcmp.eq.s32.totalorder %v218_v59, 1  ;;  %v229_v22 = vsub.s32 %v205_v6, %v2073_v48  ;;  %v230_v23 = vsub.s32 %v206_v7, %v2076_v49  ;;  %v231_v26 = vsub.s32 %v207_v8, %v2079_v50 }
  0x38   :  { %v232_v27 = vsub.s32 %v208_v11, %v2082_v51  ;;  %v233_v28 = vsub.s32 %v209_v12, %v2085_v52  ;;  %v234_v29 = vsub.s32 %v210_v13, %v2088_v53  ;;  %v235_v30 = vsub.s32 %v211_v60, %v2123_v24 }
  0x39   :  { %v236_v31 = vsub.s32 %v212_v61, %v2126_v25  ;;  %v237_v38 = vsub.s32 %v2073_v48, %v205_v6  ;;  %v238_v39 = vsub.s32 %v2076_v49, %v206_v7  ;;  %v239_v40 = vsub.s32 %v2079_v50, %v207_v8 }
  0x3a   :  { %v240_v9 = vsub.s32 %v2082_v51, %v208_v11  ;;  %v241_v41 = vsub.s32 %v2085_v52, %v209_v12  ;;  %v242_v42 = vsub.s32 %v2088_v53, %v210_v13  ;;  %vm227_vm6 = vcmp.eq.s32.totalorder %v219_v62, 1 }
  0x3b   :  { %vm228_vm7 = vcmp.eq.s32.totalorder %v220_v63, 1  ;;  %v243_v10 = vsub.s32 %v2123_v24, %v211_v60  ;;  %v244_v43 = vsub.s32 %v2126_v25, %v212_v61  ;;  %v245_v46 = vsel %vm2136_vm0, %v229_v22, %v237_v38 }
  0x3c   :  { %v246_v48 = vsel %vm2140_vm1, %v230_v23, %v238_v39  ;;  %v247_v49 = vsel %vm2144_vm2, %v231_v26, %v239_v40  ;;  %v248_v50 = vsel %vm2148_vm3, %v232_v27, %v240_v9  ;;  %v249_v51 = vsel %vm2152_vm4, %v233_v28, %v241_v41 }
  0x3d   :  { %v250_v52 = vsel %vm2156_vm5, %v234_v29, %v242_v42  ;;  %v251_v53 = vsel %vm227_vm6, %v235_v30, %v243_v10  ;;  %v252_v24 = vsel %vm228_vm7, %v236_v31, %v244_v43  ;;  %vm253_vm8 = vcmp.gt.s32.totalorder %v245_v46, 0 }
  0x3e   :  { %vm254_vm9 = vcmp.gt.s32.totalorder %v246_v48, 0  ;;  %vm255_vm10 = vcmp.gt.s32.totalorder %v247_v49, 0  ;;  %vm256_vm11 = vcmp.gt.s32.totalorder %v248_v50, 0  ;;  %vm257_vm12 = vcmp.gt.s32.totalorder %v249_v51, 0 }
  0x3f   :  { %vm258_vm13 = vcmp.gt.s32.totalorder %v250_v52, 0  ;;  %vm259_vm14 = vcmp.gt.s32.totalorder %v251_v53, 0  ;;  %vm260_vm15 = vcmp.gt.s32.totalorder %v252_v24, 0  ;;  %v1980_v25 = vmov 4294936911  }
  0x40   :  { %v261_v47 = vsel %vm253_vm8, 30385, %v1980_v25  ;;  %v262_v6 = vsel %vm254_vm9, 30385, %v1980_v25  ;;  %v263_v7 = vsel %vm255_vm10, 30385, %v1980_v25  ;;  %v264_v8 = vsel %vm256_vm11, 30385, %v1980_v25 }
  0x41   :  { %v265_v11 = vsel %vm257_vm12, 30385, %v1980_v25  ;;  %v266_v12 = vsel %vm258_vm13, 30385, %v1980_v25  ;;  %v267_v13 = vsel %vm259_vm14, 30385, %v1980_v25  ;;  %v268_v14 = vsel %vm260_vm15, 30385, %v1980_v25 }
  0x42   :  { %v2196_v15 = vsub.s32 %v245_v46, %v261_v47  ;;  %v2198_v56 = vsub.s32 %v246_v48, %v262_v6  ;;  %v2200_v57 = vsub.s32 %v247_v49, %v263_v7  ;;  %v2202_v58 = vsub.s32 %v248_v50, %v264_v8 }
  0x43   :  { %v2204_v59 = vsub.s32 %v249_v51, %v265_v11  ;;  %v2206_v60 = vsub.s32 %v250_v52, %v266_v12  ;;  %v2208_v61 = vsub.s32 %v251_v53, %v267_v13  ;;  %v2210_v62 = vsub.s32 %v252_v24, %v268_v14 }
  0x44   :  { %v1981_v63 = vmov 4294934528   ;;  %vm285_vm0 = vcmp.gt.s32.totalorder %v2196_v15, 0  ;;  %vm286_vm1 = vcmp.gt.s32.totalorder %v2198_v56, 0  ;;  %vm287_vm2 = vcmp.gt.s32.totalorder %v2200_v57, 0 }
  0x45   :  { %v2213_v16 = vsel %vm253_vm8, 32768, %v1981_v63  ;;  %v2216_v17 = vsel %vm254_vm9, 32768, %v1981_v63  ;;  %v2219_v18 = vsel %vm255_vm10, 32768, %v1981_v63  ;;  %v2222_v19 = vsel %vm256_vm11, 32768, %v1981_v63 }
  0x46   :  { %v2225_v20 = vsel %vm257_vm12, 32768, %v1981_v63  ;;  %v2230_v21 = vsel %vm258_vm13, 32768, %v1981_v63  ;;  %vm288_vm3 = vcmp.gt.s32.totalorder %v2202_v58, 0  ;;  %vm289_vm4 = vcmp.gt.s32.totalorder %v2204_v59, 0 }
  0x47   :  { %v2236_v22 = vsel %vm259_vm14, 32768, %v1981_v63  ;;  %vm290_vm5 = vcmp.gt.s32.totalorder %v2206_v60, 0  ;;  %vm291_vm6 = vcmp.gt.s32.totalorder %v2208_v61, 0  ;;  %vm292_vm7 = vcmp.gt.s32.totalorder %v2210_v62, 0 }
  0x48   :  { %v2242_v23 = vsel %vm260_vm15, 32768, %v1981_v63  ;;  %v1982_v26 = vmov 4294951242   ;;  %v309_v29 = vshra.s32 %v2213_v16, 2  ;;  %v310_v39 = vshra.s32 %v2216_v17, 2 }
  0x49   :  { %v293_v27 = vsel %vm285_vm0, 16054, %v1982_v26  ;;  %v294_v28 = vsel %vm286_vm1, 16054, %v1982_v26  ;;  %v295_v30 = vsel %vm287_vm2, 16054, %v1982_v26  ;;  %v296_v31 = vsel %vm288_vm3, 16054, %v1982_v26 }
  0x4a   :  { %v297_v38 = vsel %vm289_vm4, 16054, %v1982_v26  ;;  %v298_v40 = vsel %vm290_vm5, 16054, %v1982_v26  ;;  %v299_v9 = vsel %vm291_vm6, 16054, %v1982_v26  ;;  %v300_v41 = vsel %vm292_vm7, 16054, %v1982_v26 }
  0x4b   :  { %v311_v42 = vshra.s32 %v2219_v18, 2  ;;  %v2264_v10 = vsub.s32 %v2196_v15, %v293_v27  ;;  %v2267_v43 = vsub.s32 %v2198_v56, %v294_v28  ;;  %v312_v46 = vshra.s32 %v2222_v19, 2 }
  0x4c   :  { %v313_v48 = vshra.s32 %v2225_v20, 2  ;;  %v2272_v49 = vsub.s32 %v2200_v57, %v295_v30  ;;  %v2275_v50 = vsub.s32 %v2202_v58, %v296_v31  ;;  %v2278_v51 = vsub.s32 %v2204_v59, %v297_v38 }
  0x4d   :  { %v314_v52 = vshra.s32 %v2230_v21, 2  ;;  %v315_v53 = vshra.s32 %v2236_v22, 2  ;;  %v316_v24 = vshra.s32 %v2242_v23, 2  ;;  %v317_v25 = vsub.s32 65536, %v309_v29 }
  0x4e   :  { %v318_v47 = vsub.s32 65536, %v310_v39  ;;  %v319_v6 = vsub.s32 65536, %v311_v42  ;;  %v325_v7 = vadd.s32 65536, %v309_v29  ;;  %v326_v8 = vadd.s32 65536, %v310_v39 }
  0x4f   :  { %v327_v11 = vadd.s32 65536, %v311_v42  ;;  %v320_v12 = vsub.s32 65536, %v312_v46  ;;  %v321_v13 = vsub.s32 65536, %v313_v48  ;;  %v328_v14 = vadd.s32 65536, %v312_v46 }
  0x50   :  { %v329_v63 = vadd.s32 65536, %v313_v48  ;;  %v2284_v26 = vsub.s32 %v2206_v60, %v298_v40  ;;  %v2287_v27 = vsub.s32 %v2208_v61, %v299_v9  ;;  %v2290_v28 = vsub.s32 %v2210_v62, %v300_v41 }
  0x51   :  { %v322_v30 = vsub.s32 65536, %v314_v52  ;;  %v323_v31 = vsub.s32 65536, %v315_v53  ;;  %v324_v38 = vsub.s32 65536, %v316_v24  ;;  %v330_v55 = vadd.s32 65536, %v314_v52 }
  0x52   :  { %v331_v29 = vadd.s32 65536, %v315_v53  ;;  %v332_v39 = vadd.s32 65536, %v316_v24  ;;  %v2294_v42 = vsel %vm285_vm0, %v317_v25, %v325_v7  ;;  %v2298_v40 = vsel %vm286_vm1, %v318_v47, %v326_v8 }
  0x53   :  { %v2302_v9 = vsel %vm287_vm2, %v319_v6, %v327_v11  ;;  %v2306_v41 = vsel %vm288_vm3, %v320_v12, %v328_v14  ;;  %v2310_v46 = vsel %vm289_vm4, %v321_v13, %v329_v63  ;;  %v341_v48 = vadd.s32 16384, %v2213_v16 }
  0x54   :  { %v342_v52 = vadd.s32 16384, %v2216_v17  ;;  %v343_v53 = vadd.s32 16384, %v2219_v18  ;;  %v1874_v24 = vadd.s32 4294950912, %v2213_v16  ;;  %v1875_v25 = vadd.s32 4294950912, %v2216_v17 }
  0x55   :  { %v1876_v47 = vadd.s32 4294950912, %v2219_v18  ;;  %v2320_v6 = vsel %vm290_vm5, %v322_v30, %v330_v55  ;;  %v2324_v7 = vsel %vm291_vm6, %v323_v31, %v331_v29  ;;  %v344_v8 = vadd.s32 16384, %v2222_v19 }
  0x56   :  { %v1877_v11 = vadd.s32 4294950912, %v2222_v19  ;;  %v345_v12 = vadd.s32 16384, %v2225_v20  ;;  %v346_v16 = vadd.s32 16384, %v2230_v21  ;;  %v1878_v17 = vadd.s32 4294950912, %v2225_v20 }
  0x57   :  { %v1879_v18 = vadd.s32 4294950912, %v2230_v21  ;;  %v2334_v55 = vsel %vm292_vm7, %v324_v38, %v332_v39  ;;  %v347_v13 = vadd.s32 16384, %v2236_v22  ;;  %v348_v14 = vadd.s32 16384, %v2242_v23 }
  0x58   :  { %v1880_v63 = vadd.s32 4294950912, %v2236_v22  ;;  %v1881_v19 = vadd.s32 4294950912, %v2242_v23  ;;  %v2342_v30 = vsel %vm285_vm0, %v341_v48, %v1874_v24  ;;  %v2346_v20 = vsel %vm286_vm1, %v342_v52, %v1875_v25 }
  0x59   :  { %v2350_v21 = vsel %vm287_vm2, %v343_v53, %v1876_v47  ;;  %v2354_v31 = vsel %vm288_vm3, %v344_v8, %v1877_v11  ;;  %vm365_vm8 = vcmp.gt.s32.totalorder %v2264_v10, 0  ;;  %vm366_vm9 = vcmp.gt.s32.totalorder %v2267_v43, 0 }
  0x5a   :  { %v2360_v15 = vsel %vm289_vm4, %v345_v12, %v1878_v17  ;;  %v2364_v56 = vsel %vm290_vm5, %v346_v16, %v1879_v18  ;;  %vm367_vm10 = vcmp.gt.s32.totalorder %v2272_v49, 0  ;;  %vm368_vm11 = vcmp.gt.s32.totalorder %v2275_v50, 0 }
  0x5b   :  { %vm369_vm12 = vcmp.gt.s32.totalorder %v2278_v51, 0  ;;  %vm370_vm13 = vcmp.gt.s32.totalorder %v2284_v26, 0  ;;  %vm371_vm14 = vcmp.gt.s32.totalorder %v2287_v27, 0  ;;  %vm372_vm15 = vcmp.gt.s32.totalorder %v2290_v28, 0 }
  0x5c   :  { %v2374_v57 = vsel %vm291_vm6, %v347_v13, %v1880_v63  ;;  %v2378_v58 = vsel %vm292_vm7, %v348_v14, %v1881_v19  ;;  %v1983_v59 = vmov 4294959147   ;;  %v389_v61 = vshra.s32 %v2342_v30, 3 }
  0x5d   :  { %v373_v60 = vsel %vm365_vm8, 8149, %v1983_v59  ;;  %v374_v22 = vsel %vm366_vm9, 8149, %v1983_v59  ;;  %v375_v23 = vsel %vm367_vm10, 8149, %v1983_v59  ;;  %v376_v38 = vsel %vm368_vm11, 8149, %v1983_v59 }
  0x5e   :  { %v390_v29 = vshra.s32 %v2346_v20, 3  ;;  %v377_v62 = vsel %vm369_vm12, 8149, %v1983_v59  ;;  %v378_v39 = vsel %vm370_vm13, 8149, %v1983_v59  ;;  %v379_v48 = vsel %vm371_vm14, 8149, %v1983_v59 }
  0x5f   :  { %v380_v52 = vsel %vm372_vm15, 8149, %v1983_v59  ;;  %v2399_v53 = vsub.s32 %v2264_v10, %v373_v60  ;;  %v2402_v24 = vsub.s32 %v2267_v43, %v374_v22  ;;  %v391_v25 = vshra.s32 %v2350_v21, 3 }
  0x60   :  { %v392_v47 = vshra.s32 %v2354_v31, 3  ;;  %v2407_v8 = vsub.s32 %v2272_v49, %v375_v23  ;;  %v2410_v11 = vsub.s32 %v2275_v50, %v376_v38  ;;  %v393_v12 = vshra.s32 %v2360_v15, 3 }
  0x61   :  { %v394_v16 = vshra.s32 %v2364_v56, 3  ;;  %v2415_v17 = vsub.s32 %v2278_v51, %v377_v62  ;;  %v2418_v18 = vsub.s32 %v2284_v26, %v378_v39  ;;  %v2421_v13 = vsub.s32 %v2287_v27, %v379_v48 }
  0x62   :  { %v2424_v14 = vsub.s32 %v2290_v28, %v380_v52  ;;  %v395_v63 = vshra.s32 %v2374_v57, 3  ;;  %v396_v19 = vshra.s32 %v2378_v58, 3  ;;  %v397_v59 = vshra.s32 %v2294_v42, 3 }
  0x63   :  { %v398_v60 = vshra.s32 %v2298_v40, 3  ;;  %v405_v22 = vsub.s32 %v2294_v42, %v389_v61  ;;  %v406_v23 = vsub.s32 %v2298_v40, %v390_v29  ;;  %v407_v38 = vsub.s32 %v2302_v9, %v391_v25 }
  0x64   :  { %v408_v62 = vsub.s32 %v2306_v41, %v392_v47  ;;  %v409_v39 = vsub.s32 %v2310_v46, %v393_v12  ;;  %v410_v48 = vsub.s32 %v2320_v6, %v394_v16  ;;  %v413_v52 = vadd.s32 %v389_v61, %v2294_v42 }
  0x65   :  { %v414_v5 = vadd.s32 %v390_v29, %v2298_v40  ;;  %v415_v4 = vadd.s32 %v391_v25, %v2302_v9  ;;  %v416_v3 = vadd.s32 %v392_v47, %v2306_v41  ;;  %v417_v2 = vadd.s32 %v393_v12, %v2310_v46 }
  0x66   :  { %v418_v1 = vadd.s32 %v394_v16, %v2320_v6  ;;  %v399_v45 = vshra.s32 %v2302_v9, 3  ;;  %v400_v44 = vshra.s32 %v2306_v41, 3  ;;  %v401_v0 = vshra.s32 %v2310_v46, 3 }
  0x67   :  { %v402_v54 = vshra.s32 %v2320_v6, 3  ;;  %v403_v42 = vshra.s32 %v2324_v7, 3  ;;  %v404_v40 = vshra.s32 %v2334_v55, 3  ;;  %v411_v61 = vsub.s32 %v2324_v7, %v395_v63 }
  0x68   :  { %v412_v29 = vsub.s32 %v2334_v55, %v396_v19  ;;  %v419_v25 = vadd.s32 %v395_v63, %v2324_v7  ;;  %v420_v47 = vadd.s32 %v396_v19, %v2334_v55  ;;  %v2454_v9 = vsel %vm365_vm8, %v405_v22, %v413_v52 }
  0x69   :  { %v2458_v41 = vsel %vm366_vm9, %v406_v23, %v414_v5  ;;  %v2462_v46 = vsel %vm367_vm10, %v407_v38, %v415_v4  ;;  %v2466_v6 = vsel %vm368_vm11, %v408_v62, %v416_v3  ;;  %v2470_v7 = vsel %vm369_vm12, %v409_v39, %v417_v2 }
  0x6a   :  { %v2474_v55 = vsel %vm370_vm13, %v410_v48, %v418_v1  ;;  %v429_v12 = vadd.s32 %v397_v59, %v2342_v30  ;;  %v430_v5 = vadd.s32 %v398_v60, %v2346_v20  ;;  %v437_v16 = vsub.s32 %v2342_v30, %v397_v59 }
  0x6b   :  { %v438_v4 = vsub.s32 %v2346_v20, %v398_v60  ;;  %v431_v63 = vadd.s32 %v399_v45, %v2350_v21  ;;  %v432_v3 = vadd.s32 %v400_v44, %v2354_v31  ;;  %v439_v19 = vsub.s32 %v2350_v21, %v399_v45 }
  0x6c   :  { %v440_v2 = vsub.s32 %v2354_v31, %v400_v44  ;;  %v2486_v1 = vsel %vm371_vm14, %v411_v61, %v419_v25  ;;  %v2490_v22 = vsel %vm372_vm15, %v412_v29, %v420_v47  ;;  %v433_v30 = vadd.s32 %v401_v0, %v2360_v15 }
  0x6d   :  { %v441_v20 = vsub.s32 %v2360_v15, %v401_v0  ;;  %v434_v59 = vadd.s32 %v402_v54, %v2364_v56  ;;  %v435_v60 = vadd.s32 %v403_v42, %v2374_v57  ;;  %v436_v45 = vadd.s32 %v404_v40, %v2378_v58 }
  0x6e   :  { %v442_v44 = vsub.s32 %v2364_v56, %v402_v54  ;;  %v443_v21 = vsub.s32 %v2374_v57, %v403_v42  ;;  %v444_v31 = vsub.s32 %v2378_v58, %v404_v40  ;;  %v2502_v23 = vsel %vm365_vm8, %v429_v12, %v437_v16 }
  0x6f   :  { %v2506_v38 = vsel %vm366_vm9, %v430_v5, %v438_v4  ;;  %v2510_v0 = vsel %vm367_vm10, %v431_v63, %v439_v19  ;;  %v2514_v15 = vsel %vm368_vm11, %v432_v3, %v440_v2  ;;  %vm453_vm0 = vcmp.gt.s32.totalorder %v2399_v53, 0 }
  0x70   :  { %v2519_v54 = vsel %vm369_vm12, %v433_v30, %v441_v20  ;;  %vm454_vm1 = vcmp.gt.s32.totalorder %v2402_v24, 0  ;;  %vm455_vm2 = vcmp.gt.s32.totalorder %v2407_v8, 0  ;;  %vm456_vm3 = vcmp.gt.s32.totalorder %v2410_v11, 0 }
  0x71   :  { %vm457_vm4 = vcmp.gt.s32.totalorder %v2415_v17, 0  ;;  %vm458_vm5 = vcmp.gt.s32.totalorder %v2418_v18, 0  ;;  %vm459_vm6 = vcmp.gt.s32.totalorder %v2421_v13, 0  ;;  %vm460_vm7 = vcmp.gt.s32.totalorder %v2424_v14, 0 }
  0x72   :  { %v2530_v10 = vsel %vm370_vm13, %v434_v59, %v442_v44  ;;  %v2534_v43 = vsel %vm371_vm14, %v435_v60, %v443_v21  ;;  %v2538_v49 = vsel %vm372_vm15, %v436_v45, %v444_v31  ;;  %v1984_v50 = vmov 4294963206  }
  0x73   :  { %v461_v51 = vsel %vm453_vm0, 4090, %v1984_v50  ;;  %v462_v56 = vsel %vm454_vm1, 4090, %v1984_v50  ;;  %v463_v26 = vsel %vm455_vm2, 4090, %v1984_v50  ;;  %v464_v57 = vsel %vm456_vm3, 4090, %v1984_v50 }
  0x74   :  { %v477_v27 = vshra.s32 %v2502_v23, 4  ;;  %v465_v28 = vsel %vm457_vm4, 4090, %v1984_v50  ;;  %v466_v58 = vsel %vm458_vm5, 4090, %v1984_v50  ;;  %v467_v62 = vsel %vm459_vm6, 4090, %v1984_v50 }
  0x75   :  { %v468_v39 = vsel %vm460_vm7, 4090, %v1984_v50  ;;  %v2558_v48 = vsub.s32 %v2399_v53, %v461_v51  ;;  %v478_v52 = vshra.s32 %v2506_v38, 4  ;;  %v479_v42 = vshra.s32 %v2510_v0, 4 }
  0x76   :  { %v480_v40 = vshra.s32 %v2514_v15, 4  ;;  %v2564_v61 = vsub.s32 %v2402_v24, %v462_v56  ;;  %v481_v29 = vshra.s32 %v2519_v54, 4  ;;  %v482_v25 = vshra.s32 %v2530_v10, 4 }
  0x77   :  { %v483_v47 = vshra.s32 %v2534_v43, 4  ;;  %v2570_v12 = vsub.s32 %v2407_v8, %v463_v26  ;;  %v2573_v5 = vsub.s32 %v2410_v11, %v464_v57  ;;  %v2576_v16 = vsub.s32 %v2415_v17, %v465_v28 }
  0x78   :  { %v2579_v4 = vsub.s32 %v2418_v18, %v466_v58  ;;  %v2582_v63 = vsub.s32 %v2421_v13, %v467_v62  ;;  %v2585_v3 = vsub.s32 %v2424_v14, %v468_v39  ;;  %v484_v19 = vshra.s32 %v2538_v49, 4 }
  0x79   :  { %v485_v2 = vshra.s32 %v2454_v9, 4  ;;  %v493_v30 = vsub.s32 %v2454_v9, %v477_v27  ;;  %v494_v20 = vsub.s32 %v2458_v41, %v478_v52  ;;  %v495_v59 = vsub.s32 %v2462_v46, %v479_v42 }
  0x7a   :  { %v496_v60 = vsub.s32 %v2466_v6, %v480_v40  ;;  %v497_v45 = vsub.s32 %v2470_v7, %v481_v29  ;;  %v498_v44 = vsub.s32 %v2474_v55, %v482_v25  ;;  %v499_v21 = vsub.s32 %v2486_v1, %v483_v47 }
  0x7b   :  { %v501_v31 = vadd.s32 %v477_v27, %v2454_v9  ;;  %v502_v50 = vadd.s32 %v478_v52, %v2458_v41  ;;  %v503_v51 = vadd.s32 %v479_v42, %v2462_v46  ;;  %v504_v56 = vadd.s32 %v480_v40, %v2466_v6 }
  0x7c   :  { %v505_v26 = vadd.s32 %v481_v29, %v2470_v7  ;;  %v500_v57 = vsub.s32 %v2490_v22, %v484_v19  ;;  %v506_v28 = vadd.s32 %v482_v25, %v2474_v55  ;;  %v507_v58 = vadd.s32 %v483_v47, %v2486_v1 }
  0x7d   :  { %v508_v62 = vadd.s32 %v484_v19, %v2490_v22  ;;  %v486_v39 = vshra.s32 %v2458_v41, 4  ;;  %v487_v9 = vshra.s32 %v2462_v46, 4  ;;  %v488_v27 = vshra.s32 %v2466_v6, 4 }
  0x7e   :  { %v489_v52 = vshra.s32 %v2470_v7, 4  ;;  %v490_v42 = vshra.s32 %v2474_v55, 4  ;;  %v491_v40 = vshra.s32 %v2486_v1, 4  ;;  %v492_v29 = vshra.s32 %v2490_v22, 4 }
  0x7f   :  { %v2614_v25 = vsel %vm453_vm0, %v493_v30, %v501_v31  ;;  %v2618_v47 = vsel %vm454_vm1, %v494_v20, %v502_v50  ;;  %v2622_v41 = vsel %vm455_vm2, %v495_v59, %v503_v51  ;;  %v2626_v46 = vsel %vm456_vm3, %v496_v60, %v504_v56 }
  0x80   :  { %v2630_v6 = vsel %vm457_vm4, %v497_v45, %v505_v26  ;;  %v2634_v7 = vsel %vm458_vm5, %v498_v44, %v506_v28  ;;  %v2638_v55 = vsel %vm459_vm6, %v499_v21, %v507_v58  ;;  %v2642_v1 = vsel %vm460_vm7, %v500_v57, %v508_v62 }
  0x81   :  { %v517_v22 = vadd.s32 %v485_v2, %v2502_v23  ;;  %v518_v19 = vadd.s32 %v486_v39, %v2506_v38  ;;  %v519_v30 = vadd.s32 %v487_v9, %v2510_v0  ;;  %v520_v20 = vadd.s32 %v488_v27, %v2514_v15 }
  0x82   :  { %v521_v59 = vadd.s32 %v489_v52, %v2519_v54  ;;  %v525_v60 = vsub.s32 %v2502_v23, %v485_v2  ;;  %v526_v45 = vsub.s32 %v2506_v38, %v486_v39  ;;  %v527_v44 = vsub.s32 %v2510_v0, %v487_v9 }
  0x83   :  { %v528_v21 = vsub.s32 %v2514_v15, %v488_v27  ;;  %v522_v31 = vadd.s32 %v490_v42, %v2530_v10  ;;  %v523_v50 = vadd.s32 %v491_v40, %v2534_v43  ;;  %v524_v51 = vadd.s32 %v492_v29, %v2538_v49 }
  0x84   :  { %v529_v56 = vsub.s32 %v2519_v54, %v489_v52  ;;  %v530_v26 = vsub.s32 %v2530_v10, %v490_v42  ;;  %v531_v57 = vsub.s32 %v2534_v43, %v491_v40  ;;  %v532_v23 = vsub.s32 %v2538_v49, %v492_v29 }
  0x85   :  { %vm541_vm8 = vcmp.gt.s32.totalorder %v2558_v48, 0  ;;  %vm542_vm9 = vcmp.gt.s32.totalorder %v2564_v61, 0  ;;  %vm543_vm10 = vcmp.gt.s32.totalorder %v2570_v12, 0  ;;  %vm544_vm11 = vcmp.gt.s32.totalorder %v2573_v5, 0 }
  0x86   :  { %v2666_v38 = vsel %vm453_vm0, %v517_v22, %v525_v60  ;;  %v2670_v0 = vsel %vm454_vm1, %v518_v19, %v526_v45  ;;  %v2674_v15 = vsel %vm455_vm2, %v519_v30, %v527_v44  ;;  %v2678_v54 = vsel %vm456_vm3, %v520_v20, %v528_v21 }
  0x87   :  { %vm545_vm12 = vcmp.gt.s32.totalorder %v2576_v16, 0  ;;  %vm546_vm13 = vcmp.gt.s32.totalorder %v2579_v4, 0  ;;  %vm547_vm14 = vcmp.gt.s32.totalorder %v2582_v63, 0  ;;  %vm548_vm15 = vcmp.gt.s32.totalorder %v2585_v3, 0 }
  0x88   :  { %v1985_v53 = vmov 4294965249   ;;  %v2694_v43 = vsel %vm457_vm4, %v521_v59, %v529_v56  ;;  %v2698_v49 = vsel %vm458_vm5, %v522_v31, %v530_v26  ;;  %v2702_v2 = vsel %vm459_vm6, %v523_v50, %v531_v57 }
  0x89   :  { %v549_v24 = vsel %vm541_vm8, 2047, %v1985_v53  ;;  %v550_v8 = vsel %vm542_vm9, 2047, %v1985_v53  ;;  %v551_v11 = vsel %vm543_vm10, 2047, %v1985_v53  ;;  %v552_v10 = vsel %vm544_vm11, 2047, %v1985_v53 }
  0x8a   :  { %v2706_v28 = vsel %vm460_vm7, %v524_v51, %v532_v23  ;;  %v553_v58 = vsel %vm545_vm12, 2047, %v1985_v53  ;;  %v554_v17 = vsel %vm546_vm13, 2047, %v1985_v53  ;;  %v555_v62 = vsel %vm547_vm14, 2047, %v1985_v53 }
  0x8b   :  { %v556_v18 = vsel %vm548_vm15, 2047, %v1985_v53  ;;  %v2717_v13 = vsub.s32 %v2558_v48, %v549_v24  ;;  %v2720_v39 = vsub.s32 %v2564_v61, %v550_v8  ;;  %v2723_v14 = vsub.s32 %v2570_v12, %v551_v11 }
  0x8c   :  { %v2726_v9 = vsub.s32 %v2573_v5, %v552_v10  ;;  %v565_v27 = vshra.s32 %v2666_v38, 5  ;;  %v566_v52 = vshra.s32 %v2670_v0, 5  ;;  %v567_v42 = vshra.s32 %v2674_v15, 5 }
  0x8d   :  { %v568_v40 = vshra.s32 %v2678_v54, 5  ;;  %v2733_v29 = vsub.s32 %v2576_v16, %v553_v58  ;;  %v2736_v22 = vsub.s32 %v2579_v4, %v554_v17  ;;  %v2739_v19 = vsub.s32 %v2582_v63, %v555_v62 }
  0x8e   :  { %v2742_v30 = vsub.s32 %v2585_v3, %v556_v18  ;;  %v569_v20 = vshra.s32 %v2694_v43, 5  ;;  %v570_v59 = vshra.s32 %v2698_v49, 5  ;;  %v571_v60 = vshra.s32 %v2702_v2, 5 }
  0x8f   :  { %v572_v45 = vshra.s32 %v2706_v28, 5  ;;  %v573_v44 = vshra.s32 %v2614_v25, 5  ;;  %v574_v21 = vshra.s32 %v2618_v47, 5  ;;  %v575_v31 = vshra.s32 %v2622_v41, 5 }
  0x90   :  { %v576_v50 = vshra.s32 %v2626_v46, 5  ;;  %v581_v51 = vsub.s32 %v2614_v25, %v565_v27  ;;  %v582_v56 = vsub.s32 %v2618_v47, %v566_v52  ;;  %v583_v26 = vsub.s32 %v2622_v41, %v567_v42 }
  0x91   :  { %v584_v57 = vsub.s32 %v2626_v46, %v568_v40  ;;  %v589_v23 = vadd.s32 %v565_v27, %v2614_v25  ;;  %v590_v53 = vadd.s32 %v566_v52, %v2618_v47  ;;  %v591_v24 = vadd.s32 %v567_v42, %v2622_v41 }
  0x92   :  { %v592_v8 = vadd.s32 %v568_v40, %v2626_v46  ;;  %v585_v11 = vsub.s32 %v2630_v6, %v569_v20  ;;  %v586_v10 = vsub.s32 %v2634_v7, %v570_v59  ;;  %v593_v58 = vadd.s32 %v569_v20, %v2630_v6 }
  0x93   :  { %v594_v17 = vadd.s32 %v570_v59, %v2634_v7  ;;  %v577_v62 = vshra.s32 %v2630_v6, 5  ;;  %v578_v18 = vshra.s32 %v2634_v7, 5  ;;  %v579_v25 = vshra.s32 %v2638_v55, 5 }
  0x94   :  { %v580_v47 = vshra.s32 %v2642_v1, 5  ;;  %v587_v41 = vsub.s32 %v2638_v55, %v571_v60  ;;  %v588_v46 = vsub.s32 %v2642_v1, %v572_v45  ;;  %v595_v27 = vadd.s32 %v571_v60, %v2638_v55 }
  0x95   :  { %v596_v52 = vadd.s32 %v572_v45, %v2642_v1  ;;  %v2774_v42 = vsel %vm541_vm8, %v581_v51, %v589_v23  ;;  %v2778_v6 = vsel %vm542_vm9, %v582_v56, %v590_v53  ;;  %v2782_v7 = vsel %vm543_vm10, %v583_v26, %v591_v24 }
  0x96   :  { %v2786_v40 = vsel %vm544_vm11, %v584_v57, %v592_v8  ;;  %v2790_v55 = vsel %vm545_vm12, %v585_v11, %v593_v58  ;;  %v2794_v1 = vsel %vm546_vm13, %v586_v10, %v594_v17  ;;  %v605_v20 = vadd.s32 %v573_v44, %v2666_v38 }
  0x97   :  { %v606_v59 = vadd.s32 %v574_v21, %v2670_v0  ;;  %v607_v60 = vadd.s32 %v575_v31, %v2674_v15  ;;  %v613_v45 = vsub.s32 %v2666_v38, %v573_v44  ;;  %v614_v51 = vsub.s32 %v2670_v0, %v574_v21 }
  0x98   :  { %v615_v56 = vsub.s32 %v2674_v15, %v575_v31  ;;  %v2804_v26 = vsel %vm547_vm14, %v587_v41, %v595_v27  ;;  %v2808_v57 = vsel %vm548_vm15, %v588_v46, %v596_v52  ;;  %v608_v23 = vadd.s32 %v576_v50, %v2678_v54 }
  0x99   :  { %v609_v53 = vadd.s32 %v577_v62, %v2694_v43  ;;  %v610_v24 = vadd.s32 %v578_v18, %v2698_v49  ;;  %v611_v38 = vadd.s32 %v579_v25, %v2702_v2  ;;  %v612_v0 = vadd.s32 %v580_v47, %v2706_v28 }
  0x9a   :  { %v616_v15 = vsub.s32 %v2678_v54, %v576_v50  ;;  %v617_v44 = vsub.s32 %v2694_v43, %v577_v62  ;;  %v618_v21 = vsub.s32 %v2698_v49, %v578_v18  ;;  %v619_v31 = vsub.s32 %v2702_v2, %v579_v25 }
  0x9b   :  { %v620_v8 = vsub.s32 %v2706_v28, %v580_v47  ;;  %v2822_v11 = vsel %vm541_vm8, %v605_v20, %v613_v45  ;;  %v2826_v10 = vsel %vm542_vm9, %v606_v59, %v614_v51  ;;  %v2830_v58 = vsel %vm543_vm10, %v607_v60, %v615_v56 }
  0x9c   :  { %vm629_vm0 = vcmp.gt.s32.totalorder %v2717_v13, 0  ;;  %vm630_vm1 = vcmp.gt.s32.totalorder %v2720_v39, 0  ;;  %vm631_vm2 = vcmp.gt.s32.totalorder %v2723_v14, 0  ;;  %vm632_vm3 = vcmp.gt.s32.totalorder %v2726_v9, 0 }
  0x9d   :  { %vm633_vm4 = vcmp.gt.s32.totalorder %v2733_v29, 0  ;;  %vm634_vm5 = vcmp.gt.s32.totalorder %v2736_v22, 0  ;;  %vm635_vm6 = vcmp.gt.s32.totalorder %v2739_v19, 0  ;;  %vm636_vm7 = vcmp.gt.s32.totalorder %v2742_v30, 0 }
  0x9e   :  { %v2842_v48 = vsel %vm544_vm11, %v608_v23, %v616_v15  ;;  %v2846_v61 = vsel %vm545_vm12, %v609_v53, %v617_v44  ;;  %v2850_v12 = vsel %vm546_vm13, %v610_v24, %v618_v21  ;;  %v2854_v54 = vsel %vm547_vm14, %v611_v38, %v619_v31 }
  0x9f   :  { %v1986_v43 = vmov 4294966273   ;;  %v2874_v17 = vsel %vm548_vm15, %v612_v0, %v620_v8  ;;  %v653_v62 = vshra.s32 %v2822_v11, 6  ;;  %v654_v18 = vshra.s32 %v2826_v10, 6 }
  0xa0   :  { %v637_v49 = vsel %vm629_vm0, 1023, %v1986_v43  ;;  %v638_v5 = vsel %vm630_vm1, 1023, %v1986_v43  ;;  %v639_v16 = vsel %vm631_vm2, 1023, %v1986_v43  ;;  %v640_v2 = vsel %vm632_vm3, 1023, %v1986_v43 }
  0xa1   :  { %v641_v4 = vsel %vm633_vm4, 1023, %v1986_v43  ;;  %v642_v63 = vsel %vm634_vm5, 1023, %v1986_v43  ;;  %v643_v28 = vsel %vm635_vm6, 1023, %v1986_v43  ;;  %v644_v50 = vsel %vm636_vm7, 1023, %v1986_v43 }
  0xa2   :  { %v655_v25 = vshra.s32 %v2830_v58, 6  ;;  %v2880_v47 = vsub.s32 %v2717_v13, %v637_v49  ;;  %v2883_v41 = vsub.s32 %v2720_v39, %v638_v5  ;;  %v2886_v46 = vsub.s32 %v2723_v14, %v639_v16 }
  0xa3   :  { %v2889_v27 = vsub.s32 %v2726_v9, %v640_v2  ;;  %v2892_v3 = vsub.s32 %v2733_v29, %v641_v4  ;;  %v2895_v52 = vsub.s32 %v2736_v22, %v642_v63  ;;  %v2898_v20 = vsub.s32 %v2739_v19, %v643_v28 }
  0xa4   :  { %v2901_v59 = vsub.s32 %v2742_v30, %v644_v50  ;;  %v656_v60 = vshra.s32 %v2842_v48, 6  ;;  %v657_v45 = vshra.s32 %v2846_v61, 6  ;;  %v658_v51 = vshra.s32 %v2850_v12, 6 }
  0xa5   :  { %v659_v56 = vshra.s32 %v2854_v54, 6  ;;  %v660_v23 = vshra.s32 %v2874_v17, 6  ;;  %v661_v53 = vshra.s32 %v2774_v42, 6  ;;  %v662_v24 = vshra.s32 %v2778_v6, 6 }
  0xa6   :  { %v663_v38 = vshra.s32 %v2782_v7, 6  ;;  %v664_v0 = vshra.s32 %v2786_v40, 6  ;;  %v665_v15 = vshra.s32 %v2790_v55, 6  ;;  %v669_v44 = vsub.s32 %v2774_v42, %v653_v62 }
  0xa7   :  { %v670_v21 = vsub.s32 %v2778_v6, %v654_v18  ;;  %v671_v31 = vsub.s32 %v2782_v7, %v655_v25  ;;  %v677_v8 = vadd.s32 %v653_v62, %v2774_v42  ;;  %v678_v43 = vadd.s32 %v654_v18, %v2778_v6 }
  0xa8   :  { %v679_v49 = vadd.s32 %v655_v25, %v2782_v7  ;;  %v672_v5 = vsub.s32 %v2786_v40, %v656_v60  ;;  %v673_v16 = vsub.s32 %v2790_v55, %v657_v45  ;;  %v680_v2 = vadd.s32 %v656_v60, %v2786_v40 }
  0xa9   :  { %v681_v4 = vadd.s32 %v657_v45, %v2790_v55  ;;  %v666_v63 = vshra.s32 %v2794_v1, 6  ;;  %v667_v28 = vshra.s32 %v2804_v26, 6  ;;  %v668_v50 = vshra.s32 %v2808_v57, 6 }
  0xaa   :  { %v674_v42 = vsub.s32 %v2794_v1, %v658_v51  ;;  %v675_v6 = vsub.s32 %v2804_v26, %v659_v56  ;;  %v676_v7 = vsub.s32 %v2808_v57, %v660_v23  ;;  %v682_v62 = vadd.s32 %v658_v51, %v2794_v1 }
  0xab   :  { %v683_v18 = vadd.s32 %v659_v56, %v2804_v26  ;;  %v684_v40 = vadd.s32 %v660_v23, %v2808_v57  ;;  %v2934_v55 = vsel %vm629_vm0, %v669_v44, %v677_v8  ;;  %v2938_v25 = vsel %vm630_vm1, %v670_v21, %v678_v43 }
  0xac   :  { %v2942_v60 = vsel %vm631_vm2, %v671_v31, %v679_v49  ;;  %v2946_v45 = vsel %vm632_vm3, %v672_v5, %v680_v2  ;;  %v2950_v1 = vsel %vm633_vm4, %v673_v16, %v681_v4  ;;  %v693_v26 = vadd.s32 %v661_v53, %v2822_v11 }
  0xad   :  { %v694_v57 = vadd.s32 %v662_v24, %v2826_v10  ;;  %v695_v51 = vadd.s32 %v663_v38, %v2830_v58  ;;  %v701_v56 = vsub.s32 %v2822_v11, %v661_v53  ;;  %v702_v23 = vsub.s32 %v2826_v10, %v662_v24 }
  0xae   :  { %v703_v44 = vsub.s32 %v2830_v58, %v663_v38  ;;  %v2960_v21 = vsel %vm634_vm5, %v674_v42, %v682_v62  ;;  %v2964_v31 = vsel %vm635_vm6, %v675_v6, %v683_v18  ;;  %v696_v8 = vadd.s32 %v664_v0, %v2842_v48 }
  0xaf   :  { %v704_v43 = vsub.s32 %v2842_v48, %v664_v0  ;;  %v697_v49 = vadd.s32 %v665_v15, %v2846_v61  ;;  %v698_v11 = vadd.s32 %v666_v63, %v2850_v12  ;;  %v705_v10 = vsub.s32 %v2846_v61, %v665_v15 }
  0xb0   :  { %v706_v58 = vsub.s32 %v2850_v12, %v666_v63  ;;  %v2974_v53 = vsel %vm636_vm7, %v676_v7, %v684_v40  ;;  %v699_v24 = vadd.s32 %v667_v28, %v2854_v54  ;;  %v700_v38 = vadd.s32 %v668_v50, %v2874_v17 }
  0xb1   :  { %v707_v5 = vsub.s32 %v2854_v54, %v667_v28  ;;  %v708_v48 = vsub.s32 %v2874_v17, %v668_v50  ;;  %v2982_v0 = vsel %vm629_vm0, %v693_v26, %v701_v56  ;;  %v2986_v61 = vsel %vm630_vm1, %v694_v57, %v702_v23 }
  0xb2   :  { %v2990_v12 = vsel %vm631_vm2, %v695_v51, %v703_v44  ;;  %v2994_v15 = vsel %vm632_vm3, %v696_v8, %v704_v43  ;;  %vm717_vm8 = vcmp.gt.s32.totalorder %v2880_v47, 0  ;;  %vm718_vm9 = vcmp.gt.s32.totalorder %v2883_v41, 0 }
  0xb3   :  { %v3000_v13 = vsel %vm633_vm4, %v697_v49, %v705_v10  ;;  %v3004_v39 = vsel %vm634_vm5, %v698_v11, %v706_v58  ;;  %vm719_vm10 = vcmp.gt.s32.totalorder %v2886_v46, 0  ;;  %vm720_vm11 = vcmp.gt.s32.totalorder %v2889_v27, 0 }
  0xb4   :  { %vm721_vm12 = vcmp.gt.s32.totalorder %v2892_v3, 0  ;;  %vm722_vm13 = vcmp.gt.s32.totalorder %v2895_v52, 0  ;;  %vm723_vm14 = vcmp.gt.s32.totalorder %v2898_v20, 0  ;;  %vm724_vm15 = vcmp.gt.s32.totalorder %v2901_v59, 0 }
  0xb5   :  { %v3014_v14 = vsel %vm635_vm6, %v699_v24, %v707_v5  ;;  %v3018_v9 = vsel %vm636_vm7, %v700_v38, %v708_v48  ;;  %v1987_v29 = vmov 4294966785   ;;  %v741_v19 = vshra.s32 %v2982_v0, 7 }
  0xb6   :  { %v725_v22 = vsel %vm717_vm8, 511, %v1987_v29  ;;  %v726_v54 = vsel %vm718_vm9, 511, %v1987_v29  ;;  %v727_v17 = vsel %vm719_vm10, 511, %v1987_v29  ;;  %v728_v16 = vsel %vm720_vm11, 511, %v1987_v29 }
  0xb7   :  { %v742_v2 = vshra.s32 %v2986_v61, 7  ;;  %v729_v30 = vsel %vm721_vm12, 511, %v1987_v29  ;;  %v730_v4 = vsel %vm722_vm13, 511, %v1987_v29  ;;  %v731_v63 = vsel %vm723_vm14, 511, %v1987_v29 }
  0xb8   :  { %v732_v28 = vsel %vm724_vm15, 511, %v1987_v29  ;;  %v3039_v50 = vsub.s32 %v2880_v47, %v725_v22  ;;  %v3042_v42 = vsub.s32 %v2883_v41, %v726_v54  ;;  %v743_v6 = vshra.s32 %v2990_v12, 7 }
  0xb9   :  { %v744_v7 = vshra.s32 %v2994_v15, 7  ;;  %v3047_v62 = vsub.s32 %v2886_v46, %v727_v17  ;;  %v3050_v18 = vsub.s32 %v2889_v27, %v728_v16  ;;  %v745_v40 = vshra.s32 %v3000_v13, 7 }
  0xba   :  { %v746_v26 = vshra.s32 %v3004_v39, 7  ;;  %v3055_v57 = vsub.s32 %v2892_v3, %v729_v30  ;;  %v3058_v51 = vsub.s32 %v2895_v52, %v730_v4  ;;  %v3061_v56 = vsub.s32 %v2898_v20, %v731_v63 }
  0xbb   :  { %v3064_v23 = vsub.s32 %v2901_v59, %v732_v28  ;;  %v747_v44 = vshra.s32 %v3014_v14, 7  ;;  %v748_v8 = vshra.s32 %v3018_v9, 7  ;;  %v749_v43 = vshra.s32 %v2934_v55, 7 }
  0xbc   :  { %v750_v49 = vshra.s32 %v2938_v25, 7  ;;  %v757_v11 = vsub.s32 %v2934_v55, %v741_v19  ;;  %v758_v10 = vsub.s32 %v2938_v25, %v742_v2  ;;  %v759_v58 = vsub.s32 %v2942_v60, %v743_v6 }
  0xbd   :  { %v760_v24 = vsub.s32 %v2946_v45, %v744_v7  ;;  %v761_v38 = vsub.s32 %v2950_v1, %v745_v40  ;;  %v762_v5 = vsub.s32 %v2960_v21, %v746_v26  ;;  %v765_v48 = vadd.s32 %v741_v19, %v2934_v55 }
  0xbe   :  { %v766_v29 = vadd.s32 %v742_v2, %v2938_v25  ;;  %v767_v22 = vadd.s32 %v743_v6, %v2942_v60  ;;  %v768_v54 = vadd.s32 %v744_v7, %v2946_v45  ;;  %v769_v17 = vadd.s32 %v745_v40, %v2950_v1 }
  0xbf   :  { %v770_v16 = vadd.s32 %v746_v26, %v2960_v21  ;;  %v751_v30 = vshra.s32 %v2942_v60, 7  ;;  %v752_v4 = vshra.s32 %v2946_v45, 7  ;;  %v753_v63 = vshra.s32 %v2950_v1, 7 }
  0xc0   :  { %v754_v28 = vshra.s32 %v2960_v21, 7  ;;  %v755_v55 = vshra.s32 %v2964_v31, 7  ;;  %v756_v25 = vshra.s32 %v2974_v53, 7  ;;  %v763_v19 = vsub.s32 %v2964_v31, %v747_v44 }
  0xc1   :  { %v764_v2 = vsub.s32 %v2974_v53, %v748_v8  ;;  %v771_v6 = vadd.s32 %v747_v44, %v2964_v31  ;;  %v772_v7 = vadd.s32 %v748_v8, %v2974_v53  ;;  %v3094_v60 = vsel %vm717_vm8, %v757_v11, %v765_v48 }
  0xc2   :  { %v3098_v45 = vsel %vm718_vm9, %v758_v10, %v766_v29  ;;  %v3102_v1 = vsel %vm719_vm10, %v759_v58, %v767_v22  ;;  %v3106_v21 = vsel %vm720_vm11, %v760_v24, %v768_v54  ;;  %v3110_v31 = vsel %vm721_vm12, %v761_v38, %v769_v17 }
  0xc3   :  { %v3114_v53 = vsel %vm722_vm13, %v762_v5, %v770_v16  ;;  %v781_v40 = vadd.s32 %v749_v43, %v2982_v0  ;;  %v782_v26 = vadd.s32 %v750_v49, %v2986_v61  ;;  %v789_v44 = vsub.s32 %v2982_v0, %v749_v43 }
  0xc4   :  { %v790_v8 = vsub.s32 %v2986_v61, %v750_v49  ;;  %v783_v11 = vadd.s32 %v751_v30, %v2990_v12  ;;  %v784_v10 = vadd.s32 %v752_v4, %v2994_v15  ;;  %v791_v58 = vsub.s32 %v2990_v12, %v751_v30 }
  0xc5   :  { %v792_v24 = vsub.s32 %v2994_v15, %v752_v4  ;;  %v3126_v38 = vsel %vm723_vm14, %v763_v19, %v771_v6  ;;  %v3130_v5 = vsel %vm724_vm15, %v764_v2, %v772_v7  ;;  %v785_v0 = vadd.s32 %v753_v63, %v3000_v13 }
  0xc6   :  { %v793_v61 = vsub.s32 %v3000_v13, %v753_v63  ;;  %v786_v43 = vadd.s32 %v754_v28, %v3004_v39  ;;  %v787_v49 = vadd.s32 %v755_v55, %v3014_v14  ;;  %v788_v12 = vadd.s32 %v756_v25, %v3018_v9 }
  0xc7   :  { %v794_v15 = vsub.s32 %v3004_v39, %v754_v28  ;;  %v795_v48 = vsub.s32 %v3014_v14, %v755_v55  ;;  %v796_v29 = vsub.s32 %v3018_v9, %v756_v25  ;;  %v3142_v22 = vsel %vm717_vm8, %v781_v40, %v789_v44 }
  0xc8   :  { %v3146_v54 = vsel %vm718_vm9, %v782_v26, %v790_v8  ;;  %v3150_v13 = vsel %vm719_vm10, %v783_v11, %v791_v58  ;;  %v3154_v17 = vsel %vm720_vm11, %v784_v10, %v792_v24  ;;  %vm805_vm0 = vcmp.gt.s32.totalorder %v3039_v50, 0 }
  0xc9   :  { %v3159_v39 = vsel %vm721_vm12, %v785_v0, %v793_v61  ;;  %vm806_vm1 = vcmp.gt.s32.totalorder %v3042_v42, 0  ;;  %vm807_vm2 = vcmp.gt.s32.totalorder %v3047_v62, 0  ;;  %vm808_vm3 = vcmp.gt.s32.totalorder %v3050_v18, 0 }
  0xca   :  { %vm809_vm4 = vcmp.gt.s32.totalorder %v3055_v57, 0  ;;  %vm810_vm5 = vcmp.gt.s32.totalorder %v3058_v51, 0  ;;  %vm811_vm6 = vcmp.gt.s32.totalorder %v3061_v56, 0  ;;  %vm812_vm7 = vcmp.gt.s32.totalorder %v3064_v23, 0 }
  0xcb   :  { %v3170_v47 = vsel %vm722_vm13, %v786_v43, %v794_v15  ;;  %v3174_v41 = vsel %vm723_vm14, %v787_v49, %v795_v48  ;;  %v3178_v46 = vsel %vm724_vm15, %v788_v12, %v796_v29  ;;  %v1988_v27 = vmov 4294967041  }
  0xcc   :  { %v813_v3 = vsel %vm805_vm0, 255, %v1988_v27  ;;  %v814_v14 = vsel %vm806_vm1, 255, %v1988_v27  ;;  %v815_v52 = vsel %vm807_vm2, 255, %v1988_v27  ;;  %v816_v9 = vsel %vm808_vm3, 255, %v1988_v27 }
  0xcd   :  { %v829_v20 = vshra.s32 %v3142_v22, 8  ;;  %v817_v59 = vsel %vm809_vm4, 255, %v1988_v27  ;;  %v818_v16 = vsel %vm810_vm5, 255, %v1988_v27  ;;  %v819_v30 = vsel %vm811_vm6, 255, %v1988_v27 }
  0xce   :  { %v820_v4 = vsel %vm812_vm7, 255, %v1988_v27  ;;  %v3198_v63 = vsub.s32 %v3039_v50, %v813_v3  ;;  %v830_v28 = vshra.s32 %v3146_v54, 8  ;;  %v831_v55 = vshra.s32 %v3150_v13, 8 }
  0xcf   :  { %v832_v25 = vshra.s32 %v3154_v17, 8  ;;  %v3204_v19 = vsub.s32 %v3042_v42, %v814_v14  ;;  %v833_v2 = vshra.s32 %v3159_v39, 8  ;;  %v834_v6 = vshra.s32 %v3170_v47, 8 }
  0xd0   :  { %v835_v7 = vshra.s32 %v3174_v41, 8  ;;  %v3210_v40 = vsub.s32 %v3047_v62, %v815_v52  ;;  %v3213_v26 = vsub.s32 %v3050_v18, %v816_v9  ;;  %v3216_v44 = vsub.s32 %v3055_v57, %v817_v59 }
  0xd1   :  { %v3219_v8 = vsub.s32 %v3058_v51, %v818_v16  ;;  %v3222_v11 = vsub.s32 %v3061_v56, %v819_v30  ;;  %v3225_v10 = vsub.s32 %v3064_v23, %v820_v4  ;;  %v836_v58 = vshra.s32 %v3178_v46, 8 }
  0xd2   :  { %v837_v24 = vshra.s32 %v3094_v60, 8  ;;  %v845_v0 = vsub.s32 %v3094_v60, %v829_v20  ;;  %v846_v61 = vsub.s32 %v3098_v45, %v830_v28  ;;  %v847_v43 = vsub.s32 %v3102_v1, %v831_v55 }
  0xd3   :  { %v848_v49 = vsub.s32 %v3106_v21, %v832_v25  ;;  %v849_v12 = vsub.s32 %v3110_v31, %v833_v2  ;;  %v850_v15 = vsub.s32 %v3114_v53, %v834_v6  ;;  %v851_v48 = vsub.s32 %v3126_v38, %v835_v7 }
  0xd4   :  { %v853_v29 = vadd.s32 %v829_v20, %v3094_v60  ;;  %v854_v27 = vadd.s32 %v830_v28, %v3098_v45  ;;  %v855_v3 = vadd.s32 %v831_v55, %v3102_v1  ;;  %v856_v14 = vadd.s32 %v832_v25, %v3106_v21 }
  0xd5   :  { %v857_v52 = vadd.s32 %v833_v2, %v3110_v31  ;;  %v852_v9 = vsub.s32 %v3130_v5, %v836_v58  ;;  %v858_v59 = vadd.s32 %v834_v6, %v3114_v53  ;;  %v859_v16 = vadd.s32 %v835_v7, %v3126_v38 }
  0xd6   :  { %v860_v30 = vadd.s32 %v836_v58, %v3130_v5  ;;  %v838_v4 = vshra.s32 %v3098_v45, 8  ;;  %v839_v60 = vshra.s32 %v3102_v1, 8  ;;  %v840_v20 = vshra.s32 %v3106_v21, 8 }
  0xd7   :  { %v841_v28 = vshra.s32 %v3110_v31, 8  ;;  %v842_v55 = vshra.s32 %v3114_v53, 8  ;;  %v843_v25 = vshra.s32 %v3126_v38, 8  ;;  %v844_v2 = vshra.s32 %v3130_v5, 8 }
  0xd8   :  { %v3254_v6 = vsel %vm805_vm0, %v845_v0, %v853_v29  ;;  %v3258_v7 = vsel %vm806_vm1, %v846_v61, %v854_v27  ;;  %v3262_v45 = vsel %vm807_vm2, %v847_v43, %v855_v3  ;;  %v3266_v1 = vsel %vm808_vm3, %v848_v49, %v856_v14 }
  0xd9   :  { %v3270_v21 = vsel %vm809_vm4, %v849_v12, %v857_v52  ;;  %v3274_v31 = vsel %vm810_vm5, %v850_v15, %v858_v59  ;;  %v3278_v53 = vsel %vm811_vm6, %v851_v48, %v859_v16  ;;  %v3282_v38 = vsel %vm812_vm7, %v852_v9, %v860_v30 }
  0xda   :  { %v869_v5 = vadd.s32 %v837_v24, %v3142_v22  ;;  %v870_v58 = vadd.s32 %v838_v4, %v3146_v54  ;;  %v871_v0 = vadd.s32 %v839_v60, %v3150_v13  ;;  %v872_v61 = vadd.s32 %v840_v20, %v3154_v17 }
  0xdb   :  { %v873_v43 = vadd.s32 %v841_v28, %v3159_v39  ;;  %v877_v49 = vsub.s32 %v3142_v22, %v837_v24  ;;  %v878_v12 = vsub.s32 %v3146_v54, %v838_v4  ;;  %v879_v15 = vsub.s32 %v3150_v13, %v839_v60 }
  0xdc   :  { %v880_v48 = vsub.s32 %v3154_v17, %v840_v20  ;;  %v874_v29 = vadd.s32 %v842_v55, %v3170_v47  ;;  %v875_v27 = vadd.s32 %v843_v25, %v3174_v41  ;;  %v876_v3 = vadd.s32 %v844_v2, %v3178_v46 }
  0xdd   :  { %v881_v14 = vsub.s32 %v3159_v39, %v841_v28  ;;  %v882_v52 = vsub.s32 %v3170_v47, %v842_v55  ;;  %v883_v9 = vsub.s32 %v3174_v41, %v843_v25  ;;  %v884_v22 = vsub.s32 %v3178_v46, %v844_v2 }
  0xde   :  { %vm893_vm8 = vcmp.gt.s32.totalorder %v3198_v63, 0  ;;  %vm894_vm9 = vcmp.gt.s32.totalorder %v3204_v19, 0  ;;  %vm895_vm10 = vcmp.gt.s32.totalorder %v3210_v40, 0  ;;  %vm896_vm11 = vcmp.gt.s32.totalorder %v3213_v26, 0 }
  0xdf   :  { %v3306_v54 = vsel %vm805_vm0, %v869_v5, %v877_v49  ;;  %v3310_v13 = vsel %vm806_vm1, %v870_v58, %v878_v12  ;;  %v3314_v17 = vsel %vm807_vm2, %v871_v0, %v879_v15  ;;  %v3318_v39 = vsel %vm808_vm3, %v872_v61, %v880_v48 }
  0xe0   :  { %vm897_vm12 = vcmp.gt.s32.totalorder %v3216_v44, 0  ;;  %vm898_vm13 = vcmp.gt.s32.totalorder %v3219_v8, 0  ;;  %vm899_vm14 = vcmp.gt.s32.totalorder %v3222_v11, 0  ;;  %vm900_vm15 = vcmp.gt.s32.totalorder %v3225_v10, 0 }
  0xe1   :  { %v1989_v50 = vmov 4294967169   ;;  %v3334_v41 = vsel %vm809_vm4, %v873_v43, %v881_v14  ;;  %v3338_v46 = vsel %vm810_vm5, %v874_v29, %v882_v52  ;;  %v3342_v24 = vsel %vm811_vm6, %v875_v27, %v883_v9 }
  0xe2   :  { %v901_v42 = vsel %vm893_vm8, 127, %v1989_v50  ;;  %v902_v62 = vsel %vm894_vm9, 127, %v1989_v50  ;;  %v903_v18 = vsel %vm895_vm10, 127, %v1989_v50  ;;  %v904_v47 = vsel %vm896_vm11, 127, %v1989_v50 }
  0xe3   :  { %v3346_v59 = vsel %vm812_vm7, %v876_v3, %v884_v22  ;;  %v905_v16 = vsel %vm897_vm12, 127, %v1989_v50  ;;  %v906_v57 = vsel %vm898_vm13, 127, %v1989_v50  ;;  %v907_v30 = vsel %vm899_vm14, 127, %v1989_v50 }
  0xe4   :  { %v908_v51 = vsel %vm900_vm15, 127, %v1989_v50  ;;  %v3357_v56 = vsub.s32 %v3198_v63, %v901_v42  ;;  %v3360_v4 = vsub.s32 %v3204_v19, %v902_v62  ;;  %v3363_v23 = vsub.s32 %v3210_v40, %v903_v18 }
  0xe5   :  { %v3366_v60 = vsub.s32 %v3213_v26, %v904_v47  ;;  %v917_v20 = vshra.s32 %v3306_v54, 9  ;;  %v918_v28 = vshra.s32 %v3310_v13, 9  ;;  %v919_v55 = vshra.s32 %v3314_v17, 9 }
  0xe6   :  { %v920_v25 = vshra.s32 %v3318_v39, 9  ;;  %v3373_v2 = vsub.s32 %v3216_v44, %v905_v16  ;;  %v3376_v5 = vsub.s32 %v3219_v8, %v906_v57  ;;  %v3379_v58 = vsub.s32 %v3222_v11, %v907_v30 }
  0xe7   :  { %v3382_v0 = vsub.s32 %v3225_v10, %v908_v51  ;;  %v921_v61 = vshra.s32 %v3334_v41, 9  ;;  %v922_v43 = vshra.s32 %v3338_v46, 9  ;;  %v923_v49 = vshra.s32 %v3342_v24, 9 }
  0xe8   :  { %v924_v12 = vshra.s32 %v3346_v59, 9  ;;  %v925_v15 = vshra.s32 %v3254_v6, 9  ;;  %v926_v48 = vshra.s32 %v3258_v7, 9  ;;  %v927_v29 = vshra.s32 %v3262_v45, 9 }
  0xe9   :  { %v928_v27 = vshra.s32 %v3266_v1, 9  ;;  %v933_v3 = vsub.s32 %v3254_v6, %v917_v20  ;;  %v934_v14 = vsub.s32 %v3258_v7, %v918_v28  ;;  %v935_v52 = vsub.s32 %v3262_v45, %v919_v55 }
  0xea   :  { %v936_v9 = vsub.s32 %v3266_v1, %v920_v25  ;;  %v941_v22 = vadd.s32 %v917_v20, %v3254_v6  ;;  %v942_v50 = vadd.s32 %v918_v28, %v3258_v7  ;;  %v943_v42 = vadd.s32 %v919_v55, %v3262_v45 }
  0xeb   :  { %v944_v62 = vadd.s32 %v920_v25, %v3266_v1  ;;  %v937_v18 = vsub.s32 %v3270_v21, %v921_v61  ;;  %v938_v47 = vsub.s32 %v3274_v31, %v922_v43  ;;  %v945_v16 = vadd.s32 %v921_v61, %v3270_v21 }
  0xec   :  { %v946_v57 = vadd.s32 %v922_v43, %v3274_v31  ;;  %v929_v30 = vshra.s32 %v3270_v21, 9  ;;  %v930_v51 = vshra.s32 %v3274_v31, 9  ;;  %v931_v6 = vshra.s32 %v3278_v53, 9 }
  0xed   :  { %v932_v7 = vshra.s32 %v3282_v38, 9  ;;  %v939_v45 = vsub.s32 %v3278_v53, %v923_v49  ;;  %v940_v1 = vsub.s32 %v3282_v38, %v924_v12  ;;  %v947_v20 = vadd.s32 %v923_v49, %v3278_v53 }
  0xee   :  { %v948_v28 = vadd.s32 %v924_v12, %v3282_v38  ;;  %v3414_v55 = vsel %vm893_vm8, %v933_v3, %v941_v22  ;;  %v3418_v21 = vsel %vm894_vm9, %v934_v14, %v942_v50  ;;  %v3422_v31 = vsel %vm895_vm10, %v935_v52, %v943_v42 }
  0xef   :  { %v3426_v25 = vsel %vm896_vm11, %v936_v9, %v944_v62  ;;  %v3430_v53 = vsel %vm897_vm12, %v937_v18, %v945_v16  ;;  %v3434_v38 = vsel %vm898_vm13, %v938_v47, %v946_v57  ;;  %v957_v61 = vadd.s32 %v925_v15, %v3306_v54 }
  0xf0   :  { %v958_v43 = vadd.s32 %v926_v48, %v3310_v13  ;;  %v959_v49 = vadd.s32 %v927_v29, %v3314_v17  ;;  %v965_v12 = vsub.s32 %v3306_v54, %v925_v15  ;;  %v966_v3 = vsub.s32 %v3310_v13, %v926_v48 }
  0xf1   :  { %v967_v14 = vsub.s32 %v3314_v17, %v927_v29  ;;  %v3444_v52 = vsel %vm899_vm14, %v939_v45, %v947_v20  ;;  %v3448_v9 = vsel %vm900_vm15, %v940_v1, %v948_v28  ;;  %v960_v22 = vadd.s32 %v928_v27, %v3318_v39 }
  0xf2   :  { %v961_v50 = vadd.s32 %v929_v30, %v3334_v41  ;;  %v962_v42 = vadd.s32 %v930_v51, %v3338_v46  ;;  %v963_v54 = vadd.s32 %v931_v6, %v3342_v24  ;;  %v964_v13 = vadd.s32 %v932_v7, %v3346_v59 }
  0xf3   :  { %v968_v17 = vsub.s32 %v3318_v39, %v928_v27  ;;  %v969_v15 = vsub.s32 %v3334_v41, %v929_v30  ;;  %v970_v48 = vsub.s32 %v3338_v46, %v930_v51  ;;  %v971_v29 = vsub.s32 %v3342_v24, %v931_v6 }
  0xf4   :  { %v972_v62 = vsub.s32 %v3346_v59, %v932_v7  ;;  %v3462_v18 = vsel %vm893_vm8, %v957_v61, %v965_v12  ;;  %v3466_v47 = vsel %vm894_vm9, %v958_v43, %v966_v3  ;;  %v3470_v16 = vsel %vm895_vm10, %v959_v49, %v967_v14 }
  0xf5   :  { %vm981_vm0 = vcmp.gt.s32.totalorder %v3357_v56, 0  ;;  %vm982_vm1 = vcmp.gt.s32.totalorder %v3360_v4, 0  ;;  %vm983_vm2 = vcmp.gt.s32.totalorder %v3363_v23, 0  ;;  %vm984_vm3 = vcmp.gt.s32.totalorder %v3366_v60, 0 }
  0xf6   :  { %vm985_vm4 = vcmp.gt.s32.totalorder %v3373_v2, 0  ;;  %vm986_vm5 = vcmp.gt.s32.totalorder %v3376_v5, 0  ;;  %vm987_vm6 = vcmp.gt.s32.totalorder %v3379_v58, 0  ;;  %vm988_vm7 = vcmp.gt.s32.totalorder %v3382_v0, 0 }
  0xf7   :  { %v3482_v63 = vsel %vm896_vm11, %v960_v22, %v968_v17  ;;  %v3486_v19 = vsel %vm897_vm12, %v961_v50, %v969_v15  ;;  %v3490_v40 = vsel %vm898_vm13, %v962_v42, %v970_v48  ;;  %v3494_v39 = vsel %vm899_vm14, %v963_v54, %v971_v29 }
  0xf8   :  { %v1990_v41 = vmov 4294967233   ;;  %v3514_v57 = vsel %vm900_vm15, %v964_v13, %v972_v62  ;;  %v1005_v30 = vshra.s32 %v3462_v18, 10  ;;  %v1006_v51 = vshra.s32 %v3466_v47, 10 }
  0xf9   :  { %v989_v46 = vsel %vm981_vm0, 63, %v1990_v41  ;;  %v990_v26 = vsel %vm982_vm1, 63, %v1990_v41  ;;  %v991_v44 = vsel %vm983_vm2, 63, %v1990_v41  ;;  %v992_v24 = vsel %vm984_vm3, 63, %v1990_v41 }
  0xfa   :  { %v993_v8 = vsel %vm985_vm4, 63, %v1990_v41  ;;  %v994_v11 = vsel %vm986_vm5, 63, %v1990_v41  ;;  %v995_v59 = vsel %vm987_vm6, 63, %v1990_v41  ;;  %v996_v27 = vsel %vm988_vm7, 63, %v1990_v41 }
  0xfb   :  { %v1007_v6 = vshra.s32 %v3470_v16, 10  ;;  %v3520_v7 = vsub.s32 %v3357_v56, %v989_v46  ;;  %v3523_v45 = vsub.s32 %v3360_v4, %v990_v26  ;;  %v3526_v1 = vsub.s32 %v3363_v23, %v991_v44 }
  0xfc   :  { %v3529_v20 = vsub.s32 %v3366_v60, %v992_v24  ;;  %v3532_v10 = vsub.s32 %v3373_v2, %v993_v8  ;;  %v3535_v28 = vsub.s32 %v3376_v5, %v994_v11  ;;  %v3538_v61 = vsub.s32 %v3379_v58, %v995_v59 }
  0xfd   :  { %v3541_v43 = vsub.s32 %v3382_v0, %v996_v27  ;;  %v1008_v49 = vshra.s32 %v3482_v63, 10  ;;  %v1009_v12 = vshra.s32 %v3486_v19, 10  ;;  %v1010_v3 = vshra.s32 %v3490_v40, 10 }
  0xfe   :  { %v1011_v14 = vshra.s32 %v3494_v39, 10  ;;  %v1012_v22 = vshra.s32 %v3514_v57, 10  ;;  %v1013_v50 = vshra.s32 %v3414_v55, 10  ;;  %v1014_v42 = vshra.s32 %v3418_v21, 10 }
  0xff   :  { %v1015_v54 = vshra.s32 %v3422_v31, 10  ;;  %v1016_v13 = vshra.s32 %v3426_v25, 10  ;;  %v1017_v17 = vshra.s32 %v3430_v53, 10  ;;  %v1021_v15 = vsub.s32 %v3414_v55, %v1005_v30 }
 0x100   :  { %v1022_v48 = vsub.s32 %v3418_v21, %v1006_v51  ;;  %v1023_v29 = vsub.s32 %v3422_v31, %v1007_v6  ;;  %v1029_v62 = vadd.s32 %v1005_v30, %v3414_v55  ;;  %v1030_v41 = vadd.s32 %v1006_v51, %v3418_v21 }
 0x101   :  { %v1031_v46 = vadd.s32 %v1007_v6, %v3422_v31  ;;  %v1024_v26 = vsub.s32 %v3426_v25, %v1008_v49  ;;  %v1025_v44 = vsub.s32 %v3430_v53, %v1009_v12  ;;  %v1032_v24 = vadd.s32 %v1008_v49, %v3426_v25 }
 0x102   :  { %v1033_v8 = vadd.s32 %v1009_v12, %v3430_v53  ;;  %v1018_v11 = vshra.s32 %v3434_v38, 10  ;;  %v1019_v59 = vshra.s32 %v3444_v52, 10  ;;  %v1020_v27 = vshra.s32 %v3448_v9, 10 }
 0x103   :  { %v1026_v55 = vsub.s32 %v3434_v38, %v1010_v3  ;;  %v1027_v21 = vsub.s32 %v3444_v52, %v1011_v14  ;;  %v1028_v31 = vsub.s32 %v3448_v9, %v1012_v22  ;;  %v1034_v30 = vadd.s32 %v1010_v3, %v3434_v38 }
 0x104   :  { %v1035_v51 = vadd.s32 %v1011_v14, %v3444_v52  ;;  %v1036_v25 = vadd.s32 %v1012_v22, %v3448_v9  ;;  %v3574_v53 = vsel %vm981_vm0, %v1021_v15, %v1029_v62  ;;  %v3578_v6 = vsel %vm982_vm1, %v1022_v48, %v1030_v41 }
 0x105   :  { %v3582_v49 = vsel %vm983_vm2, %v1023_v29, %v1031_v46  ;;  %v3586_v12 = vsel %vm984_vm3, %v1024_v26, %v1032_v24  ;;  %v3590_v38 = vsel %vm985_vm4, %v1025_v44, %v1033_v8  ;;  %v1045_v52 = vadd.s32 %v1013_v50, %v3462_v18 }
 0x106   :  { %v1046_v9 = vadd.s32 %v1014_v42, %v3466_v47  ;;  %v1047_v3 = vadd.s32 %v1015_v54, %v3470_v16  ;;  %v1053_v14 = vsub.s32 %v3462_v18, %v1013_v50  ;;  %v1054_v22 = vsub.s32 %v3466_v47, %v1014_v42 }
 0x107   :  { %v1055_v15 = vsub.s32 %v3470_v16, %v1015_v54  ;;  %v3600_v48 = vsel %vm986_vm5, %v1026_v55, %v1034_v30  ;;  %v3604_v29 = vsel %vm987_vm6, %v1027_v21, %v1035_v51  ;;  %v1048_v62 = vadd.s32 %v1016_v13, %v3482_v63 }
 0x108   :  { %v1056_v41 = vsub.s32 %v3482_v63, %v1016_v13  ;;  %v1049_v46 = vadd.s32 %v1017_v17, %v3486_v19  ;;  %v1050_v18 = vadd.s32 %v1018_v11, %v3490_v40  ;;  %v1057_v47 = vsub.s32 %v3486_v19, %v1017_v17 }
 0x109   :  { %v1058_v16 = vsub.s32 %v3490_v40, %v1018_v11  ;;  %v3614_v50 = vsel %vm988_vm7, %v1028_v31, %v1036_v25  ;;  %v1051_v42 = vadd.s32 %v1019_v59, %v3494_v39  ;;  %v1052_v54 = vadd.s32 %v1020_v27, %v3514_v57 }
 0x10a   :  { %v1059_v26 = vsub.s32 %v3494_v39, %v1019_v59  ;;  %v1060_v63 = vsub.s32 %v3514_v57, %v1020_v27  ;;  %v3622_v13 = vsel %vm981_vm0, %v1045_v52, %v1053_v14  ;;  %v3626_v19 = vsel %vm982_vm1, %v1046_v9, %v1054_v22 }
 0x10b   :  { %v3630_v40 = vsel %vm983_vm2, %v1047_v3, %v1055_v15  ;;  %v3634_v17 = vsel %vm984_vm3, %v1048_v62, %v1056_v41  ;;  %vm1069_vm8 = vcmp.gt.s32.totalorder %v3520_v7, 0  ;;  %vm1070_vm9 = vcmp.gt.s32.totalorder %v3523_v45, 0 }
 0x10c   :  { %v3640_v56 = vsel %vm985_vm4, %v1049_v46, %v1057_v47  ;;  %v3644_v4 = vsel %vm986_vm5, %v1050_v18, %v1058_v16  ;;  %vm1071_vm10 = vcmp.gt.s32.totalorder %v3526_v1, 0  ;;  %vm1072_vm11 = vcmp.gt.s32.totalorder %v3529_v20, 0 }
 0x10d   :  { %vm1073_vm12 = vcmp.gt.s32.totalorder %v3532_v10, 0  ;;  %vm1074_vm13 = vcmp.gt.s32.totalorder %v3535_v28, 0  ;;  %vm1075_vm14 = vcmp.gt.s32.totalorder %v3538_v61, 0  ;;  %vm1076_vm15 = vcmp.gt.s32.totalorder %v3541_v43, 0 }
 0x10e   :  { %v3654_v23 = vsel %vm987_vm6, %v1051_v42, %v1059_v26  ;;  %v3658_v60 = vsel %vm988_vm7, %v1052_v54, %v1060_v63  ;;  %v1991_v2 = vmov 4294967265   ;;  %v1093_v58 = vshra.s32 %v3622_v13, 11 }
 0x10f   :  { %v1077_v5 = vsel %vm1069_vm8, 31, %v1991_v2  ;;  %v1078_v39 = vsel %vm1070_vm9, 31, %v1991_v2  ;;  %v1079_v57 = vsel %vm1071_vm10, 31, %v1991_v2  ;;  %v1080_v44 = vsel %vm1072_vm11, 31, %v1991_v2 }
 0x110   :  { %v1094_v24 = vshra.s32 %v3626_v19, 11  ;;  %v1081_v0 = vsel %vm1073_vm12, 31, %v1991_v2  ;;  %v1082_v8 = vsel %vm1074_vm13, 31, %v1991_v2  ;;  %v1083_v11 = vsel %vm1075_vm14, 31, %v1991_v2 }
 0x111   :  { %v1084_v59 = vsel %vm1076_vm15, 31, %v1991_v2  ;;  %v3679_v27 = vsub.s32 %v3520_v7, %v1077_v5  ;;  %v3682_v55 = vsub.s32 %v3523_v45, %v1078_v39  ;;  %v1095_v21 = vshra.s32 %v3630_v40, 11 }
 0x112   :  { %v1096_v31 = vshra.s32 %v3634_v17, 11  ;;  %v3687_v30 = vsub.s32 %v3526_v1, %v1079_v57  ;;  %v3690_v51 = vsub.s32 %v3529_v20, %v1080_v44  ;;  %v1097_v25 = vshra.s32 %v3640_v56, 11 }
 0x113   :  { %v1098_v52 = vshra.s32 %v3644_v4, 11  ;;  %v3695_v9 = vsub.s32 %v3532_v10, %v1081_v0  ;;  %v3698_v3 = vsub.s32 %v3535_v28, %v1082_v8  ;;  %v3701_v14 = vsub.s32 %v3538_v61, %v1083_v11 }
 0x114   :  { %v3704_v22 = vsub.s32 %v3541_v43, %v1084_v59  ;;  %v1099_v15 = vshra.s32 %v3654_v23, 11  ;;  %v1100_v62 = vshra.s32 %v3658_v60, 11  ;;  %v1101_v41 = vshra.s32 %v3574_v53, 11 }
 0x115   :  { %v1102_v46 = vshra.s32 %v3578_v6, 11  ;;  %v1109_v18 = vsub.s32 %v3574_v53, %v1093_v58  ;;  %v1110_v47 = vsub.s32 %v3578_v6, %v1094_v24  ;;  %v1111_v16 = vsub.s32 %v3582_v49, %v1095_v21 }
 0x116   :  { %v1112_v42 = vsub.s32 %v3586_v12, %v1096_v31  ;;  %v1113_v54 = vsub.s32 %v3590_v38, %v1097_v25  ;;  %v1114_v26 = vsub.s32 %v3600_v48, %v1098_v52  ;;  %v1117_v63 = vadd.s32 %v1093_v58, %v3574_v53 }
 0x117   :  { %v1118_v2 = vadd.s32 %v1094_v24, %v3578_v6  ;;  %v1119_v5 = vadd.s32 %v1095_v21, %v3582_v49  ;;  %v1120_v39 = vadd.s32 %v1096_v31, %v3586_v12  ;;  %v1121_v57 = vadd.s32 %v1097_v25, %v3590_v38 }
 0x118   :  { %v1122_v44 = vadd.s32 %v1098_v52, %v3600_v48  ;;  %v1103_v0 = vshra.s32 %v3582_v49, 11  ;;  %v1104_v8 = vshra.s32 %v3586_v12, 11  ;;  %v1105_v11 = vshra.s32 %v3590_v38, 11 }
 0x119   :  { %v1106_v59 = vshra.s32 %v3600_v48, 11  ;;  %v1107_v53 = vshra.s32 %v3604_v29, 11  ;;  %v1108_v6 = vshra.s32 %v3614_v50, 11  ;;  %v1115_v58 = vsub.s32 %v3604_v29, %v1099_v15 }
 0x11a   :  { %v1116_v24 = vsub.s32 %v3614_v50, %v1100_v62  ;;  %v1123_v21 = vadd.s32 %v1099_v15, %v3604_v29  ;;  %v1124_v31 = vadd.s32 %v1100_v62, %v3614_v50  ;;  %v3734_v49 = vsel %vm1069_vm8, %v1109_v18, %v1117_v63 }
 0x11b   :  { %v3738_v12 = vsel %vm1070_vm9, %v1110_v47, %v1118_v2  ;;  %v3742_v38 = vsel %vm1071_vm10, %v1111_v16, %v1119_v5  ;;  %v3746_v48 = vsel %vm1072_vm11, %v1112_v42, %v1120_v39  ;;  %v3750_v29 = vsel %vm1073_vm12, %v1113_v54, %v1121_v57 }
 0x11c   :  { %v3754_v50 = vsel %vm1074_vm13, %v1114_v26, %v1122_v44  ;;  %v1133_v25 = vadd.s32 %v1101_v41, %v3622_v13  ;;  %v1134_v52 = vadd.s32 %v1102_v46, %v3626_v19  ;;  %v1141_v15 = vsub.s32 %v3622_v13, %v1101_v41 }
 0x11d   :  { %v1142_v62 = vsub.s32 %v3626_v19, %v1102_v46  ;;  %v1135_v18 = vadd.s32 %v1103_v0, %v3630_v40  ;;  %v1136_v47 = vadd.s32 %v1104_v8, %v3634_v17  ;;  %v1143_v16 = vsub.s32 %v3630_v40, %v1103_v0 }
 0x11e   :  { %v1144_v42 = vsub.s32 %v3634_v17, %v1104_v8  ;;  %v3766_v54 = vsel %vm1075_vm14, %v1115_v58, %v1123_v21  ;;  %v3770_v26 = vsel %vm1076_vm15, %v1116_v24, %v1124_v31  ;;  %v1137_v13 = vadd.s32 %v1105_v11, %v3640_v56 }
 0x11f   :  { %v1145_v19 = vsub.s32 %v3640_v56, %v1105_v11  ;;  %v1138_v41 = vadd.s32 %v1106_v59, %v3644_v4  ;;  %v1139_v46 = vadd.s32 %v1107_v53, %v3654_v23  ;;  %v1140_v40 = vadd.s32 %v1108_v6, %v3658_v60 }
 0x120   :  { %v1146_v17 = vsub.s32 %v3644_v4, %v1106_v59  ;;  %v1147_v63 = vsub.s32 %v3654_v23, %v1107_v53  ;;  %v1148_v2 = vsub.s32 %v3658_v60, %v1108_v6  ;;  %v3782_v5 = vsel %vm1069_vm8, %v1133_v25, %v1141_v15 }
 0x121   :  { %v3786_v39 = vsel %vm1070_vm9, %v1134_v52, %v1142_v62  ;;  %v3790_v56 = vsel %vm1071_vm10, %v1135_v18, %v1143_v16  ;;  %v3794_v57 = vsel %vm1072_vm11, %v1136_v47, %v1144_v42  ;;  %vm1157_vm0 = vcmp.gt.s32.totalorder %v3679_v27, 0 }
 0x122   :  { %v3799_v4 = vsel %vm1073_vm12, %v1137_v13, %v1145_v19  ;;  %vm1158_vm1 = vcmp.gt.s32.totalorder %v3682_v55, 0  ;;  %vm1159_vm2 = vcmp.gt.s32.totalorder %v3687_v30, 0  ;;  %vm1160_vm3 = vcmp.gt.s32.totalorder %v3690_v51, 0 }
 0x123   :  { %vm1161_vm4 = vcmp.gt.s32.totalorder %v3695_v9, 0  ;;  %vm1162_vm5 = vcmp.gt.s32.totalorder %v3698_v3, 0  ;;  %vm1163_vm6 = vcmp.gt.s32.totalorder %v3701_v14, 0  ;;  %vm1164_vm7 = vcmp.gt.s32.totalorder %v3704_v22, 0 }
 0x124   :  { %v3810_v7 = vsel %vm1074_vm13, %v1138_v41, %v1146_v17  ;;  %v3814_v45 = vsel %vm1075_vm14, %v1139_v46, %v1147_v63  ;;  %v3818_v1 = vsel %vm1076_vm15, %v1140_v40, %v1148_v2  ;;  %v1992_v20 = vmov 4294967280  }
 0x125   :  { %v1165_v10 = vsel %vm1157_vm0, 16, %v1992_v20  ;;  %v1166_v23 = vsel %vm1158_vm1, 16, %v1992_v20  ;;  %v1167_v28 = vsel %vm1159_vm2, 16, %v1992_v20  ;;  %v1168_v60 = vsel %vm1160_vm3, 16, %v1992_v20 }
 0x126   :  { %v1181_v61 = vshra.s32 %v3782_v5, 12  ;;  %v1169_v43 = vsel %vm1161_vm4, 16, %v1992_v20  ;;  %v1170_v44 = vsel %vm1162_vm5, 16, %v1992_v20  ;;  %v1171_v0 = vsel %vm1163_vm6, 16, %v1992_v20 }
 0x127   :  { %v1172_v8 = vsel %vm1164_vm7, 16, %v1992_v20  ;;  %v3838_v11 = vsub.s32 %v3679_v27, %v1165_v10  ;;  %v1182_v59 = vshra.s32 %v3786_v39, 12  ;;  %v1183_v53 = vshra.s32 %v3790_v56, 12 }
 0x128   :  { %v1184_v6 = vshra.s32 %v3794_v57, 12  ;;  %v3844_v58 = vsub.s32 %v3682_v55, %v1166_v23  ;;  %v1185_v24 = vshra.s32 %v3799_v4, 12  ;;  %v1186_v21 = vshra.s32 %v3810_v7, 12 }
 0x129   :  { %v1187_v31 = vshra.s32 %v3814_v45, 12  ;;  %v3850_v25 = vsub.s32 %v3687_v30, %v1167_v28  ;;  %v3853_v52 = vsub.s32 %v3690_v51, %v1168_v60  ;;  %v3856_v15 = vsub.s32 %v3695_v9, %v1169_v43 }
 0x12a   :  { %v3859_v62 = vsub.s32 %v3698_v3, %v1170_v44  ;;  %v3862_v18 = vsub.s32 %v3701_v14, %v1171_v0  ;;  %v3865_v47 = vsub.s32 %v3704_v22, %v1172_v8  ;;  %v1188_v16 = vshra.s32 %v3818_v1, 12 }
 0x12b   :  { %v1189_v42 = vshra.s32 %v3734_v49, 12  ;;  %v1197_v13 = vsub.s32 %v3734_v49, %v1181_v61  ;;  %v1198_v19 = vsub.s32 %v3738_v12, %v1182_v59  ;;  %v1199_v41 = vsub.s32 %v3742_v38, %v1183_v53 }
 0x12c   :  { %v1200_v46 = vsub.s32 %v3746_v48, %v1184_v6  ;;  %v1201_v40 = vsub.s32 %v3750_v29, %v1185_v24  ;;  %v1202_v17 = vsub.s32 %v3754_v50, %v1186_v21  ;;  %v1203_v63 = vsub.s32 %v3766_v54, %v1187_v31 }
 0x12d   :  { %v1205_v2 = vadd.s32 %v1181_v61, %v3734_v49  ;;  %v1206_v20 = vadd.s32 %v1182_v59, %v3738_v12  ;;  %v1207_v10 = vadd.s32 %v1183_v53, %v3742_v38  ;;  %v1208_v23 = vadd.s32 %v1184_v6, %v3746_v48 }
 0x12e   :  { %v1209_v28 = vadd.s32 %v1185_v24, %v3750_v29  ;;  %v1204_v60 = vsub.s32 %v3770_v26, %v1188_v16  ;;  %v1210_v43 = vadd.s32 %v1186_v21, %v3754_v50  ;;  %v1211_v44 = vadd.s32 %v1187_v31, %v3766_v54 }
 0x12f   :  { %v1212_v0 = vadd.s32 %v1188_v16, %v3770_v26  ;;  %v1190_v8 = vshra.s32 %v3738_v12, 12  ;;  %v1191_v49 = vshra.s32 %v3742_v38, 12  ;;  %v1192_v61 = vshra.s32 %v3746_v48, 12 }
 0x130   :  { %v1193_v59 = vshra.s32 %v3750_v29, 12  ;;  %v1194_v53 = vshra.s32 %v3754_v50, 12  ;;  %v1195_v6 = vshra.s32 %v3766_v54, 12  ;;  %v1196_v24 = vshra.s32 %v3770_v26, 12 }
 0x131   :  { %v3894_v21 = vsel %vm1157_vm0, %v1197_v13, %v1205_v2  ;;  %v3898_v31 = vsel %vm1158_vm1, %v1198_v19, %v1206_v20  ;;  %v3902_v12 = vsel %vm1159_vm2, %v1199_v41, %v1207_v10  ;;  %v3906_v38 = vsel %vm1160_vm3, %v1200_v46, %v1208_v23 }
 0x132   :  { %v3910_v48 = vsel %vm1161_vm4, %v1201_v40, %v1209_v28  ;;  %v3914_v29 = vsel %vm1162_vm5, %v1202_v17, %v1210_v43  ;;  %v3918_v50 = vsel %vm1163_vm6, %v1203_v63, %v1211_v44  ;;  %v3922_v54 = vsel %vm1164_vm7, %v1204_v60, %v1212_v0 }
 0x133   :  { %v1221_v26 = vadd.s32 %v1189_v42, %v3782_v5  ;;  %v1222_v16 = vadd.s32 %v1190_v8, %v3786_v39  ;;  %v1223_v13 = vadd.s32 %v1191_v49, %v3790_v56  ;;  %v1224_v19 = vadd.s32 %v1192_v61, %v3794_v57 }
 0x134   :  { %v1225_v41 = vadd.s32 %v1193_v59, %v3799_v4  ;;  %v1229_v46 = vsub.s32 %v3782_v5, %v1189_v42  ;;  %v1230_v40 = vsub.s32 %v3786_v39, %v1190_v8  ;;  %v1231_v17 = vsub.s32 %v3790_v56, %v1191_v49 }
 0x135   :  { %v1232_v63 = vsub.s32 %v3794_v57, %v1192_v61  ;;  %v1226_v2 = vadd.s32 %v1194_v53, %v3810_v7  ;;  %v1227_v20 = vadd.s32 %v1195_v6, %v3814_v45  ;;  %v1228_v10 = vadd.s32 %v1196_v24, %v3818_v1 }
 0x136   :  { %v1233_v23 = vsub.s32 %v3799_v4, %v1193_v59  ;;  %v1234_v28 = vsub.s32 %v3810_v7, %v1194_v53  ;;  %v1235_v60 = vsub.s32 %v3814_v45, %v1195_v6  ;;  %v1236_v5 = vsub.s32 %v3818_v1, %v1196_v24 }
 0x137   :  { %vm1245_vm8 = vcmp.gt.s32.totalorder %v3838_v11, 0  ;;  %vm1246_vm9 = vcmp.gt.s32.totalorder %v3844_v58, 0  ;;  %vm1247_vm10 = vcmp.gt.s32.totalorder %v3850_v25, 0  ;;  %vm1248_vm11 = vcmp.gt.s32.totalorder %v3853_v52, 0 }
 0x138   :  { %v3946_v39 = vsel %vm1157_vm0, %v1221_v26, %v1229_v46  ;;  %v3950_v56 = vsel %vm1158_vm1, %v1222_v16, %v1230_v40  ;;  %v3954_v57 = vsel %vm1159_vm2, %v1223_v13, %v1231_v17  ;;  %v3958_v4 = vsel %vm1160_vm3, %v1224_v19, %v1232_v63 }
 0x139   :  { %vm1249_vm12 = vcmp.gt.s32.totalorder %v3856_v15, 0  ;;  %vm1250_vm13 = vcmp.gt.s32.totalorder %v3859_v62, 0  ;;  %vm1251_vm14 = vcmp.gt.s32.totalorder %v3862_v18, 0  ;;  %vm1252_vm15 = vcmp.gt.s32.totalorder %v3865_v47, 0 }
 0x13a   :  { %v1993_v27 = vmov 4294967288   ;;  %v1241_v45 = vsel %vm1161_vm4, %v1225_v41, %v1233_v23  ;;  %v1242_v1 = vsel %vm1162_vm5, %v1226_v2, %v1234_v28  ;;  %v3978_v42 = vsel %vm1163_vm6, %v1227_v20, %v1235_v60 }
 0x13b   :  { %v1253_v55 = vsel %vm1245_vm8, 8, %v1993_v27  ;;  %v1254_v30 = vsel %vm1246_vm9, 8, %v1993_v27  ;;  %v1255_v51 = vsel %vm1247_vm10, 8, %v1993_v27  ;;  %v1256_v7 = vsel %vm1248_vm11, 8, %v1993_v27 }
 0x13c   :  { %v3982_v43 = vsel %vm1164_vm7, %v1228_v10, %v1236_v5  ;;  %v1257_v44 = vsel %vm1249_vm12, 8, %v1993_v27  ;;  %v1258_v0 = vsel %vm1250_vm13, 8, %v1993_v27  ;;  %v1259_v9 = vsel %vm1251_vm14, 8, %v1993_v27 }
 0x13d   :  { %v1260_v3 = vsel %vm1252_vm15, 8, %v1993_v27  ;;  %v3993_v14 = vsub.s32 %v3838_v11, %v1253_v55  ;;  %v3996_v8 = vsub.s32 %v3844_v58, %v1254_v30  ;;  %v3999_v22 = vsub.s32 %v3850_v25, %v1255_v51 }
 0x13e   :  { %v4002_v49 = vsub.s32 %v3853_v52, %v1256_v7  ;;  %v1269_v61 = vshra.s32 %v3946_v39, 13  ;;  %v1270_v59 = vshra.s32 %v3950_v56, 13  ;;  %v1271_v53 = vshra.s32 %v3954_v57, 13 }
 0x13f   :  { %v1272_v6 = vshra.s32 %v3958_v4, 13  ;;  %v4009_v24 = vsub.s32 %v3856_v15, %v1257_v44  ;;  %v4012_v26 = vsub.s32 %v3859_v62, %v1258_v0  ;;  %v4015_v16 = vsub.s32 %v3862_v18, %v1259_v9 }
 0x140   :  { %v4018_v13 = vsub.s32 %v3865_v47, %v1260_v3  ;;  %v1273_v19 = vshra.s32 %v1241_v45, 13  ;;  %v1274_v41 = vshra.s32 %v1242_v1, 13  ;;  %v1275_v46 = vshra.s32 %v3978_v42, 13 }
 0x141   :  { %v1276_v40 = vshra.s32 %v3982_v43, 13  ;;  %v1277_v17 = vshra.s32 %v3894_v21, 13  ;;  %v1278_v63 = vshra.s32 %v3898_v31, 13  ;;  %v1279_v2 = vshra.s32 %v3902_v12, 13 }
 0x142   :  { %v1280_v20 = vshra.s32 %v3906_v38, 13  ;;  %v1285_v10 = vsub.s32 %v3894_v21, %v1269_v61  ;;  %v1286_v23 = vsub.s32 %v3898_v31, %v1270_v59  ;;  %v1287_v28 = vsub.s32 %v3902_v12, %v1271_v53 }
 0x143   :  { %v1288_v60 = vsub.s32 %v3906_v38, %v1272_v6  ;;  %v1293_v5 = vadd.s32 %v1269_v61, %v3894_v21  ;;  %v1294_v27 = vadd.s32 %v1270_v59, %v3898_v31  ;;  %v1295_v55 = vadd.s32 %v1271_v53, %v3902_v12 }
 0x144   :  { %v1296_v30 = vadd.s32 %v1272_v6, %v3906_v38  ;;  %v1281_v51 = vshra.s32 %v3910_v48, 13  ;;  %v1282_v7 = vshra.s32 %v3914_v29, 13  ;;  %v1283_v44 = vshra.s32 %v3918_v50, 13 }
 0x145   :  { %v1284_v0 = vshra.s32 %v3922_v54, 13  ;;  %v1289_v9 = vsub.s32 %v3910_v48, %v1273_v19  ;;  %v1290_v3 = vsub.s32 %v3914_v29, %v1274_v41  ;;  %v1291_v21 = vsub.s32 %v3918_v50, %v1275_v46 }
 0x146   :  { %v1292_v31 = vsub.s32 %v3922_v54, %v1276_v40  ;;  %v1297_v12 = vadd.s32 %v1273_v19, %v3910_v48  ;;  %v1298_v38 = vadd.s32 %v1274_v41, %v3914_v29  ;;  %v1299_v61 = vadd.s32 %v1275_v46, %v3918_v50 }
 0x147   :  { %v1300_v59 = vadd.s32 %v1276_v40, %v3922_v54  ;;  %v4048_v53 = vsel %vm1245_vm8, %v1285_v10, %v1293_v5  ;;  %v4052_v6 = vsel %vm1246_vm9, %v1286_v23, %v1294_v27  ;;  %v4056_v37 = vsel %vm1247_vm10, %v1287_v28, %v1295_v55 }
 0x148   :  { %v4060_v48 = vsel %vm1248_vm11, %v1288_v60, %v1296_v30  ;;  %v1309_v29 = vadd.s32 %v1277_v17, %v3946_v39  ;;  %v1310_v50 = vadd.s32 %v1278_v63, %v3950_v56  ;;  %v1311_v54 = vadd.s32 %v1279_v2, %v3954_v57 }
 0x149   :  { %v1312_v19 = vadd.s32 %v1280_v20, %v3958_v4  ;;  %v1317_v41 = vsub.s32 %v3946_v39, %v1277_v17  ;;  %v1318_v46 = vsub.s32 %v3950_v56, %v1278_v63  ;;  %v1319_v40 = vsub.s32 %v3954_v57, %v1279_v2 }
 0x14a   :  { %v1320_v10 = vsub.s32 %v3958_v4, %v1280_v20  ;;  %v1313_v23 = vadd.s32 %v1281_v51, %v1241_v45  ;;  %v1314_v28 = vadd.s32 %v1282_v7, %v1242_v1  ;;  %v1321_v60 = vsub.s32 %v1241_v45, %v1281_v51 }
 0x14b   :  { %v1322_v5 = vsub.s32 %v1242_v1, %v1282_v7  ;;  %v4072_v27 = vsel %vm1249_vm12, %v1289_v9, %v1297_v12  ;;  %v4076_v55 = vsel %vm1250_vm13, %v1290_v3, %v1298_v38  ;;  %v1315_v39 = vadd.s32 %v1283_v44, %v3978_v42 }
 0x14c   :  { %v1323_v56 = vsub.s32 %v3978_v42, %v1283_v44  ;;  %v4082_v57 = vsel %vm1251_vm14, %v1291_v21, %v1299_v61  ;;  %v4086_v4 = vsel %vm1252_vm15, %v1292_v31, %v1300_v59  ;;  %v1316_v45 = vadd.s32 %v1284_v0, %v3982_v43 }
 0x14d   :  { %v1324_v1 = vsub.s32 %v3982_v43, %v1284_v0  ;;  %v4092_v17 = vsel %vm1245_vm8, %v1309_v29, %v1317_v41  ;;  %v4096_v63 = vsel %vm1246_vm9, %v1310_v50, %v1318_v46  ;;  %v4100_v42 = vsel %vm1247_vm10, %v1311_v54, %v1319_v40 }
 0x14e   :  { %v4104_v2 = vsel %vm1248_vm11, %v1312_v19, %v1320_v10  ;;  %v4108_v20 = vsel %vm1249_vm12, %v1313_v23, %v1321_v60  ;;  %v4112_v11 = vsel %vm1250_vm13, %v1314_v28, %v1322_v5  ;;  %vm1333_vm0 = vcmp.gt.s32.totalorder %v3993_v14, 0 }
 0x14f   :  { %v4117_v58 = vsel %vm1251_vm14, %v1315_v39, %v1323_v56  ;;  %vm1334_vm1 = vcmp.gt.s32.totalorder %v3996_v8, 0  ;;  %vm1335_vm2 = vcmp.gt.s32.totalorder %v3999_v22, 0  ;;  %vm1336_vm3 = vcmp.gt.s32.totalorder %v4002_v49, 0 }
 0x150   :  { %vm1337_vm4 = vcmp.gt.s32.totalorder %v4009_v24, 0  ;;  %vm1338_vm5 = vcmp.gt.s32.totalorder %v4012_v26, 0  ;;  %vm1339_vm6 = vcmp.gt.s32.totalorder %v4015_v16, 0  ;;  %vm1340_vm7 = vcmp.gt.s32.totalorder %v4018_v13, 0 }
 0x151   :  { %v4128_v25 = vsel %vm1252_vm15, %v1316_v45, %v1324_v1  ;;  %v1994_v52 = vmov 4294967292   ;;  %v1357_v62 = vshra.s32 %v4092_v17, 14  ;;  %v1358_v18 = vshra.s32 %v4096_v63, 14 }
 0x152   :  { %v1341_v15 = vsel %vm1333_vm0, 4, %v1994_v52  ;;  %v1342_v43 = vsel %vm1334_vm1, 4, %v1994_v52  ;;  %v1343_v30 = vsel %vm1335_vm2, 4, %v1994_v52  ;;  %v1344_v51 = vsel %vm1336_vm3, 4, %v1994_v52 }
 0x153   :  { %v1359_v47 = vshra.s32 %v4100_v42, 14  ;;  %v1345_v7 = vsel %vm1337_vm4, 4, %v1994_v52  ;;  %v1346_v44 = vsel %vm1338_vm5, 4, %v1994_v52  ;;  %v1347_v0 = vsel %vm1339_vm6, 4, %v1994_v52 }
 0x154   :  { %v1348_v9 = vsel %vm1340_vm7, 4, %v1994_v52  ;;  %v4150_v3 = vsub.s32 %v3993_v14, %v1341_v15  ;;  %v1360_v21 = vshra.s32 %v4104_v2, 14  ;;  %v1361_v31 = vshra.s32 %v4108_v20, 14 }
 0x155   :  { %v1362_v12 = vshra.s32 %v4112_v11, 14  ;;  %v4156_v38 = vsub.s32 %v3996_v8, %v1342_v43  ;;  %v4159_v61 = vsub.s32 %v3999_v22, %v1343_v30  ;;  %v4162_v59 = vsub.s32 %v4002_v49, %v1344_v51 }
 0x156   :  { %v1363_v29 = vshra.s32 %v4117_v58, 14  ;;  %v4166_v50 = vsub.s32 %v4009_v24, %v1345_v7  ;;  %v4169_v54 = vsub.s32 %v4012_v26, %v1346_v44  ;;  %v4172_v19 = vsub.s32 %v4015_v16, %v1347_v0 }
 0x157   :  { %v4175_v41 = vsub.s32 %v4018_v13, %v1348_v9  ;;  %v1364_v46 = vshra.s32 %v4128_v25, 14  ;;  %v1365_v40 = vshra.s32 %v4048_v53, 14  ;;  %v1373_v10 = vsub.s32 %v4048_v53, %v1357_v62 }
 0x158   :  { %v1374_v23 = vsub.s32 %v4052_v6, %v1358_v18  ;;  %v1375_v28 = vsub.s32 %v4056_v37, %v1359_v47  ;;  %v1376_v60 = vsub.s32 %v4060_v48, %v1360_v21  ;;  %v1377_v5 = vsub.s32 %v4072_v27, %v1361_v31 }
 0x159   :  { %v1378_v39 = vsub.s32 %v4076_v55, %v1362_v12  ;;  %v1379_v56 = vsub.s32 %v4082_v57, %v1363_v29  ;;  %v1381_v45 = vadd.s32 %v1357_v62, %v4048_v53  ;;  %v1382_v1 = vadd.s32 %v1358_v18, %v4052_v6 }
 0x15a   :  { %v1383_v52 = vadd.s32 %v1359_v47, %v4056_v37  ;;  %v1384_v15 = vadd.s32 %v1360_v21, %v4060_v48  ;;  %v1385_v43 = vadd.s32 %v1361_v31, %v4072_v27  ;;  %v1386_v30 = vadd.s32 %v1362_v12, %v4076_v55 }
 0x15b   :  { %v1387_v51 = vadd.s32 %v1363_v29, %v4082_v57  ;;  %v1366_v7 = vshra.s32 %v4052_v6, 14  ;;  %v1367_v44 = vshra.s32 %v4056_v37, 14  ;;  %v1368_v0 = vshra.s32 %v4060_v48, 14 }
 0x15c   :  { %v1369_v53 = vshra.s32 %v4072_v27, 14  ;;  %v1370_v62 = vshra.s32 %v4076_v55, 14  ;;  %v1371_v18 = vshra.s32 %v4082_v57, 14  ;;  %v1380_v47 = vsub.s32 %v4086_v4, %v1364_v46 }
 0x15d   :  { %v1388_v9 = vadd.s32 %v1364_v46, %v4086_v4  ;;  %v1372_v21 = vshra.s32 %v4086_v4, 14  ;;  %v4204_v31 = vsel %vm1333_vm0, %v1373_v10, %v1381_v45  ;;  %v4208_v37 = vsel %vm1334_vm1, %v1374_v23, %v1382_v1 }
 0x15e   :  { %v4212_v6 = vsel %vm1335_vm2, %v1375_v28, %v1383_v52  ;;  %v4216_v48 = vsel %vm1336_vm3, %v1376_v60, %v1384_v15  ;;  %v4220_v27 = vsel %vm1337_vm4, %v1377_v5, %v1385_v43  ;;  %v4224_v55 = vsel %vm1338_vm5, %v1378_v39, %v1386_v30 }
 0x15f   :  { %v4228_v57 = vsel %vm1339_vm6, %v1379_v56, %v1387_v51  ;;  %v1397_v4 = vadd.s32 %v1365_v40, %v4092_v17  ;;  %v1398_v12 = vadd.s32 %v1366_v7, %v4096_v63  ;;  %v1405_v29 = vsub.s32 %v4092_v17, %v1365_v40 }
 0x160   :  { %v1406_v46 = vsub.s32 %v4096_v63, %v1366_v7  ;;  %v4236_v10 = vsel %vm1340_vm7, %v1380_v47, %v1388_v9  ;;  %v1399_v23 = vadd.s32 %v1367_v44, %v4100_v42  ;;  %v1400_v28 = vadd.s32 %v1368_v0, %v4104_v2 }
 0x161   :  { %v1401_v60 = vadd.s32 %v1369_v53, %v4108_v20  ;;  %v1402_v5 = vadd.s32 %v1370_v62, %v4112_v11  ;;  %v1403_v39 = vadd.s32 %v1371_v18, %v4117_v58  ;;  %v1404_v56 = vadd.s32 %v1372_v21, %v4128_v25 }
 0x162   :  { %v1407_v17 = vsub.s32 %v4100_v42, %v1367_v44  ;;  %v1408_v63 = vsub.s32 %v4104_v2, %v1368_v0  ;;  %v1409_v40 = vsub.s32 %v4108_v20, %v1369_v53  ;;  %v1410_v45 = vsub.s32 %v4112_v11, %v1370_v62 }
 0x163   :  { %v1411_v1 = vsub.s32 %v4117_v58, %v1371_v18  ;;  %v1412_v52 = vsub.s32 %v4128_v25, %v1372_v21  ;;  %v4252_v15 = vsel %vm1333_vm0, %v1397_v4, %v1405_v29  ;;  %v4256_v43 = vsel %vm1334_vm1, %v1398_v12, %v1406_v46 }
 0x164   :  { %vm1421_vm8 = vcmp.gt.s32.totalorder %v4150_v3, 0  ;;  %vm1422_vm9 = vcmp.gt.s32.totalorder %v4156_v38, 0  ;;  %vm1423_vm10 = vcmp.gt.s32.totalorder %v4159_v61, 0  ;;  %vm1424_vm11 = vcmp.gt.s32.totalorder %v4162_v59, 0 }
 0x165   :  { %vm1425_vm12 = vcmp.gt.s32.totalorder %v4166_v50, 0  ;;  %vm1426_vm13 = vcmp.gt.s32.totalorder %v4169_v54, 0  ;;  %vm1427_vm14 = vcmp.gt.s32.totalorder %v4172_v19, 0  ;;  %vm1428_vm15 = vcmp.gt.s32.totalorder %v4175_v41, 0 }
 0x166   :  { %v4268_v14 = vsel %vm1335_vm2, %v1399_v23, %v1407_v17  ;;  %v4272_v8 = vsel %vm1336_vm3, %v1400_v28, %v1408_v63  ;;  %v4276_v42 = vsel %vm1337_vm4, %v1401_v60, %v1409_v40  ;;  %v4280_v2 = vsel %vm1338_vm5, %v1402_v5, %v1410_v45 }
 0x167   :  { %v1995_v20 = vmov 4294967294   ;;  %v1419_v51 = vsel %vm1339_vm6, %v1403_v39, %v1411_v1  ;;  %v1420_v7 = vsel %vm1340_vm7, %v1404_v56, %v1412_v52  ;;  %v1445_v44 = vshra.s32 %v4252_v15, 15 }
 0x168   :  { %v4284_v11 = vsel %vm1421_vm8, 2, %v1995_v20  ;;  %v4288_v22 = vsel %vm1422_vm9, 2, %v1995_v20  ;;  %v4292_v49 = vsel %vm1423_vm10, 2, %v1995_v20  ;;  %v4296_v24 = vsel %vm1424_vm11, 2, %v1995_v20 }
 0x169   :  { %v4300_v26 = vsel %vm1425_vm12, 2, %v1995_v20  ;;  %v4304_v58 = vsel %vm1426_vm13, 2, %v1995_v20  ;;  %v4308_v25 = vsel %vm1427_vm14, 2, %v1995_v20  ;;  %v4312_v30 = vsel %vm1428_vm15, 2, %v1995_v20 }
 0x16a   :  { %v1446_v0 = vshra.s32 %v4256_v43, 15  ;;  %v1447_v4 = vshra.s32 %v4268_v14, 15  ;;  %v1448_v12 = vshra.s32 %v4272_v8, 15  ;;  %v1449_v29 = vshra.s32 %v4276_v42, 15 }
 0x16b   :  { %v1450_v46 = vshra.s32 %v4280_v2, 15  ;;  %v1451_v23 = vshra.s32 %v1419_v51, 15  ;;  %v1452_v28 = vshra.s32 %v1420_v7, 15  ;;  %v1453_v60 = vshra.s32 %v4204_v31, 15 }
 0x16c   :  { %v1454_v5 = vshra.s32 %v4208_v37, 15  ;;  %v1455_v39 = vshra.s32 %v4212_v6, 15  ;;  %v1456_v56 = vshra.s32 %v4216_v48, 15  ;;  %v1457_v17 = vshra.s32 %v4220_v27, 15 }
 0x16d   :  { %v1458_v63 = vshra.s32 %v4224_v55, 15  ;;  %v1461_v40 = vsub.s32 %v4204_v31, %v1445_v44  ;;  %v1462_v45 = vsub.s32 %v4208_v37, %v1446_v0  ;;  %v1469_v1 = vadd.s32 %v1445_v44, %v4204_v31 }
 0x16e   :  { %v1470_v52 = vadd.s32 %v1446_v0, %v4208_v37  ;;  %v1459_v20 = vshra.s32 %v4228_v57, 15  ;;  %v1460_v21 = vshra.s32 %v4236_v10, 15  ;;  %v1463_v9 = vsub.s32 %v4212_v6, %v1447_v4 }
 0x16f   :  { %v1464_v47 = vsub.s32 %v4216_v48, %v1448_v12  ;;  %v1465_v13 = vsub.s32 %v4220_v27, %v1449_v29  ;;  %v1466_v16 = vsub.s32 %v4224_v55, %v1450_v46  ;;  %v1467_v18 = vsub.s32 %v4228_v57, %v1451_v23 }
 0x170   :  { %v1468_v62 = vsub.s32 %v4236_v10, %v1452_v28  ;;  %v1471_v31 = vadd.s32 %v1447_v4, %v4212_v6  ;;  %v1472_v37 = vadd.s32 %v1448_v12, %v4216_v48  ;;  %v1473_v44 = vadd.s32 %v1449_v29, %v4220_v27 }
 0x171   :  { %v1474_v0 = vadd.s32 %v1450_v46, %v4224_v55  ;;  %v1475_v53 = vadd.s32 %v1451_v23, %v4228_v57  ;;  %v1476_v36 = vadd.s32 %v1452_v28, %v4236_v10  ;;  %v4366_v35 = vsel %vm1421_vm8, %v1461_v40, %v1469_v1 }
 0x172   :  { %v4370_v34 = vsel %vm1422_vm9, %v1462_v45, %v1470_v52  ;;  %v1485_v6 = vadd.s32 %v1453_v60, %v4252_v15  ;;  %v1486_v48 = vadd.s32 %v1454_v5, %v4256_v43  ;;  %v1487_v27 = vadd.s32 %v1455_v39, %v4268_v14 }
 0x173   :  { %v1488_v55 = vadd.s32 %v1456_v56, %v4272_v8  ;;  %v1493_v57 = vsub.s32 %v4252_v15, %v1453_v60  ;;  %v1494_v10 = vsub.s32 %v4256_v43, %v1454_v5  ;;  %v1495_v4 = vsub.s32 %v4268_v14, %v1455_v39 }
 0x174   :  { %v1496_v12 = vsub.s32 %v4272_v8, %v1456_v56  ;;  %v1489_v29 = vadd.s32 %v1457_v17, %v4276_v42  ;;  %v1490_v46 = vadd.s32 %v1458_v63, %v4280_v2  ;;  %v1497_v23 = vsub.s32 %v4276_v42, %v1457_v17 }
 0x175   :  { %v1498_v28 = vsub.s32 %v4280_v2, %v1458_v63  ;;  %v1491_v40 = vadd.s32 %v1459_v20, %v1419_v51  ;;  %v1492_v45 = vadd.s32 %v1460_v21, %v1420_v7  ;;  %v1499_v1 = vsub.s32 %v1419_v51, %v1459_v20 }
 0x176   :  { %v1500_v52 = vsub.s32 %v1420_v7, %v1460_v21  ;;  %v4386_v15 = vsel %vm1423_vm10, %v1463_v9, %v1471_v31  ;;  %v4390_v43 = vsel %vm1424_vm11, %v1464_v47, %v1472_v37  ;;  %v4394_v14 = vsel %vm1425_vm12, %v1465_v13, %v1473_v44 }
 0x177   :  { %v4398_v8 = vsel %vm1426_vm13, %v1466_v16, %v1474_v0  ;;  %v4402_v42 = vsel %vm1421_vm8, %v1485_v6, %v1493_v57  ;;  %v4406_v2 = vsel %vm1422_vm9, %v1486_v48, %v1494_v10  ;;  %v4410_v51 = vsel %vm1423_vm10, %v1487_v27, %v1495_v4 }
 0x178   :  { %v4414_v7 = vsel %vm1424_vm11, %v1488_v55, %v1496_v12  ;;  %v4418_v16 = vsel %vm1427_vm14, %v1467_v18, %v1475_v53  ;;  %v4422_v13 = vsel %vm1428_vm15, %v1468_v62, %v1476_v36  ;;  %v4426_v47 = vsel %vm1425_vm12, %v1489_v29, %v1497_v23 }
 0x179   :  { %v4430_v9 = vsel %vm1426_vm13, %v1490_v46, %v1498_v28  ;;  %v4434_v21 = vsel %vm1427_vm14, %v1491_v40, %v1499_v1  ;;  %v4438_v53 = vsel %vm1428_vm15, %v1492_v45, %v1500_v52  ;;  %v5011_v36 = vsub.s32 %v4150_v3, %v4284_v11 }
 0x17a   :  { %v5014_v18 = vsub.s32 %v4156_v38, %v4288_v22  ;;  %v1517_v5 = vshra.s32 %v4402_v42, 16  ;;  %v1518_v39 = vshra.s32 %v4406_v2, 16  ;;  %v1519_v56 = vshra.s32 %v4410_v51, 16 }
 0x17b   :  { %vm4443_vm0 = vcmp.gt.s32.totalorder %v5011_v36, 0  ;;  %v1520_v17 = vshra.s32 %v4414_v7, 16  ;;  %v5017_v3 = vsub.s32 %v4159_v61, %v4292_v49  ;;  %v5020_v38 = vsub.s32 %v4162_v59, %v4296_v24 }
 0x17c   :  { %vm4450_vm1 = vcmp.gt.s32.totalorder %v5014_v18, 0  ;;  %v1521_v63 = vshra.s32 %v4426_v47, 16  ;;  %v1522_v20 = vshra.s32 %v4430_v9, 16  ;;  %v5023_v31 = vsub.s32 %v4166_v50, %v4300_v26 }
 0x17d   :  { %vm4461_vm2 = vcmp.gt.s32.totalorder %v5017_v3, 0  ;;  %vm4468_vm3 = vcmp.gt.s32.totalorder %v5020_v38, 0  ;;  %v5026_v49 = vsub.s32 %v4169_v54, %v4304_v58  ;;  %v5029_v24 = vsub.s32 %v4172_v19, %v4308_v25 }
 0x17e   :  { %vm4477_vm4 = vcmp.gt.s32.totalorder %v5023_v31, 0  ;;  %v5030_v37 = vmov 0  ;;  %v5033_v50 = vsub.s32 %v4175_v41, %v4312_v30  ;;  %v5034_v26 = vmov 0 }
 0x17f   :  { %vm4484_vm5 = vcmp.gt.s32.totalorder %v5026_v49, 0  ;;  %vm4491_vm6 = vcmp.gt.s32.totalorder %v5029_v24, 0  ;;  %v1523_v54 = vshra.s32 %v4434_v21, 16  ;;  %v1524_v58 = vshra.s32 %v4438_v53, 16 }
 0x180   :  { %v5031_v37 = vsel %vm4491_vm6, 4294967295, %v5030_v37  ;;  %vm4498_vm7 = vcmp.gt.s32.totalorder %v5033_v50, 0  ;;  %v1525_v44 = vshra.s32 %v4366_v35, 16  ;;  %v1526_v0 = vshra.s32 %v4370_v34, 16 }
 0x181   :  { %5032 = vst [vmem:[#allocation27_spill] sm:$0xff] %v5031_v37  ;;  %v5035_v26 = vsel %vm4498_vm7, 4294967295, %v5034_v26  ;;  %v1533_v19 = vsub.s32 %v4366_v35, %v1517_v5  ;;  %v1534_v25 = vsub.s32 %v4370_v34, %v1518_v39  ;;  %v1535_v6 = vsub.s32 %v4386_v15, %v1519_v56 }
 0x182   :  { %5036 = vst [vmem:[#allocation28_spill] sm:$0xff] %v5035_v26  ;;  %v1536_v41 = vsub.s32 %v4390_v43, %v1520_v17  ;;  %v1537_v30 = vsub.s32 %v4394_v14, %v1521_v63  ;;  %v1538_v48 = vsub.s32 %v4398_v8, %v1522_v20  ;;  %v1541_v27 = vadd.s32 %v1517_v5, %v4366_v35 }
 0x183   :  { %v1542_v55 = vadd.s32 %v1518_v39, %v4370_v34  ;;  %v1543_v57 = vadd.s32 %v1519_v56, %v4386_v15  ;;  %v1544_v10 = vadd.s32 %v1520_v17, %v4390_v43  ;;  %v1545_v4 = vadd.s32 %v1521_v63, %v4394_v14 }
 0x184   :  { %v1546_v12 = vadd.s32 %v1522_v20, %v4398_v8  ;;  %v1539_v29 = vsub.s32 %v4418_v16, %v1523_v54  ;;  %v1540_v46 = vsub.s32 %v4422_v13, %v1524_v58  ;;  %v1547_v23 = vadd.s32 %v1523_v54, %v4418_v16 }
 0x185   :  { %v1548_v28 = vadd.s32 %v1524_v58, %v4422_v13  ;;  %v1527_v35 = vshra.s32 %v4386_v15, 16  ;;  %v1528_v34 = vshra.s32 %v4390_v43, 16  ;;  %v1529_v40 = vshra.s32 %v4394_v14, 16 }
 0x186   :  { %v1530_v45 = vshra.s32 %v4398_v8, 16  ;;  %v1531_v1 = vshra.s32 %v4418_v16, 16  ;;  %v1532_v52 = vshra.s32 %v4422_v13, 16  ;;  %v1549_v36 = vsel %vm4443_vm0, %v1533_v19, %v1541_v27 }
 0x187   :  { %v1550_v18 = vsel %vm4450_vm1, %v1534_v25, %v1542_v55  ;;  %v4534_v5 = vsel %vm4461_vm2, %v1535_v6, %v1543_v57  ;;  %v4538_v15 = vsel %vm4468_vm3, %v1536_v41, %v1544_v10  ;;  %v4542_v43 = vsel %vm4477_vm4, %v1537_v30, %v1545_v4 }
 0x188   :  { %v4546_v14 = vsel %vm4484_vm5, %v1538_v48, %v1546_v12  ;;  %v4550_v8 = vsel %vm4491_vm6, %v1539_v29, %v1547_v23  ;;  %v4554_v16 = vsel %vm4498_vm7, %v1540_v46, %v1548_v28  ;;  %v1557_v13 = vadd.s32 %v1525_v44, %v4402_v42 }
 0x189   :  { %v1558_v39 = vadd.s32 %v1526_v0, %v4406_v2  ;;  %v1559_v56 = vadd.s32 %v1527_v35, %v4410_v51  ;;  %v1560_v17 = vadd.s32 %v1528_v34, %v4414_v7  ;;  %v1561_v3 = vadd.s32 %v1529_v40, %v4426_v47 }
 0x18a   :  { %v1562_v38 = vadd.s32 %v1530_v45, %v4430_v9  ;;  %v1563_v63 = vadd.s32 %v1531_v1, %v4434_v21  ;;  %v1564_v20 = vadd.s32 %v1532_v52, %v4438_v53  ;;  %v1581_v31 = vshra.s32 %v1549_v36, 8 }
 0x18b   :  { %v1582_v49 = vshra.s32 %v1550_v18, 8  ;;  %v1583_v24 = vshra.s32 %v4534_v5, 8  ;;  %v1584_v50 = vshra.s32 %v4538_v15, 8  ;;  %v1585_v54 = vshra.s32 %v4542_v43, 8 }
 0x18c   :  { %v1586_v58 = vshra.s32 %v4546_v14, 8  ;;  %v1587_v19 = vshra.s32 %v4550_v8, 8  ;;  %v1588_v25 = vshra.s32 %v4554_v16, 8  ;;  %v1589_v6 = vshll.u32 %v1581_v31, 8 }
 0x18d   :  { %v1590_v41 = vshll.u32 %v1582_v49, 8  ;;  %v1591_v30 = vshll.u32 %v1583_v24, 8  ;;  %v1592_v48 = vshll.u32 %v1584_v50, 8  ;;  %v1593_v27 = vshll.u32 %v1585_v54, 8 }
 0x18e   :  { %v1594_v55 = vshll.u32 %v1586_v58, 8  ;;  %v1565_v57 = vsub.s32 %v4402_v42, %v1525_v44  ;;  %v1566_v10 = vsub.s32 %v4406_v2, %v1526_v0  ;;  %v1595_v4 = vshll.u32 %v1587_v19, 8 }
 0x18f   :  { %v1596_v12 = vshll.u32 %v1588_v25, 8  ;;  %v1567_v29 = vsub.s32 %v4410_v51, %v1527_v35  ;;  %v1568_v46 = vsub.s32 %v4414_v7, %v1528_v34  ;;  %v1569_v23 = vsub.s32 %v4426_v47, %v1529_v40 }
 0x190   :  { %v1570_v28 = vsub.s32 %v4430_v9, %v1530_v45  ;;  %v1571_v33 = vsub.s32 %v4434_v21, %v1531_v1  ;;  %v1572_v32 = vsub.s32 %v4438_v53, %v1532_v52  ;;  %v1597_v26 = vsub.s32 %v1549_v36, %v1589_v6 }
 0x191   :  { %v1598_v37 = vsub.s32 %v1550_v18, %v1590_v41  ;;  %v1599_v42 = vsub.s32 %v4534_v5, %v1591_v30  ;;  %v1600_v2 = vsub.s32 %v4538_v15, %v1592_v48  ;;  %v1601_v44 = vsub.s32 %v4542_v43, %v1593_v27 }
 0x192   :  { %v1602_v51 = vsub.s32 %v4546_v14, %v1594_v55  ;;  %v4584_v7 = vsel %vm4443_vm0, %v1557_v13, %v1565_v57  ;;  %v4588_v47 = vsel %vm4450_vm1, %v1558_v39, %v1566_v10  ;;  %v1603_v9 = vsub.s32 %v4550_v8, %v1595_v4 }
 0x193   :  { %v1604_v21 = vsub.s32 %v4554_v16, %v1596_v12  ;;  %v4594_v53 = vsel %vm4461_vm2, %v1559_v56, %v1567_v29  ;;  %v4598_v0 = vsel %vm4468_vm3, %v1560_v17, %v1568_v46  ;;  %v4602_v62 = vsel %vm4477_vm4, %v1561_v3, %v1569_v23 }
 0x194   :  { %v4606_v60 = vsel %vm4484_vm5, %v1562_v38, %v1570_v28  ;;  %v4610_v34 = vsel %vm4491_vm6, %v1563_v63, %v1571_v33  ;;  %v4614_v11 = vsel %vm4498_vm7, %v1564_v20, %v1572_v32  ;;  %v1613_v45 = vmul.u32 56281, %v1597_v26 }
 0x195   :  { %v1614_v22 = vmul.u32 56281, %v1598_v37  ;;  %v4616_v1 = vmul.u32 56281, %v1599_v42  ;;  %v4618_v52 = vmul.u32 56281, %v1600_v2  ;;  %v4620_v61 = vmul.u32 56281, %v1601_v44 }
 0x196   :  { %v4622_v36 = vmul.u32 56281, %v1602_v51  ;;  %v1605_v59 = vmul.u32 56281, %v1581_v31  ;;  %v1606_v18 = vmul.u32 56281, %v1582_v49  ;;  %v4624_v5 = vmul.u32 56281, %v1603_v9 }
 0x197   :  { %v4626_v33 = vmul.u32 56281, %v1604_v21  ;;  %v4628_v15 = vmul.u32 56281, %v1583_v24  ;;  %v4630_v32 = vmul.u32 56281, %v1584_v50  ;;  %v4632_v26 = vmul.u32 56281, %v1585_v54 }
 0x198   :  { %v4634_v37 = vmul.u32 56281, %v1586_v58  ;;  %v4636_v43 = vmul.u32 56281, %v1587_v19  ;;  %v4638_v14 = vmul.u32 56281, %v1588_v25  ;;  %v1621_v8 = vshra.s32 %v1613_v45, 8 }
 0x199   :  { %v1622_v16 = vshra.s32 %v1614_v22, 8  ;;  %v1623_v13 = vshra.s32 %v4616_v1, 8  ;;  %v1624_v39 = vshra.s32 %v4618_v52, 8  ;;  %v1625_v56 = vshra.s32 %v4620_v61, 8 }
 0x19a   :  { %v1626_v17 = vshra.s32 %v4622_v36, 8  ;;  %v1627_v3 = vshra.s32 %v4624_v5, 8  ;;  %v1628_v38 = vshra.s32 %v4626_v33, 8  ;;  %v1645_v63 = vshra.s32 %v4584_v7, 8 }
 0x19b   :  { %v1646_v20 = vshra.s32 %v4588_v47, 8  ;;  %v1647_v31 = vshra.s32 %v4594_v53, 8  ;;  %v1648_v49 = vshra.s32 %v4598_v0, 8  ;;  %v1649_v24 = vshra.s32 %v4602_v62, 8 }
 0x19c   :  { %v1650_v50 = vshra.s32 %v4606_v60, 8  ;;  %v1651_v54 = vshra.s32 %v4610_v34, 8  ;;  %v1652_v58 = vshra.s32 %v4614_v11, 8  ;;  %v1653_v19 = vshll.u32 %v1645_v63, 8 }
 0x19d   :  { %v1654_v25 = vshll.u32 %v1646_v20, 8  ;;  %v1655_v6 = vshll.u32 %v1647_v31, 8  ;;  %v1656_v41 = vshll.u32 %v1648_v49, 8  ;;  %v1657_v30 = vshll.u32 %v1649_v24, 8 }
 0x19e   :  { %v1658_v48 = vshll.u32 %v1650_v50, 8  ;;  %v1659_v27 = vshll.u32 %v1651_v54, 8  ;;  %v1660_v55 = vshll.u32 %v1652_v58, 8  ;;  %v1661_v57 = vsub.s32 %v4584_v7, %v1653_v19 }
 0x19f   :  { %v1662_v10 = vsub.s32 %v4588_v47, %v1654_v25  ;;  %v1663_v4 = vsub.s32 %v4594_v53, %v1655_v6  ;;  %v1664_v12 = vsub.s32 %v4598_v0, %v1656_v41  ;;  %v1665_v29 = vsub.s32 %v4602_v62, %v1657_v30 }
 0x1a0   :  { %v1666_v46 = vsub.s32 %v4606_v60, %v1658_v48  ;;  %v4660_v23 = vadd.s32 %v1621_v8, %v1605_v59  ;;  %v4662_v28 = vadd.s32 %v1622_v16, %v1606_v18  ;;  %v1667_v42 = vsub.s32 %v4610_v34, %v1659_v27 }
 0x1a1   :  { %v1668_v2 = vsub.s32 %v4614_v11, %v1660_v55  ;;  %v1669_v44 = vmul.u32 56281, %v1645_v63  ;;  %v1670_v51 = vmul.u32 56281, %v1646_v20  ;;  %v1671_v7 = vmul.u32 56281, %v1647_v31 }
 0x1a2   :  { %v1672_v47 = vmul.u32 56281, %v1648_v49  ;;  %v1673_v9 = vmul.u32 56281, %v1649_v24  ;;  %v1674_v21 = vmul.u32 56281, %v1650_v50  ;;  %v1677_v53 = vmul.u32 56281, %v1661_v57  ;;  %v5039_v57 = vld [vmem:[#allocation11_spill] sm:$0xff] }
 0x1a3   :  { %v1678_v0 = vmul.u32 56281, %v1662_v10  ;;  %v1679_v35 = vmul.u32 56281, %v1663_v4  ;;  %v1680_v62 = vmul.u32 56281, %v1664_v12  ;;  %v1681_v40 = vmul.u32 56281, %v1665_v29  ;;  %v5040_v4 = vld [vmem:[#allocation12_spill] sm:$0xff]  ;;  %v5041_v29 = vld [vmem:[#allocation13_spill] sm:$0xff] }
 0x1a4   :  { %v1682_v60 = vmul.u32 56281, %v1666_v46  ;;  %v1683_v45 = vmul.u32 56281, %v1667_v42  ;;  %v1684_v22 = vmul.u32 56281, %v1668_v2  ;;  %v1685_v1 = vshra.s32 %v1677_v53, 8  ;;  %v5042_v42 = vld [vmem:[#allocation14_spill] sm:$0xff]  ;;  %v5046_v53 = vld [vmem:[#allocation20_spill] sm:$0xff] }
 0x1a5   :  { %v1686_v52 = vshra.s32 %v1678_v0, 8  ;;  %v1687_v61 = vshra.s32 %v1679_v35, 8  ;;  %v1688_v34 = vshra.s32 %v1680_v62, 8  ;;  %v1689_v36 = vshra.s32 %v1681_v40, 8  ;;  %v5047_v35 = vld [vmem:[#allocation17_spill] sm:$0xff]  ;;  %v5048_v40 = vld [vmem:[#allocation18_spill] sm:$0xff] }
 0x1a6   :  { %v1690_v11 = vshra.s32 %v1682_v60, 8  ;;  %v1675_v59 = vmul.u32 56281, %v1651_v54  ;;  %v1676_v18 = vmul.u32 56281, %v1652_v58  ;;  %v1691_v5 = vshra.s32 %v1683_v45, 8  ;;  %v5049_v45 = vld [vmem:[#allocation21_spill] sm:$0xff] }
 0x1a7   :  { %v1692_v33 = vshra.s32 %v1684_v22, 8  ;;  %v4667_v8 = vadd.s32 %v1623_v13, %v4628_v15  ;;  %v4670_v16 = vadd.s32 %v1624_v39, %v4630_v32  ;;  %v4673_v63 = vadd.s32 %v1625_v56, %v4632_v26 }
 0x1a8   :  { %v4676_v20 = vadd.s32 %v1626_v17, %v4634_v37  ;;  %v4679_v31 = vadd.s32 %v1627_v3, %v4636_v43  ;;  %v4682_v49 = vadd.s32 %v1628_v38, %v4638_v14  ;;  %v4684_v24 = vadd.s32 %v1685_v1, %v1669_v44  ;;  %v5043_v44 = vld [vmem:[#allocation15_spill] sm:$0xff]  ;;  %v5050_v1 = vld [vmem:[#allocation22_spill] sm:$0xff] }
 0x1a9   :  { %v4686_v50 = vadd.s32 %v1686_v52, %v1670_v51  ;;  %v4688_v15 = vadd.s32 %v1687_v61, %v1671_v7  ;;  %v4690_v32 = vadd.s32 %v1688_v34, %v1672_v47  ;;  %v4692_v13 = vadd.s32 %v1689_v36, %v1673_v9  ;;  %v5044_v7 = vld [vmem:[#allocation16_spill] sm:$0xff]  ;;  %v5045_v9 = vld [vmem:[#allocation19_spill] sm:$0xff] }
 0x1aa   :  { %v4694_v26 = vadd.s32 %v1690_v11, %v1674_v21  ;;  %v1637_v37 = vshra.s32 %v4660_v23, 8  ;;  %v1638_v43 = vshra.s32 %v4662_v28, 8  ;;  %v4698_v39 = vadd.s32 %v1691_v5, %v1675_v59  ;;  %v5051_v61 = vld [vmem:[#allocation23_spill] sm:$0xff]  ;;  %v5052_v36 = vld [vmem:[#allocation24_spill] sm:$0xff]  ;;  %v5053_v59 = vld [vmem:[#allocation25_spill] sm:$0xff] }
 0x1ab   :  { %v4700_v14 = vadd.s32 %v1692_v33, %v1676_v18  ;;  %v1639_v56 = vshra.s32 %v4667_v8, 8  ;;  %v4981_v17 = vshra.s32 %v4670_v16, 8  ;;  %v4978_v3 = vshra.s32 %v4673_v63, 8  ;;  %v5054_v5 = vld [vmem:[#allocation26_spill] sm:$0xff] }
 0x1ac   :  { %v4980_v38 = vshra.s32 %v4676_v20, 8  ;;  %v1701_v19 = vshra.s32 %v4684_v24, 8  ;;  %v1702_v25 = vshra.s32 %v4686_v50, 8  ;;  %v1703_v6 = vshra.s32 %v4688_v15, 8 }
 0x1ad   :  { %v4982_v41 = vshra.s32 %v4690_v32, 8  ;;  %v4979_v30 = vshra.s32 %v4692_v13, 8  ;;  %v1725_v10 = vadd.s32 2, %v5039_v57  ;;  %v1726_v12 = vadd.s32 2, %v5040_v4 }
 0x1ae   :  { %v1727_v46 = vadd.s32 2, %v5041_v29  ;;  %v1728_v2 = vadd.s32 2, %v5042_v42  ;;  %v1729_v51 = vadd.s32 2, %v5043_v44  ;;  %v1730_v47 = vadd.s32 2, %v5044_v7 }
 0x1af   :  { %v1709_v21 = vand.u32 2, %v5045_v9  ;;  %v1710_v0 = vand.u32 2, %v5046_v53  ;;  %v1731_v62 = vadd.s32 2, %v5047_v35  ;;  %v1732_v60 = vadd.s32 2, %v5048_v40 }
 0x1b0   :  { %v1711_v22 = vand.u32 2, %v5049_v45  ;;  %v1712_v52 = vand.u32 2, %v5050_v1  ;;  %v1713_v34 = vand.u32 2, %v5051_v61  ;;  %v1714_v11 = vand.u32 2, %v5052_v36 }
 0x1b1   :  { %v1715_v18 = vand.u32 2, %v5053_v59  ;;  %v1716_v33 = vand.u32 2, %v5054_v5  ;;  %v1733_v55 = vand.u32 4, %v1725_v10  ;;  %v1734_v9 = vand.u32 4, %v1726_v12 }
 0x1b2   :  { %v1735_v58 = vand.u32 4, %v1727_v46  ;;  %v1736_v53 = vand.u32 4, %v1728_v2  ;;  %v1737_v27 = vand.u32 4, %v1729_v51  ;;  %v1738_v54 = vand.u32 4, %v1730_v47 }
 0x1b3   :  { %vm4732_vm8 = vcmp.ne.s32.totalorder %v1709_v21, 0  ;;  %vm4736_vm9 = vcmp.ne.s32.totalorder %v1710_v0, 0  ;;  %v1739_v1 = vand.u32 4, %v1731_v62  ;;  %v1740_v61 = vand.u32 4, %v1732_v60 }
 0x1b4   :  { %vm4740_vm10 = vcmp.ne.s32.totalorder %v1711_v22, 0  ;;  %vm4744_vm11 = vcmp.ne.s32.totalorder %v1712_v52, 0  ;;  %vm4748_vm12 = vcmp.ne.s32.totalorder %v1713_v34, 0  ;;  %vm4752_vm13 = vcmp.ne.s32.totalorder %v1714_v11, 0 }
 0x1b5   :  { %vm4756_vm14 = vcmp.ne.s32.totalorder %v1715_v18, 0  ;;  %vm4760_vm15 = vcmp.ne.s32.totalorder %v1716_v33, 0  ;;  %vm4764_vm0 = vcmp.ne.s32.totalorder %v1733_v55, 0  ;;  %vm4768_vm1 = vcmp.ne.s32.totalorder %v1734_v9, 0 }
 0x1b6   :  { %vm4772_vm2 = vcmp.ne.s32.totalorder %v1735_v58, 0  ;;  %vm4776_vm3 = vcmp.ne.s32.totalorder %v1736_v53, 0  ;;  %vm4780_vm4 = vcmp.ne.s32.totalorder %v1737_v27, 0  ;;  %vm4784_vm5 = vcmp.ne.s32.totalorder %v1738_v54, 0 }
 0x1b7   :  { %vm4788_vm6 = vcmp.ne.s32.totalorder %v1739_v1, 0  ;;  %vm4792_vm7 = vcmp.ne.s32.totalorder %v1740_v61, 0  ;;  %v1749_v52 = vand.u32 4, %v5039_v57  ;;  %v1750_v34 = vand.u32 4, %v5040_v4 }
 0x1b8   :  { %v1751_v27 = vand.u32 4, %v5041_v29  ;;  %v1752_v11 = vand.u32 4, %v5042_v42  ;;  %v1765_v54 = vsel %vm4732_vm8, %v1701_v19, %v1637_v37  ;;  %v1766_v57 = vsel %vm4736_vm9, %v1702_v25, %v1638_v43 }
 0x1b9   :  { %v1767_v4 = vsel %vm4740_vm10, %v1703_v6, %v1639_v56  ;;  %v1768_v29 = vsel %vm4744_vm11, %v4982_v41, %v4981_v17  ;;  %v1769_v42 = vsel %vm4748_vm12, %v4979_v30, %v4978_v3  ;;  %v5087_v59 = vshra.s32 %v4694_v26, 8 }
 0x1ba   :  { %v1753_v5 = vand.u32 4, %v5043_v44  ;;  %v1754_v33 = vand.u32 4, %v5044_v7  ;;  %v1755_v9 = vand.u32 4, %v5047_v35  ;;  %v5088_v53 = vshra.s32 %v4679_v31, 8 }
 0x1bb   :  { %v1770_v18 = vsel %vm4752_vm13, %v5087_v59, %v4980_v38  ;;  %v5089_v1 = vshra.s32 %v4698_v39, 8  ;;  %v5090_v3 = vshra.s32 %v4682_v49, 8  ;;  %v5091_v30 = vshra.s32 %v4700_v14, 8 }
 0x1bc   :  { %v1773_v44 = vsel %vm4732_vm8, %v1637_v37, %v1701_v19  ;;  %v1781_v7 = vsub.s32 0, %v1765_v54  ;;  %v1782_v35 = vsub.s32 0, %v1766_v57  ;;  %v1783_v38 = vsub.s32 0, %v1767_v4 }
 0x1bd   :  { %v1771_v61 = vsel %vm4756_vm14, %v5089_v1, %v5088_v53  ;;  %v1772_v59 = vsel %vm4760_vm15, %v5091_v30, %v5090_v3  ;;  %v1784_v17 = vsub.s32 0, %v1768_v29  ;;  %v1785_v41 = vsub.s32 0, %v1769_v42 }
 0x1be   :  { %v1786_v53 = vsub.s32 0, %v1770_v18  ;;  %v1774_v3 = vsel %vm4736_vm9, %v1638_v43, %v1702_v25  ;;  %v1787_v30 = vsub.s32 0, %v1771_v61  ;;  %v1789_v23 = vsel %vm4764_vm0, %v1781_v7, %v1765_v54 }
 0x1bf   :  { %v1790_v24 = vsel %vm4768_vm1, %v1782_v35, %v1766_v57  ;;  %v1775_v37 = vsel %vm4740_vm10, %v1639_v56, %v1703_v6  ;;  %v1788_v50 = vsub.s32 0, %v1772_v59  ;;  %v1791_v28 = vsel %vm4772_vm2, %v1783_v38, %v1767_v4  ;;  %1799 = vst [vmem:[#allocation5] sm:$0xff] %v1789_v23 }
 0x1c0   :  { %v1792_v43 = vsel %vm4776_vm3, %v1784_v17, %v1768_v29  ;;  %v1756_v19 = vand.u32 4, %v5048_v40  ;;  %v5092_v25 = vshra.s32 %v4690_v32, 8  ;;  %v5093_v48 = vshra.s32 %v4670_v16, 8  ;;  %1800 = vst [vmem:[#allocation5 + $0x8] sm:$0xff] %v1790_v24 }
 0x1c1   :  { %v1793_v15 = vsel %vm4780_vm4, %v1785_v41, %v1769_v42  ;;  %v1807_v56 = vsub.s32 0, %v1773_v44  ;;  %vm4886_vm8 = vcmp.ne.s32.totalorder %v1749_v52, 0  ;;  %v5096_v17 = vshra.s32 %v4692_v13, 8  ;;  %1801 = vst [vmem:[#allocation5 + $0x10] sm:$0xff] %v1791_v28 }
 0x1c2   :  { %v1776_v8 = vsel %vm4744_vm11, %v5093_v48, %v5092_v25  ;;  %v5097_v6 = vshra.s32 %v4673_v63, 8  ;;  %v1794_v16 = vsel %vm4784_vm5, %v1786_v53, %v1770_v18  ;;  %v1808_v40 = vsub.s32 0, %v1774_v3  ;;  %1802 = vst [vmem:[#allocation5 + $0x18] sm:$0xff] %v1792_v43 }
 0x1c3   :  { %vm4903_vm9 = vcmp.ne.s32.totalorder %v1750_v34, 0  ;;  %v5100_v63 = vshra.s32 %v4694_v26, 8  ;;  %v5101_v41 = vshra.s32 %v4676_v20, 8  ;;  %v1795_v36 = vsel %vm4788_vm6, %v1787_v30, %v1771_v61  ;;  %1803 = vst [vmem:[#allocation5 + $0x20] sm:$0xff] %v1793_v15 }
 0x1c4   :  { %v1777_v32 = vsel %vm4748_vm12, %v5097_v6, %v5096_v17  ;;  %v1809_v10 = vsub.s32 0, %v1775_v37  ;;  %vm4915_vm10 = vcmp.ne.s32.totalorder %v1751_v27, 0  ;;  %v5104_v47 = vmov %v5089_v1  ;;  %1804 = vst [vmem:[#allocation5 + $0x28] sm:$0xff] %v1794_v16 }
 0x1c5   :  { %v1778_v45 = vsel %vm4752_vm13, %v5101_v41, %v5100_v63  ;;  %v5105_v21 = vshra.s32 %v4679_v31, 8  ;;  %v1796_v20 = vsel %vm4792_vm7, %v1788_v50, %v1772_v59  ;;  %v1810_v46 = vsub.s32 0, %v1776_v8  ;;  %1805 = vst [vmem:[#allocation5 + $0x30] sm:$0xff] %v1795_v36 }
 0x1c6   :  { %vm4927_vm11 = vcmp.ne.s32.totalorder %v1752_v11, 0  ;;  %v5108_v62 = vshra.s32 %v4700_v14, 8  ;;  %v5109_v60 = vshra.s32 %v4682_v49, 8  ;;  %v1811_v31 = vsub.s32 0, %v1777_v32  ;;  %1806 = vst [vmem:[#allocation5 + $0x38] sm:$0xff] %v1796_v20 }
 0x1c7   :  { %v1779_v26 = vsel %vm4756_vm14, %v5105_v21, %v5104_v47  ;;  %v1815_v2 = vsel %vm4886_vm8, %v1807_v56, %v1773_v44  ;;  %vm1761_vm12 = vcmp.ne.s32.totalorder %v1753_v5, 0  ;;  %v1812_v55 = vsub.s32 0, %v1778_v45  ;;  %1843 = dma.vmem_to_hbm [thread:$0]  %s1839_s14, 1024, %s1841_s17, [#allocation4]  }
 0x1c8   :  { %v1780_v39 = vsel %vm4760_vm15, %v5109_v60, %v5108_v62  ;;  %v1816_v22 = vsel %vm4903_vm9, %v1808_v40, %v1774_v3  ;;  %vm1762_vm13 = vcmp.ne.s32.totalorder %v1754_v33, 0  ;;  %v1813_v14 = vsub.s32 0, %v1779_v26  ;;  %1825 = vst [vmem:[#allocation6] sm:$0xff] %v1815_v2 }
 0x1c9   :  { %v1817_v49 = vsel %vm4915_vm10, %v1809_v10, %v1775_v37  ;;  %vm1763_vm14 = vcmp.ne.s32.totalorder %v1755_v9, 0  ;;  %v1814_v51 = vsub.s32 0, %v1780_v39  ;;  %v1818_v58 = vsel %vm4927_vm11, %v1810_v46, %v1776_v8  ;;  %1826 = vst [vmem:[#allocation6 + $0x8] sm:$0xff] %v1816_v22 }
 0x1ca   :  { %vm1764_vm15 = vcmp.ne.s32.totalorder %v1756_v19, 0  ;;  %v1819_v52 = vsel %vm1761_vm12, %v1811_v31, %v1777_v32  ;;  %v1820_v34 = vsel %vm1762_vm13, %v1812_v55, %v1778_v45  ;;  %1827 = vst [vmem:[#allocation6 + $0x10] sm:$0xff] %v1817_v49  ;;  %v1821_v27 = vsel %vm1763_vm14, %v1813_v14, %v1779_v26 }
 0x1cb   :  { %1828 = vst [vmem:[#allocation6 + $0x18] sm:$0xff] %v1818_v58  ;;  %v1822_v11 = vsel %vm1764_vm15, %v1814_v51, %v1780_v39 }
 0x1cc   :  { %1829 = vst [vmem:[#allocation6 + $0x20] sm:$0xff] %v1819_v52 }
 0x1cd   :  { %1830 = vst [vmem:[#allocation6 + $0x28] sm:$0xff] %v1820_v34 }
 0x1ce   :  { %1831 = vst [vmem:[#allocation6 + $0x30] sm:$0xff] %v1821_v27 }
 0x1cf   :  { %1832 = vst [vmem:[#allocation6 + $0x38] sm:$0xff] %v1822_v11 }
 0x1d0   :  { %1854 = dma.vmem_to_hbm [thread:$0]  %s1850_s18, 1024, %s1852_s21, [#allocation7]  }
 0x1d1   :  { %1975 = dma.done.wait [#allocation4], 1024  }
 0x1d2   :  { %1976 = vsyncadd [#allocation4], 4294966272 }
 0x1d3   :  { %1977 = dma.done.wait [#allocation7], 1024  }
 0x1d4   :  { %1978 = vsyncadd [#allocation7], 4294966272 }
 0x1d5   :  { %1863 = vsyncpa [#allocation3], 1 }
 0x1d6   :  { %1864 = vsyncpa [#allocation4], 1 }
 0x1d7   :  { %1865 = vsyncpa [#allocation7], 1 }

</bundles_post_ra>
